<compile_context>
chip_gen: v5e
topology: v5e:2x2
jax: 0.10.0
libtpu: 0.0.40
codegen_flags: <defaults>
</compile_context>

<pallas_src>
import functools
import math

import jax
import jax.numpy as jnp
from jax.experimental import pallas as pl
from jax.experimental.pallas import tpu as pltpu

D = 128       # embedding dim, fixed by the module
LANES = 128   # lane-dense width for the scores scratch / HBM output block


def _node2vec_kernel(B, L, s_ref, idx_ref, x_ref, o_ref, src_ref, rows_ref, scores_ref):
    """One grid step == one (s, w, neg) problem.

    s_ref:      (G*B,)        i32 SMEM  0-based start-node ids     (scalar prefetch)
    idx_ref:    (G*B*L,)      i32 SMEM  0-based ids of cat(w,neg)  (scalar prefetch)
    x_ref:      (N, D)        f32 VMEM  whole embedding table (single-buffered)
    o_ref:      (1, 1, 128)   f32 VMEM  lane l: -sum_b log softmax_b(scores)[b, l]
    src_ref:    (8, D)        f32 VMEM  scratch: gathered start-node rows
    rows_ref:   (B*L_pad, D)  f32 VMEM  scratch: gathered walk/neg rows (flat)
    scores_ref: (B, 128)      f32 VMEM  scratch: scores, batch on sublanes / L on lanes
    """
    g = pl.program_id(0)
    L_pad = rows_ref.shape[0] // B

    # Deterministic padding: lanes >= L of the output end up holding B*log(B).
    scores_ref[...] = jnp.zeros_like(scores_ref)
    rows_ref[...] = jnp.zeros_like(rows_ref)

    # ---- Phase 1: stream ALL gathers up front (no WAR dependence on the dots) ----
    for b in range(B):                                   # B is small; static unroll
        src_ref[pl.ds(b, 1), :] = x_ref[pl.ds(s_ref[g * B + b], 1), :]
        for l in range(L):
            rows_ref[pl.ds(b * L_pad + l, 1), :] = (
                x_ref[pl.ds(idx_ref[(g * B + b) * L + l], 1), :])

    # ---- Phase 2: B small MXU dots over the pre-gathered rows ----
    for b in range(B):
        # scores[b, l] = <X[idx[b, l]], X[s[b]]>  (padded rows l >= L are zero)
        row_scores = jax.lax.dot_general(
            src_ref[pl.ds(b, 1), :],                     # (1, D)
            rows_ref[pl.ds(b * L_pad, L_pad), :],        # (L_pad, D)
            (((1,), (1,)), ((), ())),
            preferred_element_type=jnp.float32)          # (1, L_pad)
        scores_ref[pl.ds(b, 1), pl.ds(0, L_pad)] = row_scores   # VMEM scratch store

    # ---- Phase 3: folded log-softmax over dim 0 (the batch), per column ----
    #   -sum_b logp[b,:] = B*log(sum_b exp(scores-m)) + B*m - sum_b scores
    scores = scores_ref[...]                                          # (B, 128) f32
    m = jnp.max(scores, axis=0, keepdims=True)                        # (1, 128)
    colsum = jnp.sum(scores, axis=0, keepdims=True)                   # (1, 128)
    esum = jnp.sum(jnp.exp(scores - m), axis=0, keepdims=True)        # (1, 128)
    out = B * (jnp.log(esum) + m) - colsum                            # (1, 128), one log
    o_ref[...] = out.reshape(1, 1, LANES)                             # lane-dense block


def node2vec_forward_batched(X, s, w, neg):
    """G independent node2vec forward problems in a single pallas_call.

    X: (N, 128) f32, s: (G, B) int, w: (G, B, Lw) int, neg: (G, B, Ln) int
    returns (G, 5) f32.
    """
    X = X.astype(jnp.float32)
    N, Dd = X.shape
    assert Dd == D, "embedding dim must be 128 (module spec)"

    s = jnp.asarray(s)
    G, B = s.shape
    idx = jnp.concatenate([jnp.asarray(w), jnp.asarray(neg)], axis=2).astype(jnp.int32) - 1
    L = idx.shape[2]
    assert L <= LANES, "walk + negative samples must fit in 128 lanes"
    L_pad = max(8, -(-L // 8) * 8)
    B_pad = -(-B // 8) * 8

    # Clamp node ids: an out-of-range id would silently read a wrong VMEM row
    # (PyTorch raises an IndexError instead).
    idx = jnp.clip(idx, 0, N - 1)
    s0 = jnp.clip(s.astype(jnp.int32) - 1, 0, N - 1)

    s_flat = s0.reshape(-1)        # (G*B,)   1D -> no SMEM lane padding
    idx_flat = idx.reshape(-1)     # (G*B*L,)

    x_bytes = N * Dd * 4
    scratch_bytes = (B_pad * Dd + B * L_pad * Dd + B * LANES) * 4
    vmem_limit = min(max(x_bytes + scratch_bytes + (4 << 20), 32 << 20), 128 << 20)

    cost = pl.CostEstimate(
        flops=2 * G * B * L * Dd,
        transcendentals=G * (B + 1) * LANES,                    # exp (B,128) + log (1,128)
        bytes_accessed=x_bytes + idx_flat.size * 4 + s_flat.size * 4 + G * LANES * 4,
    )

    out = pl.pallas_call(
        functools.partial(_node2vec_kernel, B, L),
        out_shape=jax.ShapeDtypeStruct((G, 1, LANES), jnp.float32),
        grid_spec=pltpu.PrefetchScalarGridSpec(
            num_scalar_prefetch=2,                               # s_flat, idx_flat -> SMEM
            grid=(G,),
            in_specs=[
                # whole table resident in VMEM, single-buffered (grid-invariant)
                pl.BlockSpec(memory_space=pltpu.MemorySpace.VMEM),
            ],
            out_specs=pl.BlockSpec((1, 1, LANES), lambda g, s_ref, idx_ref: (g, 0, 0)),
            scratch_shapes=[
                pltpu.VMEM((B_pad, Dd), jnp.float32),            # start-node rows
                pltpu.VMEM((B * L_pad, Dd), jnp.float32),        # flat gathered walk/neg rows
                pltpu.VMEM((B, LANES), jnp.float32),             # scores
            ],
        ),
        compiler_params=pltpu.CompilerParams(
            dimension_semantics=("parallel",),
            vmem_limit_bytes=vmem_limit,
        ),
        cost_estimate=cost,
    )(s_flat, idx_flat, X)

    return out.reshape(G, LANES)[:, :5]


def node2vec_forward(X, s, w, neg):
    """JAX/Pallas equivalent of node2vec.forward(s, w, neg). Returns shape (5,)."""
    s = jnp.asarray(s).reshape(-1)
    return node2vec_forward_batched(X, s[None], jnp.asarray(w)[None], jnp.asarray(neg)[None])[0]


def node2vec_reference(X, s, w, neg):
    """Pure-JAX reference matching the PyTorch forward (single problem)."""
    idx = jnp.concatenate([w, neg], axis=1) - 1
    temp = X[idx]                                   # (B, L, D)
    src = X[s - 1]                                  # (B, D)
    temp = jnp.einsum("bld,bd->bl", temp, src)      # (B, L)
    temp = jax.nn.softmax(temp, axis=0)             # softmax over the batch (dim 0)
    return -jnp.sum(jnp.log(temp[:, :5]), axis=0)   # (5,)


if __name__ == "__main__":
    key = jax.random.PRNGKey(0)
    k_x, k_s, k_w, k_neg = jax.random.split(key, 4)

    input_dim = 32   # number of graph nodes
    G = 4            # independent (s, w, neg) problems batched into one pallas_call
    B = 8            # batch of walks per problem
    Lw = 5           # rest-of-walk length (module slices temp[:, :5])
    Ln = 8           # negative samples per walk

    # kaiming_normal_ on (input_dim, 128): std = sqrt(2 / fan_in), fan_in = 128
    X = jax.random.normal(k_x, (input_dim, D), dtype=jnp.float32) * math.sqrt(2.0 / D)

    # Node ids are 1-based (the module subtracts 1 before indexing)
    s = jax.random.randint(k_s, (G, B), 1, input_dim + 1, dtype=jnp.int32)
    w = jax.random.randint(k_w, (G, B, Lw), 1, input_dim + 1, dtype=jnp.int32)
    neg = jax.random.randint(k_neg, (G, B, Ln), 1, input_dim + 1, dtype=jnp.int32)

    # Batched path: G problems, one kernel launch, "parallel" grid axis.
    out_batched = jax.block_until_ready(node2vec_forward_batched(X, s, w, neg))
    assert out_batched.shape == (G, 5), out_batched.shape
    ref_batched = jnp.stack(
        [node2vec_reference(X, s[g], w[g], neg[g]) for g in range(G)])
    assert jnp.allclose(out_batched, ref_batched, rtol=1e-5, atol=1e-4), (
        out_batched, ref_batched)

    # Single-problem path, matching the module's forward signature exactly.
    out_single = jax.block_until_ready(node2vec_forward(X, s[0], w[0], neg[0]))
    assert out_single.shape == (5,), out_single.shape
    assert jnp.allclose(out_single, ref_batched[0], rtol=1e-5, atol=1e-4), (
        out_single, ref_batched[0])

    print("KERNEL_OK")
</pallas_src>

<mosaic_0001>
module attributes {stable_mosaic.version = 11 : i64} {
  func.func @_node2vec_kernel(%arg0: i32, %arg1: memref<32xi32, #tpu.memory_space<smem>>, %arg2: memref<416xi32, #tpu.memory_space<smem>>, %arg3: memref<32x128xf32, #tpu.memory_space<vmem>>, %arg4: memref<1x1x128xf32, #tpu.memory_space<vmem>>, %arg5: memref<8x128xf32, #tpu.memory_space<vmem>>, %arg6: memref<128x128xf32, #tpu.memory_space<vmem>>, %arg7: memref<8x128xf32, #tpu.memory_space<vmem>>) attributes {dimension_semantics = [#tpu.dimension_semantics<parallel>], iteration_bounds = array<i64: 4>, scalar_prefetch = 2 : i64, scratch_operands = 3 : i64, tpu.core_type = #tpu.core_type<tc>, window_params = [{pipeline_mode = #tpu.pipeline_mode<synchronous>, transform_indices = @transform_0, window_bounds = array<i64: 32, 128>}, {transform_indices = @transform_1, window_bounds = array<i64: 1, 1, 128>}]} {
    %cst = arith.constant 0.000000e+00 : f32
    %0 = vector.broadcast %cst : f32 to vector<8x128xf32>
    %c0 = arith.constant 0 : index
    %c0_0 = arith.constant 0 : index
    %1 = vector.load %arg7[%c0, %c0_0] : memref<8x128xf32, #tpu.memory_space<vmem>>, vector<8x128xf32>
    tpu.vector_store %arg7[%c0, %c0_0], %0 {strides = array<i32>} : memref<8x128xf32, #tpu.memory_space<vmem>>, vector<8x128xf32>,
    %cst_1 = arith.constant 0.000000e+00 : f32
    %2 = vector.broadcast %cst_1 : f32 to vector<128x128xf32>
    %c0_2 = arith.constant 0 : index
    %c0_3 = arith.constant 0 : index
    %3 = vector.load %arg6[%c0_2, %c0_3] : memref<128x128xf32, #tpu.memory_space<vmem>>, vector<128x128xf32>
    tpu.vector_store %arg6[%c0_2, %c0_3], %2 {strides = array<i32>} : memref<128x128xf32, #tpu.memory_space<vmem>>, vector<128x128xf32>,
    %c8_i32 = arith.constant 8 : i32
    %4 = arith.muli %arg0, %c8_i32 : i32
    %c0_i32 = arith.constant 0 : i32
    %5 = arith.addi %4, %c0_i32 : i32
    %6 = arith.index_cast %5 : i32 to index
    %7 = memref.load %arg1[%6] : memref<32xi32, #tpu.memory_space<smem>>
    %8 = arith.index_cast %7 : i32 to index
    %c0_4 = arith.constant 0 : index
    %9 = vector.load %arg3[%8, %c0_4] : memref<32x128xf32, #tpu.memory_space<vmem>>, vector<1x128xf32>
    %c0_5 = arith.constant 0 : index
    %c0_6 = arith.constant 0 : index
    %10 = vector.load %arg5[%c0_5, %c0_6] : memref<8x128xf32, #tpu.memory_space<vmem>>, vector<1x128xf32>
    tpu.vector_store %arg5[%c0_5, %c0_6], %9 {strides = array<i32>} : memref<8x128xf32, #tpu.memory_space<vmem>>, vector<1x128xf32>,
    %c8_i32_7 = arith.constant 8 : i32
    %11 = arith.muli %arg0, %c8_i32_7 : i32
    %c0_i32_8 = arith.constant 0 : i32
    %12 = arith.addi %11, %c0_i32_8 : i32
    %c13_i32 = arith.constant 13 : i32
    %13 = arith.muli %12, %c13_i32 : i32
    %c0_i32_9 = arith.constant 0 : i32
    %14 = arith.addi %13, %c0_i32_9 : i32
    %15 = arith.index_cast %14 : i32 to index
    %16 = memref.load %arg2[%15] : memref<416xi32, #tpu.memory_space<smem>>
    %17 = arith.index_cast %16 : i32 to index
    %c0_10 = arith.constant 0 : index
    %18 = vector.load %arg3[%17, %c0_10] : memref<32x128xf32, #tpu.memory_space<vmem>>, vector<1x128xf32>
    %c0_11 = arith.constant 0 : index
    %c0_12 = arith.constant 0 : index
    %19 = vector.load %arg6[%c0_11, %c0_12] : memref<128x128xf32, #tpu.memory_space<vmem>>, vector<1x128xf32>
    tpu.vector_store %arg6[%c0_11, %c0_12], %18 {strides = array<i32>} : memref<128x128xf32, #tpu.memory_space<vmem>>, vector<1x128xf32>,
    %c8_i32_13 = arith.constant 8 : i32
    %20 = arith.muli %arg0, %c8_i32_13 : i32
    %c0_i32_14 = arith.constant 0 : i32
    %21 = arith.addi %20, %c0_i32_14 : i32
    %c13_i32_15 = arith.constant 13 : i32
    %22 = arith.muli %21, %c13_i32_15 : i32
    %c1_i32 = arith.constant 1 : i32
    %23 = arith.addi %22, %c1_i32 : i32
    %24 = arith.index_cast %23 : i32 to index
    %25 = memref.load %arg2[%24] : memref<416xi32, #tpu.memory_space<smem>>
    %26 = arith.index_cast %25 : i32 to index
    %c0_16 = arith.constant 0 : index
    %27 = vector.load %arg3[%26, %c0_16] : memref<32x128xf32, #tpu.memory_space<vmem>>, vector<1x128xf32>
    %c1 = arith.constant 1 : index
    %c0_17 = arith.constant 0 : index
    %28 = vector.load %arg6[%c1, %c0_17] : memref<128x128xf32, #tpu.memory_space<vmem>>, vector<1x128xf32>
    tpu.vector_store %arg6[%c1, %c0_17], %27 {strides = array<i32>} : memref<128x128xf32, #tpu.memory_space<vmem>>, vector<1x128xf32>,
    %c8_i32_18 = arith.constant 8 : i32
    %29 = arith.muli %arg0, %c8_i32_18 : i32
    %c0_i32_19 = arith.constant 0 : i32
    %30 = arith.addi %29, %c0_i32_19 : i32
    %c13_i32_20 = arith.constant 13 : i32
    %31 = arith.muli %30, %c13_i32_20 : i32
    %c2_i32 = arith.constant 2 : i32
    %32 = arith.addi %31, %c2_i32 : i32
    %33 = arith.index_cast %32 : i32 to index
    %34 = memref.load %arg2[%33] : memref<416xi32, #tpu.memory_space<smem>>
    %35 = arith.index_cast %34 : i32 to index
    %c0_21 = arith.constant 0 : index
    %36 = vector.load %arg3[%35, %c0_21] : memref<32x128xf32, #tpu.memory_space<vmem>>, vector<1x128xf32>
    %c2 = arith.constant 2 : index
    %c0_22 = arith.constant 0 : index
    %37 = vector.load %arg6[%c2, %c0_22] : memref<128x128xf32, #tpu.memory_space<vmem>>, vector<1x128xf32>
    tpu.vector_store %arg6[%c2, %c0_22], %36 {strides = array<i32>} : memref<128x128xf32, #tpu.memory_space<vmem>>, vector<1x128xf32>,
    %c8_i32_23 = arith.constant 8 : i32
    %38 = arith.muli %arg0, %c8_i32_23 : i32
    %c0_i32_24 = arith.constant 0 : i32
    %39 = arith.addi %38, %c0_i32_24 : i32
    %c13_i32_25 = arith.constant 13 : i32
    %40 = arith.muli %39, %c13_i32_25 : i32
    %c3_i32 = arith.constant 3 : i32
    %41 = arith.addi %40, %c3_i32 : i32
    %42 = arith.index_cast %41 : i32 to index
    %43 = memref.load %arg2[%42] : memref<416xi32, #tpu.memory_space<smem>>
    %44 = arith.index_cast %43 : i32 to index
    %c0_26 = arith.constant 0 : index
    %45 = vector.load %arg3[%44, %c0_26] : memref<32x128xf32, #tpu.memory_space<vmem>>, vector<1x128xf32>
    %c3 = arith.constant 3 : index
    %c0_27 = arith.constant 0 : index
    %46 = vector.load %arg6[%c3, %c0_27] : memref<128x128xf32, #tpu.memory_space<vmem>>, vector<1x128xf32>
    tpu.vector_store %arg6[%c3, %c0_27], %45 {strides = array<i32>} : memref<128x128xf32, #tpu.memory_space<vmem>>, vector<1x128xf32>,
    %c8_i32_28 = arith.constant 8 : i32
    %47 = arith.muli %arg0, %c8_i32_28 : i32
    %c0_i32_29 = arith.constant 0 : i32
    %48 = arith.addi %47, %c0_i32_29 : i32
    %c13_i32_30 = arith.constant 13 : i32
    %49 = arith.muli %48, %c13_i32_30 : i32
    %c4_i32 = arith.constant 4 : i32
    %50 = arith.addi %49, %c4_i32 : i32
    %51 = arith.index_cast %50 : i32 to index
    %52 = memref.load %arg2[%51] : memref<416xi32, #tpu.memory_space<smem>>
    %53 = arith.index_cast %52 : i32 to index
    %c0_31 = arith.constant 0 : index
    %54 = vector.load %arg3[%53, %c0_31] : memref<32x128xf32, #tpu.memory_space<vmem>>, vector<1x128xf32>
    %c4 = arith.constant 4 : index
    %c0_32 = arith.constant 0 : index
    %55 = vector.load %arg6[%c4, %c0_32] : memref<128x128xf32, #tpu.memory_space<vmem>>, vector<1x128xf32>
    tpu.vector_store %arg6[%c4, %c0_32], %54 {strides = array<i32>} : memref<128x128xf32, #tpu.memory_space<vmem>>, vector<1x128xf32>,
    %c8_i32_33 = arith.constant 8 : i32
    %56 = arith.muli %arg0, %c8_i32_33 : i32
    %c0_i32_34 = arith.constant 0 : i32
    %57 = arith.addi %56, %c0_i32_34 : i32
    %c13_i32_35 = arith.constant 13 : i32
    %58 = arith.muli %57, %c13_i32_35 : i32
    %c5_i32 = arith.constant 5 : i32
    %59 = arith.addi %58, %c5_i32 : i32
    %60 = arith.index_cast %59 : i32 to index
    %61 = memref.load %arg2[%60] : memref<416xi32, #tpu.memory_space<smem>>
    %62 = arith.index_cast %61 : i32 to index
    %c0_36 = arith.constant 0 : index
    %63 = vector.load %arg3[%62, %c0_36] : memref<32x128xf32, #tpu.memory_space<vmem>>, vector<1x128xf32>
    %c5 = arith.constant 5 : index
    %c0_37 = arith.constant 0 : index
    %64 = vector.load %arg6[%c5, %c0_37] : memref<128x128xf32, #tpu.memory_space<vmem>>, vector<1x128xf32>
    tpu.vector_store %arg6[%c5, %c0_37], %63 {strides = array<i32>} : memref<128x128xf32, #tpu.memory_space<vmem>>, vector<1x128xf32>,
    %c8_i32_38 = arith.constant 8 : i32
    %65 = arith.muli %arg0, %c8_i32_38 : i32
    %c0_i32_39 = arith.constant 0 : i32
    %66 = arith.addi %65, %c0_i32_39 : i32
    %c13_i32_40 = arith.constant 13 : i32
    %67 = arith.muli %66, %c13_i32_40 : i32
    %c6_i32 = arith.constant 6 : i32
    %68 = arith.addi %67, %c6_i32 : i32
    %69 = arith.index_cast %68 : i32 to index
    %70 = memref.load %arg2[%69] : memref<416xi32, #tpu.memory_space<smem>>
    %71 = arith.index_cast %70 : i32 to index
    %c0_41 = arith.constant 0 : index
    %72 = vector.load %arg3[%71, %c0_41] : memref<32x128xf32, #tpu.memory_space<vmem>>, vector<1x128xf32>
    %c6 = arith.constant 6 : index
    %c0_42 = arith.constant 0 : index
    %73 = vector.load %arg6[%c6, %c0_42] : memref<128x128xf32, #tpu.memory_space<vmem>>, vector<1x128xf32>
    tpu.vector_store %arg6[%c6, %c0_42], %72 {strides = array<i32>} : memref<128x128xf32, #tpu.memory_space<vmem>>, vector<1x128xf32>,
    %c8_i32_43 = arith.constant 8 : i32
    %74 = arith.muli %arg0, %c8_i32_43 : i32
    %c0_i32_44 = arith.constant 0 : i32
    %75 = arith.addi %74, %c0_i32_44 : i32
    %c13_i32_45 = arith.constant 13 : i32
    %76 = arith.muli %75, %c13_i32_45 : i32
    %c7_i32 = arith.constant 7 : i32
    %77 = arith.addi %76, %c7_i32 : i32
    %78 = arith.index_cast %77 : i32 to index
    %79 = memref.load %arg2[%78] : memref<416xi32, #tpu.memory_space<smem>>
    %80 = arith.index_cast %79 : i32 to index
    %c0_46 = arith.constant 0 : index
    %81 = vector.load %arg3[%80, %c0_46] : memref<32x128xf32, #tpu.memory_space<vmem>>, vector<1x128xf32>
    %c7 = arith.constant 7 : index
    %c0_47 = arith.constant 0 : index
    %82 = vector.load %arg6[%c7, %c0_47] : memref<128x128xf32, #tpu.memory_space<vmem>>, vector<1x128xf32>
    tpu.vector_store %arg6[%c7, %c0_47], %81 {strides = array<i32>} : memref<128x128xf32, #tpu.memory_space<vmem>>, vector<1x128xf32>,
    %c8_i32_48 = arith.constant 8 : i32
    %83 = arith.muli %arg0, %c8_i32_48 : i32
    %c0_i32_49 = arith.constant 0 : i32
    %84 = arith.addi %83, %c0_i32_49 : i32
    %c13_i32_50 = arith.constant 13 : i32
    %85 = arith.muli %84, %c13_i32_50 : i32
    %c8_i32_51 = arith.constant 8 : i32
    %86 = arith.addi %85, %c8_i32_51 : i32
    %87 = arith.index_cast %86 : i32 to index
    %88 = memref.load %arg2[%87] : memref<416xi32, #tpu.memory_space<smem>>
    %89 = arith.index_cast %88 : i32 to index
    %c0_52 = arith.constant 0 : index
    %90 = vector.load %arg3[%89, %c0_52] : memref<32x128xf32, #tpu.memory_space<vmem>>, vector<1x128xf32>
    %c8 = arith.constant 8 : index
    %c0_53 = arith.constant 0 : index
    %91 = vector.load %arg6[%c8, %c0_53] : memref<128x128xf32, #tpu.memory_space<vmem>>, vector<1x128xf32>
    tpu.vector_store %arg6[%c8, %c0_53], %90 {strides = array<i32>} : memref<128x128xf32, #tpu.memory_space<vmem>>, vector<1x128xf32>,
    %c8_i32_54 = arith.constant 8 : i32
    %92 = arith.muli %arg0, %c8_i32_54 : i32
    %c0_i32_55 = arith.constant 0 : i32
    %93 = arith.addi %92, %c0_i32_55 : i32
    %c13_i32_56 = arith.constant 13 : i32
    %94 = arith.muli %93, %c13_i32_56 : i32
    %c9_i32 = arith.constant 9 : i32
    %95 = arith.addi %94, %c9_i32 : i32
    %96 = arith.index_cast %95 : i32 to index
    %97 = memref.load %arg2[%96] : memref<416xi32, #tpu.memory_space<smem>>
    %98 = arith.index_cast %97 : i32 to index
    %c0_57 = arith.constant 0 : index
    %99 = vector.load %arg3[%98, %c0_57] : memref<32x128xf32, #tpu.memory_space<vmem>>, vector<1x128xf32>
    %c9 = arith.constant 9 : index
    %c0_58 = arith.constant 0 : index
    %100 = vector.load %arg6[%c9, %c0_58] : memref<128x128xf32, #tpu.memory_space<vmem>>, vector<1x128xf32>
    tpu.vector_store %arg6[%c9, %c0_58], %99 {strides = array<i32>} : memref<128x128xf32, #tpu.memory_space<vmem>>, vector<1x128xf32>,
    %c8_i32_59 = arith.constant 8 : i32
    %101 = arith.muli %arg0, %c8_i32_59 : i32
    %c0_i32_60 = arith.constant 0 : i32
    %102 = arith.addi %101, %c0_i32_60 : i32
    %c13_i32_61 = arith.constant 13 : i32
    %103 = arith.muli %102, %c13_i32_61 : i32
    %c10_i32 = arith.constant 10 : i32
    %104 = arith.addi %103, %c10_i32 : i32
    %105 = arith.index_cast %104 : i32 to index
    %106 = memref.load %arg2[%105] : memref<416xi32, #tpu.memory_space<smem>>
    %107 = arith.index_cast %106 : i32 to index
    %c0_62 = arith.constant 0 : index
    %108 = vector.load %arg3[%107, %c0_62] : memref<32x128xf32, #tpu.memory_space<vmem>>, vector<1x128xf32>
    %c10 = arith.constant 10 : index
    %c0_63 = arith.constant 0 : index
    %109 = vector.load %arg6[%c10, %c0_63] : memref<128x128xf32, #tpu.memory_space<vmem>>, vector<1x128xf32>
    tpu.vector_store %arg6[%c10, %c0_63], %108 {strides = array<i32>} : memref<128x128xf32, #tpu.memory_space<vmem>>, vector<1x128xf32>,
    %c8_i32_64 = arith.constant 8 : i32
    %110 = arith.muli %arg0, %c8_i32_64 : i32
    %c0_i32_65 = arith.constant 0 : i32
    %111 = arith.addi %110, %c0_i32_65 : i32
    %c13_i32_66 = arith.constant 13 : i32
    %112 = arith.muli %111, %c13_i32_66 : i32
    %c11_i32 = arith.constant 11 : i32
    %113 = arith.addi %112, %c11_i32 : i32
    %114 = arith.index_cast %113 : i32 to index
    %115 = memref.load %arg2[%114] : memref<416xi32, #tpu.memory_space<smem>>
    %116 = arith.index_cast %115 : i32 to index
    %c0_67 = arith.constant 0 : index
    %117 = vector.load %arg3[%116, %c0_67] : memref<32x128xf32, #tpu.memory_space<vmem>>, vector<1x128xf32>
    %c11 = arith.constant 11 : index
    %c0_68 = arith.constant 0 : index
    %118 = vector.load %arg6[%c11, %c0_68] : memref<128x128xf32, #tpu.memory_space<vmem>>, vector<1x128xf32>
    tpu.vector_store %arg6[%c11, %c0_68], %117 {strides = array<i32>} : memref<128x128xf32, #tpu.memory_space<vmem>>, vector<1x128xf32>,
    %c8_i32_69 = arith.constant 8 : i32
    %119 = arith.muli %arg0, %c8_i32_69 : i32
    %c0_i32_70 = arith.constant 0 : i32
    %120 = arith.addi %119, %c0_i32_70 : i32
    %c13_i32_71 = arith.constant 13 : i32
    %121 = arith.muli %120, %c13_i32_71 : i32
    %c12_i32 = arith.constant 12 : i32
    %122 = arith.addi %121, %c12_i32 : i32
    %123 = arith.index_cast %122 : i32 to index
    %124 = memref.load %arg2[%123] : memref<416xi32, #tpu.memory_space<smem>>
    %125 = arith.index_cast %124 : i32 to index
    %c0_72 = arith.constant 0 : index
    %126 = vector.load %arg3[%125, %c0_72] : memref<32x128xf32, #tpu.memory_space<vmem>>, vector<1x128xf32>
    %c12 = arith.constant 12 : index
    %c0_73 = arith.constant 0 : index
    %127 = vector.load %arg6[%c12, %c0_73] : memref<128x128xf32, #tpu.memory_space<vmem>>, vector<1x128xf32>
    tpu.vector_store %arg6[%c12, %c0_73], %126 {strides = array<i32>} : memref<128x128xf32, #tpu.memory_space<vmem>>, vector<1x128xf32>,
    %c8_i32_74 = arith.constant 8 : i32
    %128 = arith.muli %arg0, %c8_i32_74 : i32
    %c1_i32_75 = arith.constant 1 : i32
    %129 = arith.addi %128, %c1_i32_75 : i32
    %130 = arith.index_cast %129 : i32 to index
    %131 = memref.load %arg1[%130] : memref<32xi32, #tpu.memory_space<smem>>
    %132 = arith.index_cast %131 : i32 to index
    %c0_76 = arith.constant 0 : index
    %133 = vector.load %arg3[%132, %c0_76] : memref<32x128xf32, #tpu.memory_space<vmem>>, vector<1x128xf32>
    %c1_77 = arith.constant 1 : index
    %c0_78 = arith.constant 0 : index
    %134 = vector.load %arg5[%c1_77, %c0_78] : memref<8x128xf32, #tpu.memory_space<vmem>>, vector<1x128xf32>
    tpu.vector_store %arg5[%c1_77, %c0_78], %133 {strides = array<i32>} : memref<8x128xf32, #tpu.memory_space<vmem>>, vector<1x128xf32>,
    %c8_i32_79 = arith.constant 8 : i32
    %135 = arith.muli %arg0, %c8_i32_79 : i32
    %c1_i32_80 = arith.constant 1 : i32
    %136 = arith.addi %135, %c1_i32_80 : i32
    %c13_i32_81 = arith.constant 13 : i32
    %137 = arith.muli %136, %c13_i32_81 : i32
    %c0_i32_82 = arith.constant 0 : i32
    %138 = arith.addi %137, %c0_i32_82 : i32
    %139 = arith.index_cast %138 : i32 to index
    %140 = memref.load %arg2[%139] : memref<416xi32, #tpu.memory_space<smem>>
    %141 = arith.index_cast %140 : i32 to index
    %c0_83 = arith.constant 0 : index
    %142 = vector.load %arg3[%141, %c0_83] : memref<32x128xf32, #tpu.memory_space<vmem>>, vector<1x128xf32>
    %c16 = arith.constant 16 : index
    %c0_84 = arith.constant 0 : index
    %143 = vector.load %arg6[%c16, %c0_84] : memref<128x128xf32, #tpu.memory_space<vmem>>, vector<1x128xf32>
    tpu.vector_store %arg6[%c16, %c0_84], %142 {strides = array<i32>} : memref<128x128xf32, #tpu.memory_space<vmem>>, vector<1x128xf32>,
    %c8_i32_85 = arith.constant 8 : i32
    %144 = arith.muli %arg0, %c8_i32_85 : i32
    %c1_i32_86 = arith.constant 1 : i32
    %145 = arith.addi %144, %c1_i32_86 : i32
    %c13_i32_87 = arith.constant 13 : i32
    %146 = arith.muli %145, %c13_i32_87 : i32
    %c1_i32_88 = arith.constant 1 : i32
    %147 = arith.addi %146, %c1_i32_88 : i32
    %148 = arith.index_cast %147 : i32 to index
    %149 = memref.load %arg2[%148] : memref<416xi32, #tpu.memory_space<smem>>
    %150 = arith.index_cast %149 : i32 to index
    %c0_89 = arith.constant 0 : index
    %151 = vector.load %arg3[%150, %c0_89] : memref<32x128xf32, #tpu.memory_space<vmem>>, vector<1x128xf32>
    %c17 = arith.constant 17 : index
    %c0_90 = arith.constant 0 : index
    %152 = vector.load %arg6[%c17, %c0_90] : memref<128x128xf32, #tpu.memory_space<vmem>>, vector<1x128xf32>
    tpu.vector_store %arg6[%c17, %c0_90], %151 {strides = array<i32>} : memref<128x128xf32, #tpu.memory_space<vmem>>, vector<1x128xf32>,
    %c8_i32_91 = arith.constant 8 : i32
    %153 = arith.muli %arg0, %c8_i32_91 : i32
    %c1_i32_92 = arith.constant 1 : i32
    %154 = arith.addi %153, %c1_i32_92 : i32
    %c13_i32_93 = arith.constant 13 : i32
    %155 = arith.muli %154, %c13_i32_93 : i32
    %c2_i32_94 = arith.constant 2 : i32
    %156 = arith.addi %155, %c2_i32_94 : i32
    %157 = arith.index_cast %156 : i32 to index
    %158 = memref.load %arg2[%157] : memref<416xi32, #tpu.memory_space<smem>>
    %159 = arith.index_cast %158 : i32 to index
    %c0_95 = arith.constant 0 : index
    %160 = vector.load %arg3[%159, %c0_95] : memref<32x128xf32, #tpu.memory_space<vmem>>, vector<1x128xf32>
    %c18 = arith.constant 18 : index
    %c0_96 = arith.constant 0 : index
    %161 = vector.load %arg6[%c18, %c0_96] : memref<128x128xf32, #tpu.memory_space<vmem>>, vector<1x128xf32>
    tpu.vector_store %arg6[%c18, %c0_96], %160 {strides = array<i32>} : memref<128x128xf32, #tpu.memory_space<vmem>>, vector<1x128xf32>,
    %c8_i32_97 = arith.constant 8 : i32
    %162 = arith.muli %arg0, %c8_i32_97 : i32
    %c1_i32_98 = arith.constant 1 : i32
    %163 = arith.addi %162, %c1_i32_98 : i32
    %c13_i32_99 = arith.constant 13 : i32
    %164 = arith.muli %163, %c13_i32_99 : i32
    %c3_i32_100 = arith.constant 3 : i32
    %165 = arith.addi %164, %c3_i32_100 : i32
    %166 = arith.index_cast %165 : i32 to index
    %167 = memref.load %arg2[%166] : memref<416xi32, #tpu.memory_space<smem>>
    %168 = arith.index_cast %167 : i32 to index
    %c0_101 = arith.constant 0 : index
    %169 = vector.load %arg3[%168, %c0_101] : memref<32x128xf32, #tpu.memory_space<vmem>>, vector<1x128xf32>
    %c19 = arith.constant 19 : index
    %c0_102 = arith.constant 0 : index
    %170 = vector.load %arg6[%c19, %c0_102] : memref<128x128xf32, #tpu.memory_space<vmem>>, vector<1x128xf32>
    tpu.vector_store %arg6[%c19, %c0_102], %169 {strides = array<i32>} : memref<128x128xf32, #tpu.memory_space<vmem>>, vector<1x128xf32>,
    %c8_i32_103 = arith.constant 8 : i32
    %171 = arith.muli %arg0, %c8_i32_103 : i32
    %c1_i32_104 = arith.constant 1 : i32
    %172 = arith.addi %171, %c1_i32_104 : i32
    %c13_i32_105 = arith.constant 13 : i32
    %173 = arith.muli %172, %c13_i32_105 : i32
    %c4_i32_106 = arith.constant 4 : i32
    %174 = arith.addi %173, %c4_i32_106 : i32
    %175 = arith.index_cast %174 : i32 to index
    %176 = memref.load %arg2[%175] : memref<416xi32, #tpu.memory_space<smem>>
    %177 = arith.index_cast %176 : i32 to index
    %c0_107 = arith.constant 0 : index
    %178 = vector.load %arg3[%177, %c0_107] : memref<32x128xf32, #tpu.memory_space<vmem>>, vector<1x128xf32>
    %c20 = arith.constant 20 : index
    %c0_108 = arith.constant 0 : index
    %179 = vector.load %arg6[%c20, %c0_108] : memref<128x128xf32, #tpu.memory_space<vmem>>, vector<1x128xf32>
    tpu.vector_store %arg6[%c20, %c0_108], %178 {strides = array<i32>} : memref<128x128xf32, #tpu.memory_space<vmem>>, vector<1x128xf32>,
    %c8_i32_109 = arith.constant 8 : i32
    %180 = arith.muli %arg0, %c8_i32_109 : i32
    %c1_i32_110 = arith.constant 1 : i32
    %181 = arith.addi %180, %c1_i32_110 : i32
    %c13_i32_111 = arith.constant 13 : i32
    %182 = arith.muli %181, %c13_i32_111 : i32
    %c5_i32_112 = arith.constant 5 : i32
    %183 = arith.addi %182, %c5_i32_112 : i32
    %184 = arith.index_cast %183 : i32 to index
    %185 = memref.load %arg2[%184] : memref<416xi32, #tpu.memory_space<smem>>
    %186 = arith.index_cast %185 : i32 to index
    %c0_113 = arith.constant 0 : index
    %187 = vector.load %arg3[%186, %c0_113] : memref<32x128xf32, #tpu.memory_space<vmem>>, vector<1x128xf32>
    %c21 = arith.constant 21 : index
    %c0_114 = arith.constant 0 : index
    %188 = vector.load %arg6[%c21, %c0_114] : memref<128x128xf32, #tpu.memory_space<vmem>>, vector<1x128xf32>
    tpu.vector_store %arg6[%c21, %c0_114], %187 {strides = array<i32>} : memref<128x128xf32, #tpu.memory_space<vmem>>, vector<1x128xf32>,
    %c8_i32_115 = arith.constant 8 : i32
    %189 = arith.muli %arg0, %c8_i32_115 : i32
    %c1_i32_116 = arith.constant 1 : i32
    %190 = arith.addi %189, %c1_i32_116 : i32
    %c13_i32_117 = arith.constant 13 : i32
    %191 = arith.muli %190, %c13_i32_117 : i32
    %c6_i32_118 = arith.constant 6 : i32
    %192 = arith.addi %191, %c6_i32_118 : i32
    %193 = arith.index_cast %192 : i32 to index
    %194 = memref.load %arg2[%193] : memref<416xi32, #tpu.memory_space<smem>>
    %195 = arith.index_cast %194 : i32 to index
    %c0_119 = arith.constant 0 : index
    %196 = vector.load %arg3[%195, %c0_119] : memref<32x128xf32, #tpu.memory_space<vmem>>, vector<1x128xf32>
    %c22 = arith.constant 22 : index
    %c0_120 = arith.constant 0 : index
    %197 = vector.load %arg6[%c22, %c0_120] : memref<128x128xf32, #tpu.memory_space<vmem>>, vector<1x128xf32>
    tpu.vector_store %arg6[%c22, %c0_120], %196 {strides = array<i32>} : memref<128x128xf32, #tpu.memory_space<vmem>>, vector<1x128xf32>,
    %c8_i32_121 = arith.constant 8 : i32
    %198 = arith.muli %arg0, %c8_i32_121 : i32
    %c1_i32_122 = arith.constant 1 : i32
    %199 = arith.addi %198, %c1_i32_122 : i32
    %c13_i32_123 = arith.constant 13 : i32
    %200 = arith.muli %199, %c13_i32_123 : i32
    %c7_i32_124 = arith.constant 7 : i32
    %201 = arith.addi %200, %c7_i32_124 : i32
    %202 = arith.index_cast %201 : i32 to index
    %203 = memref.load %arg2[%202] : memref<416xi32, #tpu.memory_space<smem>>
    %204 = arith.index_cast %203 : i32 to index
    %c0_125 = arith.constant 0 : index
    %205 = vector.load %arg3[%204, %c0_125] : memref<32x128xf32, #tpu.memory_space<vmem>>, vector<1x128xf32>
    %c23 = arith.constant 23 : index
    %c0_126 = arith.constant 0 : index
    %206 = vector.load %arg6[%c23, %c0_126] : memref<128x128xf32, #tpu.memory_space<vmem>>, vector<1x128xf32>
    tpu.vector_store %arg6[%c23, %c0_126], %205 {strides = array<i32>} : memref<128x128xf32, #tpu.memory_space<vmem>>, vector<1x128xf32>,
    %c8_i32_127 = arith.constant 8 : i32
    %207 = arith.muli %arg0, %c8_i32_127 : i32
    %c1_i32_128 = arith.constant 1 : i32
    %208 = arith.addi %207, %c1_i32_128 : i32
    %c13_i32_129 = arith.constant 13 : i32
    %209 = arith.muli %208, %c13_i32_129 : i32
    %c8_i32_130 = arith.constant 8 : i32
    %210 = arith.addi %209, %c8_i32_130 : i32
    %211 = arith.index_cast %210 : i32 to index
    %212 = memref.load %arg2[%211] : memref<416xi32, #tpu.memory_space<smem>>
    %213 = arith.index_cast %212 : i32 to index
    %c0_131 = arith.constant 0 : index
    %214 = vector.load %arg3[%213, %c0_131] : memref<32x128xf32, #tpu.memory_space<vmem>>, vector<1x128xf32>
    %c24 = arith.constant 24 : index
    %c0_132 = arith.constant 0 : index
    %215 = vector.load %arg6[%c24, %c0_132] : memref<128x128xf32, #tpu.memory_space<vmem>>, vector<1x128xf32>
    tpu.vector_store %arg6[%c24, %c0_132], %214 {strides = array<i32>} : memref<128x128xf32, #tpu.memory_space<vmem>>, vector<1x128xf32>,
    %c8_i32_133 = arith.constant 8 : i32
    %216 = arith.muli %arg0, %c8_i32_133 : i32
    %c1_i32_134 = arith.constant 1 : i32
    %217 = arith.addi %216, %c1_i32_134 : i32
    %c13_i32_135 = arith.constant 13 : i32
    %218 = arith.muli %217, %c13_i32_135 : i32
    %c9_i32_136 = arith.constant 9 : i32
    %219 = arith.addi %218, %c9_i32_136 : i32
    %220 = arith.index_cast %219 : i32 to index
    %221 = memref.load %arg2[%220] : memref<416xi32, #tpu.memory_space<smem>>
    %222 = arith.index_cast %221 : i32 to index
    %c0_137 = arith.constant 0 : index
    %223 = vector.load %arg3[%222, %c0_137] : memref<32x128xf32, #tpu.memory_space<vmem>>, vector<1x128xf32>
    %c25 = arith.constant 25 : index
    %c0_138 = arith.constant 0 : index
    %224 = vector.load %arg6[%c25, %c0_138] : memref<128x128xf32, #tpu.memory_space<vmem>>, vector<1x128xf32>
    tpu.vector_store %arg6[%c25, %c0_138], %223 {strides = array<i32>} : memref<128x128xf32, #tpu.memory_space<vmem>>, vector<1x128xf32>,
    %c8_i32_139 = arith.constant 8 : i32
    %225 = arith.muli %arg0, %c8_i32_139 : i32
    %c1_i32_140 = arith.constant 1 : i32
    %226 = arith.addi %225, %c1_i32_140 : i32
    %c13_i32_141 = arith.constant 13 : i32
    %227 = arith.muli %226, %c13_i32_141 : i32
    %c10_i32_142 = arith.constant 10 : i32
    %228 = arith.addi %227, %c10_i32_142 : i32
    %229 = arith.index_cast %228 : i32 to index
    %230 = memref.load %arg2[%229] : memref<416xi32, #tpu.memory_space<smem>>
    %231 = arith.index_cast %230 : i32 to index
    %c0_143 = arith.constant 0 : index
    %232 = vector.load %arg3[%231, %c0_143] : memref<32x128xf32, #tpu.memory_space<vmem>>, vector<1x128xf32>
    %c26 = arith.constant 26 : index
    %c0_144 = arith.constant 0 : index
    %233 = vector.load %arg6[%c26, %c0_144] : memref<128x128xf32, #tpu.memory_space<vmem>>, vector<1x128xf32>
    tpu.vector_store %arg6[%c26, %c0_144], %232 {strides = array<i32>} : memref<128x128xf32, #tpu.memory_space<vmem>>, vector<1x128xf32>,
    %c8_i32_145 = arith.constant 8 : i32
    %234 = arith.muli %arg0, %c8_i32_145 : i32
    %c1_i32_146 = arith.constant 1 : i32
    %235 = arith.addi %234, %c1_i32_146 : i32
    %c13_i32_147 = arith.constant 13 : i32
    %236 = arith.muli %235, %c13_i32_147 : i32
    %c11_i32_148 = arith.constant 11 : i32
    %237 = arith.addi %236, %c11_i32_148 : i32
    %238 = arith.index_cast %237 : i32 to index
    %239 = memref.load %arg2[%238] : memref<416xi32, #tpu.memory_space<smem>>
    %240 = arith.index_cast %239 : i32 to index
    %c0_149 = arith.constant 0 : index
    %241 = vector.load %arg3[%240, %c0_149] : memref<32x128xf32, #tpu.memory_space<vmem>>, vector<1x128xf32>
    %c27 = arith.constant 27 : index
    %c0_150 = arith.constant 0 : index
    %242 = vector.load %arg6[%c27, %c0_150] : memref<128x128xf32, #tpu.memory_space<vmem>>, vector<1x128xf32>
    tpu.vector_store %arg6[%c27, %c0_150], %241 {strides = array<i32>} : memref<128x128xf32, #tpu.memory_space<vmem>>, vector<1x128xf32>,
    %c8_i32_151 = arith.constant 8 : i32
    %243 = arith.muli %arg0, %c8_i32_151 : i32
    %c1_i32_152 = arith.constant 1 : i32
    %244 = arith.addi %243, %c1_i32_152 : i32
    %c13_i32_153 = arith.constant 13 : i32
    %245 = arith.muli %244, %c13_i32_153 : i32
    %c12_i32_154 = arith.constant 12 : i32
    %246 = arith.addi %245, %c12_i32_154 : i32
    %247 = arith.index_cast %246 : i32 to index
    %248 = memref.load %arg2[%247] : memref<416xi32, #tpu.memory_space<smem>>
    %249 = arith.index_cast %248 : i32 to index
    %c0_155 = arith.constant 0 : index
    %250 = vector.load %arg3[%249, %c0_155] : memref<32x128xf32, #tpu.memory_space<vmem>>, vector<1x128xf32>
    %c28 = arith.constant 28 : index
    %c0_156 = arith.constant 0 : index
    %251 = vector.load %arg6[%c28, %c0_156] : memref<128x128xf32, #tpu.memory_space<vmem>>, vector<1x128xf32>
    tpu.vector_store %arg6[%c28, %c0_156], %250 {strides = array<i32>} : memref<128x128xf32, #tpu.memory_space<vmem>>, vector<1x128xf32>,
    %c8_i32_157 = arith.constant 8 : i32
    %252 = arith.muli %arg0, %c8_i32_157 : i32
    %c2_i32_158 = arith.constant 2 : i32
    %253 = arith.addi %252, %c2_i32_158 : i32
    %254 = arith.index_cast %253 : i32 to index
    %255 = memref.load %arg1[%254] : memref<32xi32, #tpu.memory_space<smem>>
    %256 = arith.index_cast %255 : i32 to index
    %c0_159 = arith.constant 0 : index
    %257 = vector.load %arg3[%256, %c0_159] : memref<32x128xf32, #tpu.memory_space<vmem>>, vector<1x128xf32>
    %c2_160 = arith.constant 2 : index
    %c0_161 = arith.constant 0 : index
    %258 = vector.load %arg5[%c2_160, %c0_161] : memref<8x128xf32, #tpu.memory_space<vmem>>, vector<1x128xf32>
    tpu.vector_store %arg5[%c2_160, %c0_161], %257 {strides = array<i32>} : memref<8x128xf32, #tpu.memory_space<vmem>>, vector<1x128xf32>,
    %c8_i32_162 = arith.constant 8 : i32
    %259 = arith.muli %arg0, %c8_i32_162 : i32
    %c2_i32_163 = arith.constant 2 : i32
    %260 = arith.addi %259, %c2_i32_163 : i32
    %c13_i32_164 = arith.constant 13 : i32
    %261 = arith.muli %260, %c13_i32_164 : i32
    %c0_i32_165 = arith.constant 0 : i32
    %262 = arith.addi %261, %c0_i32_165 : i32
    %263 = arith.index_cast %262 : i32 to index
    %264 = memref.load %arg2[%263] : memref<416xi32, #tpu.memory_space<smem>>
    %265 = arith.index_cast %264 : i32 to index
    %c0_166 = arith.constant 0 : index
    %266 = vector.load %arg3[%265, %c0_166] : memref<32x128xf32, #tpu.memory_space<vmem>>, vector<1x128xf32>
    %c32 = arith.constant 32 : index
    %c0_167 = arith.constant 0 : index
    %267 = vector.load %arg6[%c32, %c0_167] : memref<128x128xf32, #tpu.memory_space<vmem>>, vector<1x128xf32>
    tpu.vector_store %arg6[%c32, %c0_167], %266 {strides = array<i32>} : memref<128x128xf32, #tpu.memory_space<vmem>>, vector<1x128xf32>,
    %c8_i32_168 = arith.constant 8 : i32
    %268 = arith.muli %arg0, %c8_i32_168 : i32
    %c2_i32_169 = arith.constant 2 : i32
    %269 = arith.addi %268, %c2_i32_169 : i32
    %c13_i32_170 = arith.constant 13 : i32
    %270 = arith.muli %269, %c13_i32_170 : i32
    %c1_i32_171 = arith.constant 1 : i32
    %271 = arith.addi %270, %c1_i32_171 : i32
    %272 = arith.index_cast %271 : i32 to index
    %273 = memref.load %arg2[%272] : memref<416xi32, #tpu.memory_space<smem>>
    %274 = arith.index_cast %273 : i32 to index
    %c0_172 = arith.constant 0 : index
    %275 = vector.load %arg3[%274, %c0_172] : memref<32x128xf32, #tpu.memory_space<vmem>>, vector<1x128xf32>
    %c33 = arith.constant 33 : index
    %c0_173 = arith.constant 0 : index
    %276 = vector.load %arg6[%c33, %c0_173] : memref<128x128xf32, #tpu.memory_space<vmem>>, vector<1x128xf32>
    tpu.vector_store %arg6[%c33, %c0_173], %275 {strides = array<i32>} : memref<128x128xf32, #tpu.memory_space<vmem>>, vector<1x128xf32>,
    %c8_i32_174 = arith.constant 8 : i32
    %277 = arith.muli %arg0, %c8_i32_174 : i32
    %c2_i32_175 = arith.constant 2 : i32
    %278 = arith.addi %277, %c2_i32_175 : i32
    %c13_i32_176 = arith.constant 13 : i32
    %279 = arith.muli %278, %c13_i32_176 : i32
    %c2_i32_177 = arith.constant 2 : i32
    %280 = arith.addi %279, %c2_i32_177 : i32
    %281 = arith.index_cast %280 : i32 to index
    %282 = memref.load %arg2[%281] : memref<416xi32, #tpu.memory_space<smem>>
    %283 = arith.index_cast %282 : i32 to index
    %c0_178 = arith.constant 0 : index
    %284 = vector.load %arg3[%283, %c0_178] : memref<32x128xf32, #tpu.memory_space<vmem>>, vector<1x128xf32>
    %c34 = arith.constant 34 : index
    %c0_179 = arith.constant 0 : index
    %285 = vector.load %arg6[%c34, %c0_179] : memref<128x128xf32, #tpu.memory_space<vmem>>, vector<1x128xf32>
    tpu.vector_store %arg6[%c34, %c0_179], %284 {strides = array<i32>} : memref<128x128xf32, #tpu.memory_space<vmem>>, vector<1x128xf32>,
    %c8_i32_180 = arith.constant 8 : i32
    %286 = arith.muli %arg0, %c8_i32_180 : i32
    %c2_i32_181 = arith.constant 2 : i32
    %287 = arith.addi %286, %c2_i32_181 : i32
    %c13_i32_182 = arith.constant 13 : i32
    %288 = arith.muli %287, %c13_i32_182 : i32
    %c3_i32_183 = arith.constant 3 : i32
    %289 = arith.addi %288, %c3_i32_183 : i32
    %290 = arith.index_cast %289 : i32 to index
    %291 = memref.load %arg2[%290] : memref<416xi32, #tpu.memory_space<smem>>
    %292 = arith.index_cast %291 : i32 to index
    %c0_184 = arith.constant 0 : index
    %293 = vector.load %arg3[%292, %c0_184] : memref<32x128xf32, #tpu.memory_space<vmem>>, vector<1x128xf32>
    %c35 = arith.constant 35 : index
    %c0_185 = arith.constant 0 : index
    %294 = vector.load %arg6[%c35, %c0_185] : memref<128x128xf32, #tpu.memory_space<vmem>>, vector<1x128xf32>
    tpu.vector_store %arg6[%c35, %c0_185], %293 {strides = array<i32>} : memref<128x128xf32, #tpu.memory_space<vmem>>, vector<1x128xf32>,
    %c8_i32_186 = arith.constant 8 : i32
    %295 = arith.muli %arg0, %c8_i32_186 : i32
    %c2_i32_187 = arith.constant 2 : i32
    %296 = arith.addi %295, %c2_i32_187 : i32
    %c13_i32_188 = arith.constant 13 : i32
    %297 = arith.muli %296, %c13_i32_188 : i32
    %c4_i32_189 = arith.constant 4 : i32
    %298 = arith.addi %297, %c4_i32_189 : i32
    %299 = arith.index_cast %298 : i32 to index
    %300 = memref.load %arg2[%299] : memref<416xi32, #tpu.memory_space<smem>>
    %301 = arith.index_cast %300 : i32 to index
    %c0_190 = arith.constant 0 : index
    %302 = vector.load %arg3[%301, %c0_190] : memref<32x128xf32, #tpu.memory_space<vmem>>, vector<1x128xf32>
    %c36 = arith.constant 36 : index
    %c0_191 = arith.constant 0 : index
    %303 = vector.load %arg6[%c36, %c0_191] : memref<128x128xf32, #tpu.memory_space<vmem>>, vector<1x128xf32>
    tpu.vector_store %arg6[%c36, %c0_191], %302 {strides = array<i32>} : memref<128x128xf32, #tpu.memory_space<vmem>>, vector<1x128xf32>,
    %c8_i32_192 = arith.constant 8 : i32
    %304 = arith.muli %arg0, %c8_i32_192 : i32
    %c2_i32_193 = arith.constant 2 : i32
    %305 = arith.addi %304, %c2_i32_193 : i32
    %c13_i32_194 = arith.constant 13 : i32
    %306 = arith.muli %305, %c13_i32_194 : i32
    %c5_i32_195 = arith.constant 5 : i32
    %307 = arith.addi %306, %c5_i32_195 : i32
    %308 = arith.index_cast %307 : i32 to index
    %309 = memref.load %arg2[%308] : memref<416xi32, #tpu.memory_space<smem>>
    %310 = arith.index_cast %309 : i32 to index
    %c0_196 = arith.constant 0 : index
    %311 = vector.load %arg3[%310, %c0_196] : memref<32x128xf32, #tpu.memory_space<vmem>>, vector<1x128xf32>
    %c37 = arith.constant 37 : index
    %c0_197 = arith.constant 0 : index
    %312 = vector.load %arg6[%c37, %c0_197] : memref<128x128xf32, #tpu.memory_space<vmem>>, vector<1x128xf32>
    tpu.vector_store %arg6[%c37, %c0_197], %311 {strides = array<i32>} : memref<128x128xf32, #tpu.memory_space<vmem>>, vector<1x128xf32>,
    %c8_i32_198 = arith.constant 8 : i32
    %313 = arith.muli %arg0, %c8_i32_198 : i32
    %c2_i32_199 = arith.constant 2 : i32
    %314 = arith.addi %313, %c2_i32_199 : i32
    %c13_i32_200 = arith.constant 13 : i32
    %315 = arith.muli %314, %c13_i32_200 : i32
    %c6_i32_201 = arith.constant 6 : i32
    %316 = arith.addi %315, %c6_i32_201 : i32
    %317 = arith.index_cast %316 : i32 to index
    %318 = memref.load %arg2[%317] : memref<416xi32, #tpu.memory_space<smem>>
    %319 = arith.index_cast %318 : i32 to index
    %c0_202 = arith.constant 0 : index
    %320 = vector.load %arg3[%319, %c0_202] : memref<32x128xf32, #tpu.memory_space<vmem>>, vector<1x128xf32>
    %c38 = arith.constant 38 : index
    %c0_203 = arith.constant 0 : index
    %321 = vector.load %arg6[%c38, %c0_203] : memref<128x128xf32, #tpu.memory_space<vmem>>, vector<1x128xf32>
    tpu.vector_store %arg6[%c38, %c0_203], %320 {strides = array<i32>} : memref<128x128xf32, #tpu.memory_space<vmem>>, vector<1x128xf32>,
    %c8_i32_204 = arith.constant 8 : i32
    %322 = arith.muli %arg0, %c8_i32_204 : i32
    %c2_i32_205 = arith.constant 2 : i32
    %323 = arith.addi %322, %c2_i32_205 : i32
    %c13_i32_206 = arith.constant 13 : i32
    %324 = arith.muli %323, %c13_i32_206 : i32
    %c7_i32_207 = arith.constant 7 : i32
    %325 = arith.addi %324, %c7_i32_207 : i32
    %326 = arith.index_cast %325 : i32 to index
    %327 = memref.load %arg2[%326] : memref<416xi32, #tpu.memory_space<smem>>
    %328 = arith.index_cast %327 : i32 to index
    %c0_208 = arith.constant 0 : index
    %329 = vector.load %arg3[%328, %c0_208] : memref<32x128xf32, #tpu.memory_space<vmem>>, vector<1x128xf32>
    %c39 = arith.constant 39 : index
    %c0_209 = arith.constant 0 : index
    %330 = vector.load %arg6[%c39, %c0_209] : memref<128x128xf32, #tpu.memory_space<vmem>>, vector<1x128xf32>
    tpu.vector_store %arg6[%c39, %c0_209], %329 {strides = array<i32>} : memref<128x128xf32, #tpu.memory_space<vmem>>, vector<1x128xf32>,
    %c8_i32_210 = arith.constant 8 : i32
    %331 = arith.muli %arg0, %c8_i32_210 : i32
    %c2_i32_211 = arith.constant 2 : i32
    %332 = arith.addi %331, %c2_i32_211 : i32
    %c13_i32_212 = arith.constant 13 : i32
    %333 = arith.muli %332, %c13_i32_212 : i32
    %c8_i32_213 = arith.constant 8 : i32
    %334 = arith.addi %333, %c8_i32_213 : i32
    %335 = arith.index_cast %334 : i32 to index
    %336 = memref.load %arg2[%335] : memref<416xi32, #tpu.memory_space<smem>>
    %337 = arith.index_cast %336 : i32 to index
    %c0_214 = arith.constant 0 : index
    %338 = vector.load %arg3[%337, %c0_214] : memref<32x128xf32, #tpu.memory_space<vmem>>, vector<1x128xf32>
    %c40 = arith.constant 40 : index
    %c0_215 = arith.constant 0 : index
    %339 = vector.load %arg6[%c40, %c0_215] : memref<128x128xf32, #tpu.memory_space<vmem>>, vector<1x128xf32>
    tpu.vector_store %arg6[%c40, %c0_215], %338 {strides = array<i32>} : memref<128x128xf32, #tpu.memory_space<vmem>>, vector<1x128xf32>,
    %c8_i32_216 = arith.constant 8 : i32
    %340 = arith.muli %arg0, %c8_i32_216 : i32
    %c2_i32_217 = arith.constant 2 : i32
    %341 = arith.addi %340, %c2_i32_217 : i32
    %c13_i32_218 = arith.constant 13 : i32
    %342 = arith.muli %341, %c13_i32_218 : i32
    %c9_i32_219 = arith.constant 9 : i32
    %343 = arith.addi %342, %c9_i32_219 : i32
    %344 = arith.index_cast %343 : i32 to index
    %345 = memref.load %arg2[%344] : memref<416xi32, #tpu.memory_space<smem>>
    %346 = arith.index_cast %345 : i32 to index
    %c0_220 = arith.constant 0 : index
    %347 = vector.load %arg3[%346, %c0_220] : memref<32x128xf32, #tpu.memory_space<vmem>>, vector<1x128xf32>
    %c41 = arith.constant 41 : index
    %c0_221 = arith.constant 0 : index
    %348 = vector.load %arg6[%c41, %c0_221] : memref<128x128xf32, #tpu.memory_space<vmem>>, vector<1x128xf32>
    tpu.vector_store %arg6[%c41, %c0_221], %347 {strides = array<i32>} : memref<128x128xf32, #tpu.memory_space<vmem>>, vector<1x128xf32>,
    %c8_i32_222 = arith.constant 8 : i32
    %349 = arith.muli %arg0, %c8_i32_222 : i32
    %c2_i32_223 = arith.constant 2 : i32
    %350 = arith.addi %349, %c2_i32_223 : i32
    %c13_i32_224 = arith.constant 13 : i32
    %351 = arith.muli %350, %c13_i32_224 : i32
    %c10_i32_225 = arith.constant 10 : i32
    %352 = arith.addi %351, %c10_i32_225 : i32
    %353 = arith.index_cast %352 : i32 to index
    %354 = memref.load %arg2[%353] : memref<416xi32, #tpu.memory_space<smem>>
    %355 = arith.index_cast %354 : i32 to index
    %c0_226 = arith.constant 0 : index
    %356 = vector.load %arg3[%355, %c0_226] : memref<32x128xf32, #tpu.memory_space<vmem>>, vector<1x128xf32>
    %c42 = arith.constant 42 : index
    %c0_227 = arith.constant 0 : index
    %357 = vector.load %arg6[%c42, %c0_227] : memref<128x128xf32, #tpu.memory_space<vmem>>, vector<1x128xf32>
    tpu.vector_store %arg6[%c42, %c0_227], %356 {strides = array<i32>} : memref<128x128xf32, #tpu.memory_space<vmem>>, vector<1x128xf32>,
    %c8_i32_228 = arith.constant 8 : i32
    %358 = arith.muli %arg0, %c8_i32_228 : i32
    %c2_i32_229 = arith.constant 2 : i32
    %359 = arith.addi %358, %c2_i32_229 : i32
    %c13_i32_230 = arith.constant 13 : i32
    %360 = arith.muli %359, %c13_i32_230 : i32
    %c11_i32_231 = arith.constant 11 : i32
    %361 = arith.addi %360, %c11_i32_231 : i32
    %362 = arith.index_cast %361 : i32 to index
    %363 = memref.load %arg2[%362] : memref<416xi32, #tpu.memory_space<smem>>
    %364 = arith.index_cast %363 : i32 to index
    %c0_232 = arith.constant 0 : index
    %365 = vector.load %arg3[%364, %c0_232] : memref<32x128xf32, #tpu.memory_space<vmem>>, vector<1x128xf32>
    %c43 = arith.constant 43 : index
    %c0_233 = arith.constant 0 : index
    %366 = vector.load %arg6[%c43, %c0_233] : memref<128x128xf32, #tpu.memory_space<vmem>>, vector<1x128xf32>
    tpu.vector_store %arg6[%c43, %c0_233], %365 {strides = array<i32>} : memref<128x128xf32, #tpu.memory_space<vmem>>, vector<1x128xf32>,
    %c8_i32_234 = arith.constant 8 : i32
    %367 = arith.muli %arg0, %c8_i32_234 : i32
    %c2_i32_235 = arith.constant 2 : i32
    %368 = arith.addi %367, %c2_i32_235 : i32
    %c13_i32_236 = arith.constant 13 : i32
    %369 = arith.muli %368, %c13_i32_236 : i32
    %c12_i32_237 = arith.constant 12 : i32
    %370 = arith.addi %369, %c12_i32_237 : i32
    %371 = arith.index_cast %370 : i32 to index
    %372 = memref.load %arg2[%371] : memref<416xi32, #tpu.memory_space<smem>>
    %373 = arith.index_cast %372 : i32 to index
    %c0_238 = arith.constant 0 : index
    %374 = vector.load %arg3[%373, %c0_238] : memref<32x128xf32, #tpu.memory_space<vmem>>, vector<1x128xf32>
    %c44 = arith.constant 44 : index
    %c0_239 = arith.constant 0 : index
    %375 = vector.load %arg6[%c44, %c0_239] : memref<128x128xf32, #tpu.memory_space<vmem>>, vector<1x128xf32>
    tpu.vector_store %arg6[%c44, %c0_239], %374 {strides = array<i32>} : memref<128x128xf32, #tpu.memory_space<vmem>>, vector<1x128xf32>,
    %c8_i32_240 = arith.constant 8 : i32
    %376 = arith.muli %arg0, %c8_i32_240 : i32
    %c3_i32_241 = arith.constant 3 : i32
    %377 = arith.addi %376, %c3_i32_241 : i32
    %378 = arith.index_cast %377 : i32 to index
    %379 = memref.load %arg1[%378] : memref<32xi32, #tpu.memory_space<smem>>
    %380 = arith.index_cast %379 : i32 to index
    %c0_242 = arith.constant 0 : index
    %381 = vector.load %arg3[%380, %c0_242] : memref<32x128xf32, #tpu.memory_space<vmem>>, vector<1x128xf32>
    %c3_243 = arith.constant 3 : index
    %c0_244 = arith.constant 0 : index
    %382 = vector.load %arg5[%c3_243, %c0_244] : memref<8x128xf32, #tpu.memory_space<vmem>>, vector<1x128xf32>
    tpu.vector_store %arg5[%c3_243, %c0_244], %381 {strides = array<i32>} : memref<8x128xf32, #tpu.memory_space<vmem>>, vector<1x128xf32>,
    %c8_i32_245 = arith.constant 8 : i32
    %383 = arith.muli %arg0, %c8_i32_245 : i32
    %c3_i32_246 = arith.constant 3 : i32
    %384 = arith.addi %383, %c3_i32_246 : i32
    %c13_i32_247 = arith.constant 13 : i32
    %385 = arith.muli %384, %c13_i32_247 : i32
    %c0_i32_248 = arith.constant 0 : i32
    %386 = arith.addi %385, %c0_i32_248 : i32
    %387 = arith.index_cast %386 : i32 to index
    %388 = memref.load %arg2[%387] : memref<416xi32, #tpu.memory_space<smem>>
    %389 = arith.index_cast %388 : i32 to index
    %c0_249 = arith.constant 0 : index
    %390 = vector.load %arg3[%389, %c0_249] : memref<32x128xf32, #tpu.memory_space<vmem>>, vector<1x128xf32>
    %c48 = arith.constant 48 : index
    %c0_250 = arith.constant 0 : index
    %391 = vector.load %arg6[%c48, %c0_250] : memref<128x128xf32, #tpu.memory_space<vmem>>, vector<1x128xf32>
    tpu.vector_store %arg6[%c48, %c0_250], %390 {strides = array<i32>} : memref<128x128xf32, #tpu.memory_space<vmem>>, vector<1x128xf32>,
    %c8_i32_251 = arith.constant 8 : i32
    %392 = arith.muli %arg0, %c8_i32_251 : i32
    %c3_i32_252 = arith.constant 3 : i32
    %393 = arith.addi %392, %c3_i32_252 : i32
    %c13_i32_253 = arith.constant 13 : i32
    %394 = arith.muli %393, %c13_i32_253 : i32
    %c1_i32_254 = arith.constant 1 : i32
    %395 = arith.addi %394, %c1_i32_254 : i32
    %396 = arith.index_cast %395 : i32 to index
    %397 = memref.load %arg2[%396] : memref<416xi32, #tpu.memory_space<smem>>
    %398 = arith.index_cast %397 : i32 to index
    %c0_255 = arith.constant 0 : index
    %399 = vector.load %arg3[%398, %c0_255] : memref<32x128xf32, #tpu.memory_space<vmem>>, vector<1x128xf32>
    %c49 = arith.constant 49 : index
    %c0_256 = arith.constant 0 : index
    %400 = vector.load %arg6[%c49, %c0_256] : memref<128x128xf32, #tpu.memory_space<vmem>>, vector<1x128xf32>
    tpu.vector_store %arg6[%c49, %c0_256], %399 {strides = array<i32>} : memref<128x128xf32, #tpu.memory_space<vmem>>, vector<1x128xf32>,
    %c8_i32_257 = arith.constant 8 : i32
    %401 = arith.muli %arg0, %c8_i32_257 : i32
    %c3_i32_258 = arith.constant 3 : i32
    %402 = arith.addi %401, %c3_i32_258 : i32
    %c13_i32_259 = arith.constant 13 : i32
    %403 = arith.muli %402, %c13_i32_259 : i32
    %c2_i32_260 = arith.constant 2 : i32
    %404 = arith.addi %403, %c2_i32_260 : i32
    %405 = arith.index_cast %404 : i32 to index
    %406 = memref.load %arg2[%405] : memref<416xi32, #tpu.memory_space<smem>>
    %407 = arith.index_cast %406 : i32 to index
    %c0_261 = arith.constant 0 : index
    %408 = vector.load %arg3[%407, %c0_261] : memref<32x128xf32, #tpu.memory_space<vmem>>, vector<1x128xf32>
    %c50 = arith.constant 50 : index
    %c0_262 = arith.constant 0 : index
    %409 = vector.load %arg6[%c50, %c0_262] : memref<128x128xf32, #tpu.memory_space<vmem>>, vector<1x128xf32>
    tpu.vector_store %arg6[%c50, %c0_262], %408 {strides = array<i32>} : memref<128x128xf32, #tpu.memory_space<vmem>>, vector<1x128xf32>,
    %c8_i32_263 = arith.constant 8 : i32
    %410 = arith.muli %arg0, %c8_i32_263 : i32
    %c3_i32_264 = arith.constant 3 : i32
    %411 = arith.addi %410, %c3_i32_264 : i32
    %c13_i32_265 = arith.constant 13 : i32
    %412 = arith.muli %411, %c13_i32_265 : i32
    %c3_i32_266 = arith.constant 3 : i32
    %413 = arith.addi %412, %c3_i32_266 : i32
    %414 = arith.index_cast %413 : i32 to index
    %415 = memref.load %arg2[%414] : memref<416xi32, #tpu.memory_space<smem>>
    %416 = arith.index_cast %415 : i32 to index
    %c0_267 = arith.constant 0 : index
    %417 = vector.load %arg3[%416, %c0_267] : memref<32x128xf32, #tpu.memory_space<vmem>>, vector<1x128xf32>
    %c51 = arith.constant 51 : index
    %c0_268 = arith.constant 0 : index
    %418 = vector.load %arg6[%c51, %c0_268] : memref<128x128xf32, #tpu.memory_space<vmem>>, vector<1x128xf32>
    tpu.vector_store %arg6[%c51, %c0_268], %417 {strides = array<i32>} : memref<128x128xf32, #tpu.memory_space<vmem>>, vector<1x128xf32>,
    %c8_i32_269 = arith.constant 8 : i32
    %419 = arith.muli %arg0, %c8_i32_269 : i32
    %c3_i32_270 = arith.constant 3 : i32
    %420 = arith.addi %419, %c3_i32_270 : i32
    %c13_i32_271 = arith.constant 13 : i32
    %421 = arith.muli %420, %c13_i32_271 : i32
    %c4_i32_272 = arith.constant 4 : i32
    %422 = arith.addi %421, %c4_i32_272 : i32
    %423 = arith.index_cast %422 : i32 to index
    %424 = memref.load %arg2[%423] : memref<416xi32, #tpu.memory_space<smem>>
    %425 = arith.index_cast %424 : i32 to index
    %c0_273 = arith.constant 0 : index
    %426 = vector.load %arg3[%425, %c0_273] : memref<32x128xf32, #tpu.memory_space<vmem>>, vector<1x128xf32>
    %c52 = arith.constant 52 : index
    %c0_274 = arith.constant 0 : index
    %427 = vector.load %arg6[%c52, %c0_274] : memref<128x128xf32, #tpu.memory_space<vmem>>, vector<1x128xf32>
    tpu.vector_store %arg6[%c52, %c0_274], %426 {strides = array<i32>} : memref<128x128xf32, #tpu.memory_space<vmem>>, vector<1x128xf32>,
    %c8_i32_275 = arith.constant 8 : i32
    %428 = arith.muli %arg0, %c8_i32_275 : i32
    %c3_i32_276 = arith.constant 3 : i32
    %429 = arith.addi %428, %c3_i32_276 : i32
    %c13_i32_277 = arith.constant 13 : i32
    %430 = arith.muli %429, %c13_i32_277 : i32
    %c5_i32_278 = arith.constant 5 : i32
    %431 = arith.addi %430, %c5_i32_278 : i32
    %432 = arith.index_cast %431 : i32 to index
    %433 = memref.load %arg2[%432] : memref<416xi32, #tpu.memory_space<smem>>
    %434 = arith.index_cast %433 : i32 to index
    %c0_279 = arith.constant 0 : index
    %435 = vector.load %arg3[%434, %c0_279] : memref<32x128xf32, #tpu.memory_space<vmem>>, vector<1x128xf32>
    %c53 = arith.constant 53 : index
    %c0_280 = arith.constant 0 : index
    %436 = vector.load %arg6[%c53, %c0_280] : memref<128x128xf32, #tpu.memory_space<vmem>>, vector<1x128xf32>
    tpu.vector_store %arg6[%c53, %c0_280], %435 {strides = array<i32>} : memref<128x128xf32, #tpu.memory_space<vmem>>, vector<1x128xf32>,
    %c8_i32_281 = arith.constant 8 : i32
    %437 = arith.muli %arg0, %c8_i32_281 : i32
    %c3_i32_282 = arith.constant 3 : i32
    %438 = arith.addi %437, %c3_i32_282 : i32
    %c13_i32_283 = arith.constant 13 : i32
    %439 = arith.muli %438, %c13_i32_283 : i32
    %c6_i32_284 = arith.constant 6 : i32
    %440 = arith.addi %439, %c6_i32_284 : i32
    %441 = arith.index_cast %440 : i32 to index
    %442 = memref.load %arg2[%441] : memref<416xi32, #tpu.memory_space<smem>>
    %443 = arith.index_cast %442 : i32 to index
    %c0_285 = arith.constant 0 : index
    %444 = vector.load %arg3[%443, %c0_285] : memref<32x128xf32, #tpu.memory_space<vmem>>, vector<1x128xf32>
    %c54 = arith.constant 54 : index
    %c0_286 = arith.constant 0 : index
    %445 = vector.load %arg6[%c54, %c0_286] : memref<128x128xf32, #tpu.memory_space<vmem>>, vector<1x128xf32>
    tpu.vector_store %arg6[%c54, %c0_286], %444 {strides = array<i32>} : memref<128x128xf32, #tpu.memory_space<vmem>>, vector<1x128xf32>,
    %c8_i32_287 = arith.constant 8 : i32
    %446 = arith.muli %arg0, %c8_i32_287 : i32
    %c3_i32_288 = arith.constant 3 : i32
    %447 = arith.addi %446, %c3_i32_288 : i32
    %c13_i32_289 = arith.constant 13 : i32
    %448 = arith.muli %447, %c13_i32_289 : i32
    %c7_i32_290 = arith.constant 7 : i32
    %449 = arith.addi %448, %c7_i32_290 : i32
    %450 = arith.index_cast %449 : i32 to index
    %451 = memref.load %arg2[%450] : memref<416xi32, #tpu.memory_space<smem>>
    %452 = arith.index_cast %451 : i32 to index
    %c0_291 = arith.constant 0 : index
    %453 = vector.load %arg3[%452, %c0_291] : memref<32x128xf32, #tpu.memory_space<vmem>>, vector<1x128xf32>
    %c55 = arith.constant 55 : index
    %c0_292 = arith.constant 0 : index
    %454 = vector.load %arg6[%c55, %c0_292] : memref<128x128xf32, #tpu.memory_space<vmem>>, vector<1x128xf32>
    tpu.vector_store %arg6[%c55, %c0_292], %453 {strides = array<i32>} : memref<128x128xf32, #tpu.memory_space<vmem>>, vector<1x128xf32>,
    %c8_i32_293 = arith.constant 8 : i32
    %455 = arith.muli %arg0, %c8_i32_293 : i32
    %c3_i32_294 = arith.constant 3 : i32
    %456 = arith.addi %455, %c3_i32_294 : i32
    %c13_i32_295 = arith.constant 13 : i32
    %457 = arith.muli %456, %c13_i32_295 : i32
    %c8_i32_296 = arith.constant 8 : i32
    %458 = arith.addi %457, %c8_i32_296 : i32
    %459 = arith.index_cast %458 : i32 to index
    %460 = memref.load %arg2[%459] : memref<416xi32, #tpu.memory_space<smem>>
    %461 = arith.index_cast %460 : i32 to index
    %c0_297 = arith.constant 0 : index
    %462 = vector.load %arg3[%461, %c0_297] : memref<32x128xf32, #tpu.memory_space<vmem>>, vector<1x128xf32>
    %c56 = arith.constant 56 : index
    %c0_298 = arith.constant 0 : index
    %463 = vector.load %arg6[%c56, %c0_298] : memref<128x128xf32, #tpu.memory_space<vmem>>, vector<1x128xf32>
    tpu.vector_store %arg6[%c56, %c0_298], %462 {strides = array<i32>} : memref<128x128xf32, #tpu.memory_space<vmem>>, vector<1x128xf32>,
    %c8_i32_299 = arith.constant 8 : i32
    %464 = arith.muli %arg0, %c8_i32_299 : i32
    %c3_i32_300 = arith.constant 3 : i32
    %465 = arith.addi %464, %c3_i32_300 : i32
    %c13_i32_301 = arith.constant 13 : i32
    %466 = arith.muli %465, %c13_i32_301 : i32
    %c9_i32_302 = arith.constant 9 : i32
    %467 = arith.addi %466, %c9_i32_302 : i32
    %468 = arith.index_cast %467 : i32 to index
    %469 = memref.load %arg2[%468] : memref<416xi32, #tpu.memory_space<smem>>
    %470 = arith.index_cast %469 : i32 to index
    %c0_303 = arith.constant 0 : index
    %471 = vector.load %arg3[%470, %c0_303] : memref<32x128xf32, #tpu.memory_space<vmem>>, vector<1x128xf32>
    %c57 = arith.constant 57 : index
    %c0_304 = arith.constant 0 : index
    %472 = vector.load %arg6[%c57, %c0_304] : memref<128x128xf32, #tpu.memory_space<vmem>>, vector<1x128xf32>
    tpu.vector_store %arg6[%c57, %c0_304], %471 {strides = array<i32>} : memref<128x128xf32, #tpu.memory_space<vmem>>, vector<1x128xf32>,
    %c8_i32_305 = arith.constant 8 : i32
    %473 = arith.muli %arg0, %c8_i32_305 : i32
    %c3_i32_306 = arith.constant 3 : i32
    %474 = arith.addi %473, %c3_i32_306 : i32
    %c13_i32_307 = arith.constant 13 : i32
    %475 = arith.muli %474, %c13_i32_307 : i32
    %c10_i32_308 = arith.constant 10 : i32
    %476 = arith.addi %475, %c10_i32_308 : i32
    %477 = arith.index_cast %476 : i32 to index
    %478 = memref.load %arg2[%477] : memref<416xi32, #tpu.memory_space<smem>>
    %479 = arith.index_cast %478 : i32 to index
    %c0_309 = arith.constant 0 : index
    %480 = vector.load %arg3[%479, %c0_309] : memref<32x128xf32, #tpu.memory_space<vmem>>, vector<1x128xf32>
    %c58 = arith.constant 58 : index
    %c0_310 = arith.constant 0 : index
    %481 = vector.load %arg6[%c58, %c0_310] : memref<128x128xf32, #tpu.memory_space<vmem>>, vector<1x128xf32>
    tpu.vector_store %arg6[%c58, %c0_310], %480 {strides = array<i32>} : memref<128x128xf32, #tpu.memory_space<vmem>>, vector<1x128xf32>,
    %c8_i32_311 = arith.constant 8 : i32
    %482 = arith.muli %arg0, %c8_i32_311 : i32
    %c3_i32_312 = arith.constant 3 : i32
    %483 = arith.addi %482, %c3_i32_312 : i32
    %c13_i32_313 = arith.constant 13 : i32
    %484 = arith.muli %483, %c13_i32_313 : i32
    %c11_i32_314 = arith.constant 11 : i32
    %485 = arith.addi %484, %c11_i32_314 : i32
    %486 = arith.index_cast %485 : i32 to index
    %487 = memref.load %arg2[%486] : memref<416xi32, #tpu.memory_space<smem>>
    %488 = arith.index_cast %487 : i32 to index
    %c0_315 = arith.constant 0 : index
    %489 = vector.load %arg3[%488, %c0_315] : memref<32x128xf32, #tpu.memory_space<vmem>>, vector<1x128xf32>
    %c59 = arith.constant 59 : index
    %c0_316 = arith.constant 0 : index
    %490 = vector.load %arg6[%c59, %c0_316] : memref<128x128xf32, #tpu.memory_space<vmem>>, vector<1x128xf32>
    tpu.vector_store %arg6[%c59, %c0_316], %489 {strides = array<i32>} : memref<128x128xf32, #tpu.memory_space<vmem>>, vector<1x128xf32>,
    %c8_i32_317 = arith.constant 8 : i32
    %491 = arith.muli %arg0, %c8_i32_317 : i32
    %c3_i32_318 = arith.constant 3 : i32
    %492 = arith.addi %491, %c3_i32_318 : i32
    %c13_i32_319 = arith.constant 13 : i32
    %493 = arith.muli %492, %c13_i32_319 : i32
    %c12_i32_320 = arith.constant 12 : i32
    %494 = arith.addi %493, %c12_i32_320 : i32
    %495 = arith.index_cast %494 : i32 to index
    %496 = memref.load %arg2[%495] : memref<416xi32, #tpu.memory_space<smem>>
    %497 = arith.index_cast %496 : i32 to index
    %c0_321 = arith.constant 0 : index
    %498 = vector.load %arg3[%497, %c0_321] : memref<32x128xf32, #tpu.memory_space<vmem>>, vector<1x128xf32>
    %c60 = arith.constant 60 : index
    %c0_322 = arith.constant 0 : index
    %499 = vector.load %arg6[%c60, %c0_322] : memref<128x128xf32, #tpu.memory_space<vmem>>, vector<1x128xf32>
    tpu.vector_store %arg6[%c60, %c0_322], %498 {strides = array<i32>} : memref<128x128xf32, #tpu.memory_space<vmem>>, vector<1x128xf32>,
    %c8_i32_323 = arith.constant 8 : i32
    %500 = arith.muli %arg0, %c8_i32_323 : i32
    %c4_i32_324 = arith.constant 4 : i32
    %501 = arith.addi %500, %c4_i32_324 : i32
    %502 = arith.index_cast %501 : i32 to index
    %503 = memref.load %arg1[%502] : memref<32xi32, #tpu.memory_space<smem>>
    %504 = arith.index_cast %503 : i32 to index
    %c0_325 = arith.constant 0 : index
    %505 = vector.load %arg3[%504, %c0_325] : memref<32x128xf32, #tpu.memory_space<vmem>>, vector<1x128xf32>
    %c4_326 = arith.constant 4 : index
    %c0_327 = arith.constant 0 : index
    %506 = vector.load %arg5[%c4_326, %c0_327] : memref<8x128xf32, #tpu.memory_space<vmem>>, vector<1x128xf32>
    tpu.vector_store %arg5[%c4_326, %c0_327], %505 {strides = array<i32>} : memref<8x128xf32, #tpu.memory_space<vmem>>, vector<1x128xf32>,
    %c8_i32_328 = arith.constant 8 : i32
    %507 = arith.muli %arg0, %c8_i32_328 : i32
    %c4_i32_329 = arith.constant 4 : i32
    %508 = arith.addi %507, %c4_i32_329 : i32
    %c13_i32_330 = arith.constant 13 : i32
    %509 = arith.muli %508, %c13_i32_330 : i32
    %c0_i32_331 = arith.constant 0 : i32
    %510 = arith.addi %509, %c0_i32_331 : i32
    %511 = arith.index_cast %510 : i32 to index
    %512 = memref.load %arg2[%511] : memref<416xi32, #tpu.memory_space<smem>>
    %513 = arith.index_cast %512 : i32 to index
    %c0_332 = arith.constant 0 : index
    %514 = vector.load %arg3[%513, %c0_332] : memref<32x128xf32, #tpu.memory_space<vmem>>, vector<1x128xf32>
    %c64 = arith.constant 64 : index
    %c0_333 = arith.constant 0 : index
    %515 = vector.load %arg6[%c64, %c0_333] : memref<128x128xf32, #tpu.memory_space<vmem>>, vector<1x128xf32>
    tpu.vector_store %arg6[%c64, %c0_333], %514 {strides = array<i32>} : memref<128x128xf32, #tpu.memory_space<vmem>>, vector<1x128xf32>,
    %c8_i32_334 = arith.constant 8 : i32
    %516 = arith.muli %arg0, %c8_i32_334 : i32
    %c4_i32_335 = arith.constant 4 : i32
    %517 = arith.addi %516, %c4_i32_335 : i32
    %c13_i32_336 = arith.constant 13 : i32
    %518 = arith.muli %517, %c13_i32_336 : i32
    %c1_i32_337 = arith.constant 1 : i32
    %519 = arith.addi %518, %c1_i32_337 : i32
    %520 = arith.index_cast %519 : i32 to index
    %521 = memref.load %arg2[%520] : memref<416xi32, #tpu.memory_space<smem>>
    %522 = arith.index_cast %521 : i32 to index
    %c0_338 = arith.constant 0 : index
    %523 = vector.load %arg3[%522, %c0_338] : memref<32x128xf32, #tpu.memory_space<vmem>>, vector<1x128xf32>
    %c65 = arith.constant 65 : index
    %c0_339 = arith.constant 0 : index
    %524 = vector.load %arg6[%c65, %c0_339] : memref<128x128xf32, #tpu.memory_space<vmem>>, vector<1x128xf32>
    tpu.vector_store %arg6[%c65, %c0_339], %523 {strides = array<i32>} : memref<128x128xf32, #tpu.memory_space<vmem>>, vector<1x128xf32>,
    %c8_i32_340 = arith.constant 8 : i32
    %525 = arith.muli %arg0, %c8_i32_340 : i32
    %c4_i32_341 = arith.constant 4 : i32
    %526 = arith.addi %525, %c4_i32_341 : i32
    %c13_i32_342 = arith.constant 13 : i32
    %527 = arith.muli %526, %c13_i32_342 : i32
    %c2_i32_343 = arith.constant 2 : i32
    %528 = arith.addi %527, %c2_i32_343 : i32
    %529 = arith.index_cast %528 : i32 to index
    %530 = memref.load %arg2[%529] : memref<416xi32, #tpu.memory_space<smem>>
    %531 = arith.index_cast %530 : i32 to index
    %c0_344 = arith.constant 0 : index
    %532 = vector.load %arg3[%531, %c0_344] : memref<32x128xf32, #tpu.memory_space<vmem>>, vector<1x128xf32>
    %c66 = arith.constant 66 : index
    %c0_345 = arith.constant 0 : index
    %533 = vector.load %arg6[%c66, %c0_345] : memref<128x128xf32, #tpu.memory_space<vmem>>, vector<1x128xf32>
    tpu.vector_store %arg6[%c66, %c0_345], %532 {strides = array<i32>} : memref<128x128xf32, #tpu.memory_space<vmem>>, vector<1x128xf32>,
    %c8_i32_346 = arith.constant 8 : i32
    %534 = arith.muli %arg0, %c8_i32_346 : i32
    %c4_i32_347 = arith.constant 4 : i32
    %535 = arith.addi %534, %c4_i32_347 : i32
    %c13_i32_348 = arith.constant 13 : i32
    %536 = arith.muli %535, %c13_i32_348 : i32
    %c3_i32_349 = arith.constant 3 : i32
    %537 = arith.addi %536, %c3_i32_349 : i32
    %538 = arith.index_cast %537 : i32 to index
    %539 = memref.load %arg2[%538] : memref<416xi32, #tpu.memory_space<smem>>
    %540 = arith.index_cast %539 : i32 to index
    %c0_350 = arith.constant 0 : index
    %541 = vector.load %arg3[%540, %c0_350] : memref<32x128xf32, #tpu.memory_space<vmem>>, vector<1x128xf32>
    %c67 = arith.constant 67 : index
    %c0_351 = arith.constant 0 : index
    %542 = vector.load %arg6[%c67, %c0_351] : memref<128x128xf32, #tpu.memory_space<vmem>>, vector<1x128xf32>
    tpu.vector_store %arg6[%c67, %c0_351], %541 {strides = array<i32>} : memref<128x128xf32, #tpu.memory_space<vmem>>, vector<1x128xf32>,
    %c8_i32_352 = arith.constant 8 : i32
    %543 = arith.muli %arg0, %c8_i32_352 : i32
    %c4_i32_353 = arith.constant 4 : i32
    %544 = arith.addi %543, %c4_i32_353 : i32
    %c13_i32_354 = arith.constant 13 : i32
    %545 = arith.muli %544, %c13_i32_354 : i32
    %c4_i32_355 = arith.constant 4 : i32
    %546 = arith.addi %545, %c4_i32_355 : i32
    %547 = arith.index_cast %546 : i32 to index
    %548 = memref.load %arg2[%547] : memref<416xi32, #tpu.memory_space<smem>>
    %549 = arith.index_cast %548 : i32 to index
    %c0_356 = arith.constant 0 : index
    %550 = vector.load %arg3[%549, %c0_356] : memref<32x128xf32, #tpu.memory_space<vmem>>, vector<1x128xf32>
    %c68 = arith.constant 68 : index
    %c0_357 = arith.constant 0 : index
    %551 = vector.load %arg6[%c68, %c0_357] : memref<128x128xf32, #tpu.memory_space<vmem>>, vector<1x128xf32>
    tpu.vector_store %arg6[%c68, %c0_357], %550 {strides = array<i32>} : memref<128x128xf32, #tpu.memory_space<vmem>>, vector<1x128xf32>,
    %c8_i32_358 = arith.constant 8 : i32
    %552 = arith.muli %arg0, %c8_i32_358 : i32
    %c4_i32_359 = arith.constant 4 : i32
    %553 = arith.addi %552, %c4_i32_359 : i32
    %c13_i32_360 = arith.constant 13 : i32
    %554 = arith.muli %553, %c13_i32_360 : i32
    %c5_i32_361 = arith.constant 5 : i32
    %555 = arith.addi %554, %c5_i32_361 : i32
    %556 = arith.index_cast %555 : i32 to index
    %557 = memref.load %arg2[%556] : memref<416xi32, #tpu.memory_space<smem>>
    %558 = arith.index_cast %557 : i32 to index
    %c0_362 = arith.constant 0 : index
    %559 = vector.load %arg3[%558, %c0_362] : memref<32x128xf32, #tpu.memory_space<vmem>>, vector<1x128xf32>
    %c69 = arith.constant 69 : index
    %c0_363 = arith.constant 0 : index
    %560 = vector.load %arg6[%c69, %c0_363] : memref<128x128xf32, #tpu.memory_space<vmem>>, vector<1x128xf32>
    tpu.vector_store %arg6[%c69, %c0_363], %559 {strides = array<i32>} : memref<128x128xf32, #tpu.memory_space<vmem>>, vector<1x128xf32>,
    %c8_i32_364 = arith.constant 8 : i32
    %561 = arith.muli %arg0, %c8_i32_364 : i32
    %c4_i32_365 = arith.constant 4 : i32
    %562 = arith.addi %561, %c4_i32_365 : i32
    %c13_i32_366 = arith.constant 13 : i32
    %563 = arith.muli %562, %c13_i32_366 : i32
    %c6_i32_367 = arith.constant 6 : i32
    %564 = arith.addi %563, %c6_i32_367 : i32
    %565 = arith.index_cast %564 : i32 to index
    %566 = memref.load %arg2[%565] : memref<416xi32, #tpu.memory_space<smem>>
    %567 = arith.index_cast %566 : i32 to index
    %c0_368 = arith.constant 0 : index
    %568 = vector.load %arg3[%567, %c0_368] : memref<32x128xf32, #tpu.memory_space<vmem>>, vector<1x128xf32>
    %c70 = arith.constant 70 : index
    %c0_369 = arith.constant 0 : index
    %569 = vector.load %arg6[%c70, %c0_369] : memref<128x128xf32, #tpu.memory_space<vmem>>, vector<1x128xf32>
    tpu.vector_store %arg6[%c70, %c0_369], %568 {strides = array<i32>} : memref<128x128xf32, #tpu.memory_space<vmem>>, vector<1x128xf32>,
    %c8_i32_370 = arith.constant 8 : i32
    %570 = arith.muli %arg0, %c8_i32_370 : i32
    %c4_i32_371 = arith.constant 4 : i32
    %571 = arith.addi %570, %c4_i32_371 : i32
    %c13_i32_372 = arith.constant 13 : i32
    %572 = arith.muli %571, %c13_i32_372 : i32
    %c7_i32_373 = arith.constant 7 : i32
    %573 = arith.addi %572, %c7_i32_373 : i32
    %574 = arith.index_cast %573 : i32 to index
    %575 = memref.load %arg2[%574] : memref<416xi32, #tpu.memory_space<smem>>
    %576 = arith.index_cast %575 : i32 to index
    %c0_374 = arith.constant 0 : index
    %577 = vector.load %arg3[%576, %c0_374] : memref<32x128xf32, #tpu.memory_space<vmem>>, vector<1x128xf32>
    %c71 = arith.constant 71 : index
    %c0_375 = arith.constant 0 : index
    %578 = vector.load %arg6[%c71, %c0_375] : memref<128x128xf32, #tpu.memory_space<vmem>>, vector<1x128xf32>
    tpu.vector_store %arg6[%c71, %c0_375], %577 {strides = array<i32>} : memref<128x128xf32, #tpu.memory_space<vmem>>, vector<1x128xf32>,
    %c8_i32_376 = arith.constant 8 : i32
    %579 = arith.muli %arg0, %c8_i32_376 : i32
    %c4_i32_377 = arith.constant 4 : i32
    %580 = arith.addi %579, %c4_i32_377 : i32
    %c13_i32_378 = arith.constant 13 : i32
    %581 = arith.muli %580, %c13_i32_378 : i32
    %c8_i32_379 = arith.constant 8 : i32
    %582 = arith.addi %581, %c8_i32_379 : i32
    %583 = arith.index_cast %582 : i32 to index
    %584 = memref.load %arg2[%583] : memref<416xi32, #tpu.memory_space<smem>>
    %585 = arith.index_cast %584 : i32 to index
    %c0_380 = arith.constant 0 : index
    %586 = vector.load %arg3[%585, %c0_380] : memref<32x128xf32, #tpu.memory_space<vmem>>, vector<1x128xf32>
    %c72 = arith.constant 72 : index
    %c0_381 = arith.constant 0 : index
    %587 = vector.load %arg6[%c72, %c0_381] : memref<128x128xf32, #tpu.memory_space<vmem>>, vector<1x128xf32>
    tpu.vector_store %arg6[%c72, %c0_381], %586 {strides = array<i32>} : memref<128x128xf32, #tpu.memory_space<vmem>>, vector<1x128xf32>,
    %c8_i32_382 = arith.constant 8 : i32
    %588 = arith.muli %arg0, %c8_i32_382 : i32
    %c4_i32_383 = arith.constant 4 : i32
    %589 = arith.addi %588, %c4_i32_383 : i32
    %c13_i32_384 = arith.constant 13 : i32
    %590 = arith.muli %589, %c13_i32_384 : i32
    %c9_i32_385 = arith.constant 9 : i32
    %591 = arith.addi %590, %c9_i32_385 : i32
    %592 = arith.index_cast %591 : i32 to index
    %593 = memref.load %arg2[%592] : memref<416xi32, #tpu.memory_space<smem>>
    %594 = arith.index_cast %593 : i32 to index
    %c0_386 = arith.constant 0 : index
    %595 = vector.load %arg3[%594, %c0_386] : memref<32x128xf32, #tpu.memory_space<vmem>>, vector<1x128xf32>
    %c73 = arith.constant 73 : index
    %c0_387 = arith.constant 0 : index
    %596 = vector.load %arg6[%c73, %c0_387] : memref<128x128xf32, #tpu.memory_space<vmem>>, vector<1x128xf32>
    tpu.vector_store %arg6[%c73, %c0_387], %595 {strides = array<i32>} : memref<128x128xf32, #tpu.memory_space<vmem>>, vector<1x128xf32>,
    %c8_i32_388 = arith.constant 8 : i32
    %597 = arith.muli %arg0, %c8_i32_388 : i32
    %c4_i32_389 = arith.constant 4 : i32
    %598 = arith.addi %597, %c4_i32_389 : i32
    %c13_i32_390 = arith.constant 13 : i32
    %599 = arith.muli %598, %c13_i32_390 : i32
    %c10_i32_391 = arith.constant 10 : i32
    %600 = arith.addi %599, %c10_i32_391 : i32
    %601 = arith.index_cast %600 : i32 to index
    %602 = memref.load %arg2[%601] : memref<416xi32, #tpu.memory_space<smem>>
    %603 = arith.index_cast %602 : i32 to index
    %c0_392 = arith.constant 0 : index
    %604 = vector.load %arg3[%603, %c0_392] : memref<32x128xf32, #tpu.memory_space<vmem>>, vector<1x128xf32>
    %c74 = arith.constant 74 : index
    %c0_393 = arith.constant 0 : index
    %605 = vector.load %arg6[%c74, %c0_393] : memref<128x128xf32, #tpu.memory_space<vmem>>, vector<1x128xf32>
    tpu.vector_store %arg6[%c74, %c0_393], %604 {strides = array<i32>} : memref<128x128xf32, #tpu.memory_space<vmem>>, vector<1x128xf32>,
    %c8_i32_394 = arith.constant 8 : i32
    %606 = arith.muli %arg0, %c8_i32_394 : i32
    %c4_i32_395 = arith.constant 4 : i32
    %607 = arith.addi %606, %c4_i32_395 : i32
    %c13_i32_396 = arith.constant 13 : i32
    %608 = arith.muli %607, %c13_i32_396 : i32
    %c11_i32_397 = arith.constant 11 : i32
    %609 = arith.addi %608, %c11_i32_397 : i32
    %610 = arith.index_cast %609 : i32 to index
    %611 = memref.load %arg2[%610] : memref<416xi32, #tpu.memory_space<smem>>
    %612 = arith.index_cast %611 : i32 to index
    %c0_398 = arith.constant 0 : index
    %613 = vector.load %arg3[%612, %c0_398] : memref<32x128xf32, #tpu.memory_space<vmem>>, vector<1x128xf32>
    %c75 = arith.constant 75 : index
    %c0_399 = arith.constant 0 : index
    %614 = vector.load %arg6[%c75, %c0_399] : memref<128x128xf32, #tpu.memory_space<vmem>>, vector<1x128xf32>
    tpu.vector_store %arg6[%c75, %c0_399], %613 {strides = array<i32>} : memref<128x128xf32, #tpu.memory_space<vmem>>, vector<1x128xf32>,
    %c8_i32_400 = arith.constant 8 : i32
    %615 = arith.muli %arg0, %c8_i32_400 : i32
    %c4_i32_401 = arith.constant 4 : i32
    %616 = arith.addi %615, %c4_i32_401 : i32
    %c13_i32_402 = arith.constant 13 : i32
    %617 = arith.muli %616, %c13_i32_402 : i32
    %c12_i32_403 = arith.constant 12 : i32
    %618 = arith.addi %617, %c12_i32_403 : i32
    %619 = arith.index_cast %618 : i32 to index
    %620 = memref.load %arg2[%619] : memref<416xi32, #tpu.memory_space<smem>>
    %621 = arith.index_cast %620 : i32 to index
    %c0_404 = arith.constant 0 : index
    %622 = vector.load %arg3[%621, %c0_404] : memref<32x128xf32, #tpu.memory_space<vmem>>, vector<1x128xf32>
    %c76 = arith.constant 76 : index
    %c0_405 = arith.constant 0 : index
    %623 = vector.load %arg6[%c76, %c0_405] : memref<128x128xf32, #tpu.memory_space<vmem>>, vector<1x128xf32>
    tpu.vector_store %arg6[%c76, %c0_405], %622 {strides = array<i32>} : memref<128x128xf32, #tpu.memory_space<vmem>>, vector<1x128xf32>,
    %c8_i32_406 = arith.constant 8 : i32
    %624 = arith.muli %arg0, %c8_i32_406 : i32
    %c5_i32_407 = arith.constant 5 : i32
    %625 = arith.addi %624, %c5_i32_407 : i32
    %626 = arith.index_cast %625 : i32 to index
    %627 = memref.load %arg1[%626] : memref<32xi32, #tpu.memory_space<smem>>
    %628 = arith.index_cast %627 : i32 to index
    %c0_408 = arith.constant 0 : index
    %629 = vector.load %arg3[%628, %c0_408] : memref<32x128xf32, #tpu.memory_space<vmem>>, vector<1x128xf32>
    %c5_409 = arith.constant 5 : index
    %c0_410 = arith.constant 0 : index
    %630 = vector.load %arg5[%c5_409, %c0_410] : memref<8x128xf32, #tpu.memory_space<vmem>>, vector<1x128xf32>
    tpu.vector_store %arg5[%c5_409, %c0_410], %629 {strides = array<i32>} : memref<8x128xf32, #tpu.memory_space<vmem>>, vector<1x128xf32>,
    %c8_i32_411 = arith.constant 8 : i32
    %631 = arith.muli %arg0, %c8_i32_411 : i32
    %c5_i32_412 = arith.constant 5 : i32
    %632 = arith.addi %631, %c5_i32_412 : i32
    %c13_i32_413 = arith.constant 13 : i32
    %633 = arith.muli %632, %c13_i32_413 : i32
    %c0_i32_414 = arith.constant 0 : i32
    %634 = arith.addi %633, %c0_i32_414 : i32
    %635 = arith.index_cast %634 : i32 to index
    %636 = memref.load %arg2[%635] : memref<416xi32, #tpu.memory_space<smem>>
    %637 = arith.index_cast %636 : i32 to index
    %c0_415 = arith.constant 0 : index
    %638 = vector.load %arg3[%637, %c0_415] : memref<32x128xf32, #tpu.memory_space<vmem>>, vector<1x128xf32>
    %c80 = arith.constant 80 : index
    %c0_416 = arith.constant 0 : index
    %639 = vector.load %arg6[%c80, %c0_416] : memref<128x128xf32, #tpu.memory_space<vmem>>, vector<1x128xf32>
    tpu.vector_store %arg6[%c80, %c0_416], %638 {strides = array<i32>} : memref<128x128xf32, #tpu.memory_space<vmem>>, vector<1x128xf32>,
    %c8_i32_417 = arith.constant 8 : i32
    %640 = arith.muli %arg0, %c8_i32_417 : i32
    %c5_i32_418 = arith.constant 5 : i32
    %641 = arith.addi %640, %c5_i32_418 : i32
    %c13_i32_419 = arith.constant 13 : i32
    %642 = arith.muli %641, %c13_i32_419 : i32
    %c1_i32_420 = arith.constant 1 : i32
    %643 = arith.addi %642, %c1_i32_420 : i32
    %644 = arith.index_cast %643 : i32 to index
    %645 = memref.load %arg2[%644] : memref<416xi32, #tpu.memory_space<smem>>
    %646 = arith.index_cast %645 : i32 to index
    %c0_421 = arith.constant 0 : index
    %647 = vector.load %arg3[%646, %c0_421] : memref<32x128xf32, #tpu.memory_space<vmem>>, vector<1x128xf32>
    %c81 = arith.constant 81 : index
    %c0_422 = arith.constant 0 : index
    %648 = vector.load %arg6[%c81, %c0_422] : memref<128x128xf32, #tpu.memory_space<vmem>>, vector<1x128xf32>
    tpu.vector_store %arg6[%c81, %c0_422], %647 {strides = array<i32>} : memref<128x128xf32, #tpu.memory_space<vmem>>, vector<1x128xf32>,
    %c8_i32_423 = arith.constant 8 : i32
    %649 = arith.muli %arg0, %c8_i32_423 : i32
    %c5_i32_424 = arith.constant 5 : i32
    %650 = arith.addi %649, %c5_i32_424 : i32
    %c13_i32_425 = arith.constant 13 : i32
    %651 = arith.muli %650, %c13_i32_425 : i32
    %c2_i32_426 = arith.constant 2 : i32
    %652 = arith.addi %651, %c2_i32_426 : i32
    %653 = arith.index_cast %652 : i32 to index
    %654 = memref.load %arg2[%653] : memref<416xi32, #tpu.memory_space<smem>>
    %655 = arith.index_cast %654 : i32 to index
    %c0_427 = arith.constant 0 : index
    %656 = vector.load %arg3[%655, %c0_427] : memref<32x128xf32, #tpu.memory_space<vmem>>, vector<1x128xf32>
    %c82 = arith.constant 82 : index
    %c0_428 = arith.constant 0 : index
    %657 = vector.load %arg6[%c82, %c0_428] : memref<128x128xf32, #tpu.memory_space<vmem>>, vector<1x128xf32>
    tpu.vector_store %arg6[%c82, %c0_428], %656 {strides = array<i32>} : memref<128x128xf32, #tpu.memory_space<vmem>>, vector<1x128xf32>,
    %c8_i32_429 = arith.constant 8 : i32
    %658 = arith.muli %arg0, %c8_i32_429 : i32
    %c5_i32_430 = arith.constant 5 : i32
    %659 = arith.addi %658, %c5_i32_430 : i32
    %c13_i32_431 = arith.constant 13 : i32
    %660 = arith.muli %659, %c13_i32_431 : i32
    %c3_i32_432 = arith.constant 3 : i32
    %661 = arith.addi %660, %c3_i32_432 : i32
    %662 = arith.index_cast %661 : i32 to index
    %663 = memref.load %arg2[%662] : memref<416xi32, #tpu.memory_space<smem>>
    %664 = arith.index_cast %663 : i32 to index
    %c0_433 = arith.constant 0 : index
    %665 = vector.load %arg3[%664, %c0_433] : memref<32x128xf32, #tpu.memory_space<vmem>>, vector<1x128xf32>
    %c83 = arith.constant 83 : index
    %c0_434 = arith.constant 0 : index
    %666 = vector.load %arg6[%c83, %c0_434] : memref<128x128xf32, #tpu.memory_space<vmem>>, vector<1x128xf32>
    tpu.vector_store %arg6[%c83, %c0_434], %665 {strides = array<i32>} : memref<128x128xf32, #tpu.memory_space<vmem>>, vector<1x128xf32>,
    %c8_i32_435 = arith.constant 8 : i32
    %667 = arith.muli %arg0, %c8_i32_435 : i32
    %c5_i32_436 = arith.constant 5 : i32
    %668 = arith.addi %667, %c5_i32_436 : i32
    %c13_i32_437 = arith.constant 13 : i32
    %669 = arith.muli %668, %c13_i32_437 : i32
    %c4_i32_438 = arith.constant 4 : i32
    %670 = arith.addi %669, %c4_i32_438 : i32
    %671 = arith.index_cast %670 : i32 to index
    %672 = memref.load %arg2[%671] : memref<416xi32, #tpu.memory_space<smem>>
    %673 = arith.index_cast %672 : i32 to index
    %c0_439 = arith.constant 0 : index
    %674 = vector.load %arg3[%673, %c0_439] : memref<32x128xf32, #tpu.memory_space<vmem>>, vector<1x128xf32>
    %c84 = arith.constant 84 : index
    %c0_440 = arith.constant 0 : index
    %675 = vector.load %arg6[%c84, %c0_440] : memref<128x128xf32, #tpu.memory_space<vmem>>, vector<1x128xf32>
    tpu.vector_store %arg6[%c84, %c0_440], %674 {strides = array<i32>} : memref<128x128xf32, #tpu.memory_space<vmem>>, vector<1x128xf32>,
    %c8_i32_441 = arith.constant 8 : i32
    %676 = arith.muli %arg0, %c8_i32_441 : i32
    %c5_i32_442 = arith.constant 5 : i32
    %677 = arith.addi %676, %c5_i32_442 : i32
    %c13_i32_443 = arith.constant 13 : i32
    %678 = arith.muli %677, %c13_i32_443 : i32
    %c5_i32_444 = arith.constant 5 : i32
    %679 = arith.addi %678, %c5_i32_444 : i32
    %680 = arith.index_cast %679 : i32 to index
    %681 = memref.load %arg2[%680] : memref<416xi32, #tpu.memory_space<smem>>
    %682 = arith.index_cast %681 : i32 to index
    %c0_445 = arith.constant 0 : index
    %683 = vector.load %arg3[%682, %c0_445] : memref<32x128xf32, #tpu.memory_space<vmem>>, vector<1x128xf32>
    %c85 = arith.constant 85 : index
    %c0_446 = arith.constant 0 : index
    %684 = vector.load %arg6[%c85, %c0_446] : memref<128x128xf32, #tpu.memory_space<vmem>>, vector<1x128xf32>
    tpu.vector_store %arg6[%c85, %c0_446], %683 {strides = array<i32>} : memref<128x128xf32, #tpu.memory_space<vmem>>, vector<1x128xf32>,
    %c8_i32_447 = arith.constant 8 : i32
    %685 = arith.muli %arg0, %c8_i32_447 : i32
    %c5_i32_448 = arith.constant 5 : i32
    %686 = arith.addi %685, %c5_i32_448 : i32
    %c13_i32_449 = arith.constant 13 : i32
    %687 = arith.muli %686, %c13_i32_449 : i32
    %c6_i32_450 = arith.constant 6 : i32
    %688 = arith.addi %687, %c6_i32_450 : i32
    %689 = arith.index_cast %688 : i32 to index
    %690 = memref.load %arg2[%689] : memref<416xi32, #tpu.memory_space<smem>>
    %691 = arith.index_cast %690 : i32 to index
    %c0_451 = arith.constant 0 : index
    %692 = vector.load %arg3[%691, %c0_451] : memref<32x128xf32, #tpu.memory_space<vmem>>, vector<1x128xf32>
    %c86 = arith.constant 86 : index
    %c0_452 = arith.constant 0 : index
    %693 = vector.load %arg6[%c86, %c0_452] : memref<128x128xf32, #tpu.memory_space<vmem>>, vector<1x128xf32>
    tpu.vector_store %arg6[%c86, %c0_452], %692 {strides = array<i32>} : memref<128x128xf32, #tpu.memory_space<vmem>>, vector<1x128xf32>,
    %c8_i32_453 = arith.constant 8 : i32
    %694 = arith.muli %arg0, %c8_i32_453 : i32
    %c5_i32_454 = arith.constant 5 : i32
    %695 = arith.addi %694, %c5_i32_454 : i32
    %c13_i32_455 = arith.constant 13 : i32
    %696 = arith.muli %695, %c13_i32_455 : i32
    %c7_i32_456 = arith.constant 7 : i32
    %697 = arith.addi %696, %c7_i32_456 : i32
    %698 = arith.index_cast %697 : i32 to index
    %699 = memref.load %arg2[%698] : memref<416xi32, #tpu.memory_space<smem>>
    %700 = arith.index_cast %699 : i32 to index
    %c0_457 = arith.constant 0 : index
    %701 = vector.load %arg3[%700, %c0_457] : memref<32x128xf32, #tpu.memory_space<vmem>>, vector<1x128xf32>
    %c87 = arith.constant 87 : index
    %c0_458 = arith.constant 0 : index
    %702 = vector.load %arg6[%c87, %c0_458] : memref<128x128xf32, #tpu.memory_space<vmem>>, vector<1x128xf32>
    tpu.vector_store %arg6[%c87, %c0_458], %701 {strides = array<i32>} : memref<128x128xf32, #tpu.memory_space<vmem>>, vector<1x128xf32>,
    %c8_i32_459 = arith.constant 8 : i32
    %703 = arith.muli %arg0, %c8_i32_459 : i32
    %c5_i32_460 = arith.constant 5 : i32
    %704 = arith.addi %703, %c5_i32_460 : i32
    %c13_i32_461 = arith.constant 13 : i32
    %705 = arith.muli %704, %c13_i32_461 : i32
    %c8_i32_462 = arith.constant 8 : i32
    %706 = arith.addi %705, %c8_i32_462 : i32
    %707 = arith.index_cast %706 : i32 to index
    %708 = memref.load %arg2[%707] : memref<416xi32, #tpu.memory_space<smem>>
    %709 = arith.index_cast %708 : i32 to index
    %c0_463 = arith.constant 0 : index
    %710 = vector.load %arg3[%709, %c0_463] : memref<32x128xf32, #tpu.memory_space<vmem>>, vector<1x128xf32>
    %c88 = arith.constant 88 : index
    %c0_464 = arith.constant 0 : index
    %711 = vector.load %arg6[%c88, %c0_464] : memref<128x128xf32, #tpu.memory_space<vmem>>, vector<1x128xf32>
    tpu.vector_store %arg6[%c88, %c0_464], %710 {strides = array<i32>} : memref<128x128xf32, #tpu.memory_space<vmem>>, vector<1x128xf32>,
    %c8_i32_465 = arith.constant 8 : i32
    %712 = arith.muli %arg0, %c8_i32_465 : i32
    %c5_i32_466 = arith.constant 5 : i32
    %713 = arith.addi %712, %c5_i32_466 : i32
    %c13_i32_467 = arith.constant 13 : i32
    %714 = arith.muli %713, %c13_i32_467 : i32
    %c9_i32_468 = arith.constant 9 : i32
    %715 = arith.addi %714, %c9_i32_468 : i32
    %716 = arith.index_cast %715 : i32 to index
    %717 = memref.load %arg2[%716] : memref<416xi32, #tpu.memory_space<smem>>
    %718 = arith.index_cast %717 : i32 to index
    %c0_469 = arith.constant 0 : index
    %719 = vector.load %arg3[%718, %c0_469] : memref<32x128xf32, #tpu.memory_space<vmem>>, vector<1x128xf32>
    %c89 = arith.constant 89 : index
    %c0_470 = arith.constant 0 : index
    %720 = vector.load %arg6[%c89, %c0_470] : memref<128x128xf32, #tpu.memory_space<vmem>>, vector<1x128xf32>
    tpu.vector_store %arg6[%c89, %c0_470], %719 {strides = array<i32>} : memref<128x128xf32, #tpu.memory_space<vmem>>, vector<1x128xf32>,
    %c8_i32_471 = arith.constant 8 : i32
    %721 = arith.muli %arg0, %c8_i32_471 : i32
    %c5_i32_472 = arith.constant 5 : i32
    %722 = arith.addi %721, %c5_i32_472 : i32
    %c13_i32_473 = arith.constant 13 : i32
    %723 = arith.muli %722, %c13_i32_473 : i32
    %c10_i32_474 = arith.constant 10 : i32
    %724 = arith.addi %723, %c10_i32_474 : i32
    %725 = arith.index_cast %724 : i32 to index
    %726 = memref.load %arg2[%725] : memref<416xi32, #tpu.memory_space<smem>>
    %727 = arith.index_cast %726 : i32 to index
    %c0_475 = arith.constant 0 : index
    %728 = vector.load %arg3[%727, %c0_475] : memref<32x128xf32, #tpu.memory_space<vmem>>, vector<1x128xf32>
    %c90 = arith.constant 90 : index
    %c0_476 = arith.constant 0 : index
    %729 = vector.load %arg6[%c90, %c0_476] : memref<128x128xf32, #tpu.memory_space<vmem>>, vector<1x128xf32>
    tpu.vector_store %arg6[%c90, %c0_476], %728 {strides = array<i32>} : memref<128x128xf32, #tpu.memory_space<vmem>>, vector<1x128xf32>,
    %c8_i32_477 = arith.constant 8 : i32
    %730 = arith.muli %arg0, %c8_i32_477 : i32
    %c5_i32_478 = arith.constant 5 : i32
    %731 = arith.addi %730, %c5_i32_478 : i32
    %c13_i32_479 = arith.constant 13 : i32
    %732 = arith.muli %731, %c13_i32_479 : i32
    %c11_i32_480 = arith.constant 11 : i32
    %733 = arith.addi %732, %c11_i32_480 : i32
    %734 = arith.index_cast %733 : i32 to index
    %735 = memref.load %arg2[%734] : memref<416xi32, #tpu.memory_space<smem>>
    %736 = arith.index_cast %735 : i32 to index
    %c0_481 = arith.constant 0 : index
    %737 = vector.load %arg3[%736, %c0_481] : memref<32x128xf32, #tpu.memory_space<vmem>>, vector<1x128xf32>
    %c91 = arith.constant 91 : index
    %c0_482 = arith.constant 0 : index
    %738 = vector.load %arg6[%c91, %c0_482] : memref<128x128xf32, #tpu.memory_space<vmem>>, vector<1x128xf32>
    tpu.vector_store %arg6[%c91, %c0_482], %737 {strides = array<i32>} : memref<128x128xf32, #tpu.memory_space<vmem>>, vector<1x128xf32>,
    %c8_i32_483 = arith.constant 8 : i32
    %739 = arith.muli %arg0, %c8_i32_483 : i32
    %c5_i32_484 = arith.constant 5 : i32
    %740 = arith.addi %739, %c5_i32_484 : i32
    %c13_i32_485 = arith.constant 13 : i32
    %741 = arith.muli %740, %c13_i32_485 : i32
    %c12_i32_486 = arith.constant 12 : i32
    %742 = arith.addi %741, %c12_i32_486 : i32
    %743 = arith.index_cast %742 : i32 to index
    %744 = memref.load %arg2[%743] : memref<416xi32, #tpu.memory_space<smem>>
    %745 = arith.index_cast %744 : i32 to index
    %c0_487 = arith.constant 0 : index
    %746 = vector.load %arg3[%745, %c0_487] : memref<32x128xf32, #tpu.memory_space<vmem>>, vector<1x128xf32>
    %c92 = arith.constant 92 : index
    %c0_488 = arith.constant 0 : index
    %747 = vector.load %arg6[%c92, %c0_488] : memref<128x128xf32, #tpu.memory_space<vmem>>, vector<1x128xf32>
    tpu.vector_store %arg6[%c92, %c0_488], %746 {strides = array<i32>} : memref<128x128xf32, #tpu.memory_space<vmem>>, vector<1x128xf32>,
    %c8_i32_489 = arith.constant 8 : i32
    %748 = arith.muli %arg0, %c8_i32_489 : i32
    %c6_i32_490 = arith.constant 6 : i32
    %749 = arith.addi %748, %c6_i32_490 : i32
    %750 = arith.index_cast %749 : i32 to index
    %751 = memref.load %arg1[%750] : memref<32xi32, #tpu.memory_space<smem>>
    %752 = arith.index_cast %751 : i32 to index
    %c0_491 = arith.constant 0 : index
    %753 = vector.load %arg3[%752, %c0_491] : memref<32x128xf32, #tpu.memory_space<vmem>>, vector<1x128xf32>
    %c6_492 = arith.constant 6 : index
    %c0_493 = arith.constant 0 : index
    %754 = vector.load %arg5[%c6_492, %c0_493] : memref<8x128xf32, #tpu.memory_space<vmem>>, vector<1x128xf32>
    tpu.vector_store %arg5[%c6_492, %c0_493], %753 {strides = array<i32>} : memref<8x128xf32, #tpu.memory_space<vmem>>, vector<1x128xf32>,
    %c8_i32_494 = arith.constant 8 : i32
    %755 = arith.muli %arg0, %c8_i32_494 : i32
    %c6_i32_495 = arith.constant 6 : i32
    %756 = arith.addi %755, %c6_i32_495 : i32
    %c13_i32_496 = arith.constant 13 : i32
    %757 = arith.muli %756, %c13_i32_496 : i32
    %c0_i32_497 = arith.constant 0 : i32
    %758 = arith.addi %757, %c0_i32_497 : i32
    %759 = arith.index_cast %758 : i32 to index
    %760 = memref.load %arg2[%759] : memref<416xi32, #tpu.memory_space<smem>>
    %761 = arith.index_cast %760 : i32 to index
    %c0_498 = arith.constant 0 : index
    %762 = vector.load %arg3[%761, %c0_498] : memref<32x128xf32, #tpu.memory_space<vmem>>, vector<1x128xf32>
    %c96 = arith.constant 96 : index
    %c0_499 = arith.constant 0 : index
    %763 = vector.load %arg6[%c96, %c0_499] : memref<128x128xf32, #tpu.memory_space<vmem>>, vector<1x128xf32>
    tpu.vector_store %arg6[%c96, %c0_499], %762 {strides = array<i32>} : memref<128x128xf32, #tpu.memory_space<vmem>>, vector<1x128xf32>,
    %c8_i32_500 = arith.constant 8 : i32
    %764 = arith.muli %arg0, %c8_i32_500 : i32
    %c6_i32_501 = arith.constant 6 : i32
    %765 = arith.addi %764, %c6_i32_501 : i32
    %c13_i32_502 = arith.constant 13 : i32
    %766 = arith.muli %765, %c13_i32_502 : i32
    %c1_i32_503 = arith.constant 1 : i32
    %767 = arith.addi %766, %c1_i32_503 : i32
    %768 = arith.index_cast %767 : i32 to index
    %769 = memref.load %arg2[%768] : memref<416xi32, #tpu.memory_space<smem>>
    %770 = arith.index_cast %769 : i32 to index
    %c0_504 = arith.constant 0 : index
    %771 = vector.load %arg3[%770, %c0_504] : memref<32x128xf32, #tpu.memory_space<vmem>>, vector<1x128xf32>
    %c97 = arith.constant 97 : index
    %c0_505 = arith.constant 0 : index
    %772 = vector.load %arg6[%c97, %c0_505] : memref<128x128xf32, #tpu.memory_space<vmem>>, vector<1x128xf32>
    tpu.vector_store %arg6[%c97, %c0_505], %771 {strides = array<i32>} : memref<128x128xf32, #tpu.memory_space<vmem>>, vector<1x128xf32>,
    %c8_i32_506 = arith.constant 8 : i32
    %773 = arith.muli %arg0, %c8_i32_506 : i32
    %c6_i32_507 = arith.constant 6 : i32
    %774 = arith.addi %773, %c6_i32_507 : i32
    %c13_i32_508 = arith.constant 13 : i32
    %775 = arith.muli %774, %c13_i32_508 : i32
    %c2_i32_509 = arith.constant 2 : i32
    %776 = arith.addi %775, %c2_i32_509 : i32
    %777 = arith.index_cast %776 : i32 to index
    %778 = memref.load %arg2[%777] : memref<416xi32, #tpu.memory_space<smem>>
    %779 = arith.index_cast %778 : i32 to index
    %c0_510 = arith.constant 0 : index
    %780 = vector.load %arg3[%779, %c0_510] : memref<32x128xf32, #tpu.memory_space<vmem>>, vector<1x128xf32>
    %c98 = arith.constant 98 : index
    %c0_511 = arith.constant 0 : index
    %781 = vector.load %arg6[%c98, %c0_511] : memref<128x128xf32, #tpu.memory_space<vmem>>, vector<1x128xf32>
    tpu.vector_store %arg6[%c98, %c0_511], %780 {strides = array<i32>} : memref<128x128xf32, #tpu.memory_space<vmem>>, vector<1x128xf32>,
    %c8_i32_512 = arith.constant 8 : i32
    %782 = arith.muli %arg0, %c8_i32_512 : i32
    %c6_i32_513 = arith.constant 6 : i32
    %783 = arith.addi %782, %c6_i32_513 : i32
    %c13_i32_514 = arith.constant 13 : i32
    %784 = arith.muli %783, %c13_i32_514 : i32
    %c3_i32_515 = arith.constant 3 : i32
    %785 = arith.addi %784, %c3_i32_515 : i32
    %786 = arith.index_cast %785 : i32 to index
    %787 = memref.load %arg2[%786] : memref<416xi32, #tpu.memory_space<smem>>
    %788 = arith.index_cast %787 : i32 to index
    %c0_516 = arith.constant 0 : index
    %789 = vector.load %arg3[%788, %c0_516] : memref<32x128xf32, #tpu.memory_space<vmem>>, vector<1x128xf32>
    %c99 = arith.constant 99 : index
    %c0_517 = arith.constant 0 : index
    %790 = vector.load %arg6[%c99, %c0_517] : memref<128x128xf32, #tpu.memory_space<vmem>>, vector<1x128xf32>
    tpu.vector_store %arg6[%c99, %c0_517], %789 {strides = array<i32>} : memref<128x128xf32, #tpu.memory_space<vmem>>, vector<1x128xf32>,
    %c8_i32_518 = arith.constant 8 : i32
    %791 = arith.muli %arg0, %c8_i32_518 : i32
    %c6_i32_519 = arith.constant 6 : i32
    %792 = arith.addi %791, %c6_i32_519 : i32
    %c13_i32_520 = arith.constant 13 : i32
    %793 = arith.muli %792, %c13_i32_520 : i32
    %c4_i32_521 = arith.constant 4 : i32
    %794 = arith.addi %793, %c4_i32_521 : i32
    %795 = arith.index_cast %794 : i32 to index
    %796 = memref.load %arg2[%795] : memref<416xi32, #tpu.memory_space<smem>>
    %797 = arith.index_cast %796 : i32 to index
    %c0_522 = arith.constant 0 : index
    %798 = vector.load %arg3[%797, %c0_522] : memref<32x128xf32, #tpu.memory_space<vmem>>, vector<1x128xf32>
    %c100 = arith.constant 100 : index
    %c0_523 = arith.constant 0 : index
    %799 = vector.load %arg6[%c100, %c0_523] : memref<128x128xf32, #tpu.memory_space<vmem>>, vector<1x128xf32>
    tpu.vector_store %arg6[%c100, %c0_523], %798 {strides = array<i32>} : memref<128x128xf32, #tpu.memory_space<vmem>>, vector<1x128xf32>,
    %c8_i32_524 = arith.constant 8 : i32
    %800 = arith.muli %arg0, %c8_i32_524 : i32
    %c6_i32_525 = arith.constant 6 : i32
    %801 = arith.addi %800, %c6_i32_525 : i32
    %c13_i32_526 = arith.constant 13 : i32
    %802 = arith.muli %801, %c13_i32_526 : i32
    %c5_i32_527 = arith.constant 5 : i32
    %803 = arith.addi %802, %c5_i32_527 : i32
    %804 = arith.index_cast %803 : i32 to index
    %805 = memref.load %arg2[%804] : memref<416xi32, #tpu.memory_space<smem>>
    %806 = arith.index_cast %805 : i32 to index
    %c0_528 = arith.constant 0 : index
    %807 = vector.load %arg3[%806, %c0_528] : memref<32x128xf32, #tpu.memory_space<vmem>>, vector<1x128xf32>
    %c101 = arith.constant 101 : index
    %c0_529 = arith.constant 0 : index
    %808 = vector.load %arg6[%c101, %c0_529] : memref<128x128xf32, #tpu.memory_space<vmem>>, vector<1x128xf32>
    tpu.vector_store %arg6[%c101, %c0_529], %807 {strides = array<i32>} : memref<128x128xf32, #tpu.memory_space<vmem>>, vector<1x128xf32>,
    %c8_i32_530 = arith.constant 8 : i32
    %809 = arith.muli %arg0, %c8_i32_530 : i32
    %c6_i32_531 = arith.constant 6 : i32
    %810 = arith.addi %809, %c6_i32_531 : i32
    %c13_i32_532 = arith.constant 13 : i32
    %811 = arith.muli %810, %c13_i32_532 : i32
    %c6_i32_533 = arith.constant 6 : i32
    %812 = arith.addi %811, %c6_i32_533 : i32
    %813 = arith.index_cast %812 : i32 to index
    %814 = memref.load %arg2[%813] : memref<416xi32, #tpu.memory_space<smem>>
    %815 = arith.index_cast %814 : i32 to index
    %c0_534 = arith.constant 0 : index
    %816 = vector.load %arg3[%815, %c0_534] : memref<32x128xf32, #tpu.memory_space<vmem>>, vector<1x128xf32>
    %c102 = arith.constant 102 : index
    %c0_535 = arith.constant 0 : index
    %817 = vector.load %arg6[%c102, %c0_535] : memref<128x128xf32, #tpu.memory_space<vmem>>, vector<1x128xf32>
    tpu.vector_store %arg6[%c102, %c0_535], %816 {strides = array<i32>} : memref<128x128xf32, #tpu.memory_space<vmem>>, vector<1x128xf32>,
    %c8_i32_536 = arith.constant 8 : i32
    %818 = arith.muli %arg0, %c8_i32_536 : i32
    %c6_i32_537 = arith.constant 6 : i32
    %819 = arith.addi %818, %c6_i32_537 : i32
    %c13_i32_538 = arith.constant 13 : i32
    %820 = arith.muli %819, %c13_i32_538 : i32
    %c7_i32_539 = arith.constant 7 : i32
    %821 = arith.addi %820, %c7_i32_539 : i32
    %822 = arith.index_cast %821 : i32 to index
    %823 = memref.load %arg2[%822] : memref<416xi32, #tpu.memory_space<smem>>
    %824 = arith.index_cast %823 : i32 to index
    %c0_540 = arith.constant 0 : index
    %825 = vector.load %arg3[%824, %c0_540] : memref<32x128xf32, #tpu.memory_space<vmem>>, vector<1x128xf32>
    %c103 = arith.constant 103 : index
    %c0_541 = arith.constant 0 : index
    %826 = vector.load %arg6[%c103, %c0_541] : memref<128x128xf32, #tpu.memory_space<vmem>>, vector<1x128xf32>
    tpu.vector_store %arg6[%c103, %c0_541], %825 {strides = array<i32>} : memref<128x128xf32, #tpu.memory_space<vmem>>, vector<1x128xf32>,
    %c8_i32_542 = arith.constant 8 : i32
    %827 = arith.muli %arg0, %c8_i32_542 : i32
    %c6_i32_543 = arith.constant 6 : i32
    %828 = arith.addi %827, %c6_i32_543 : i32
    %c13_i32_544 = arith.constant 13 : i32
    %829 = arith.muli %828, %c13_i32_544 : i32
    %c8_i32_545 = arith.constant 8 : i32
    %830 = arith.addi %829, %c8_i32_545 : i32
    %831 = arith.index_cast %830 : i32 to index
    %832 = memref.load %arg2[%831] : memref<416xi32, #tpu.memory_space<smem>>
    %833 = arith.index_cast %832 : i32 to index
    %c0_546 = arith.constant 0 : index
    %834 = vector.load %arg3[%833, %c0_546] : memref<32x128xf32, #tpu.memory_space<vmem>>, vector<1x128xf32>
    %c104 = arith.constant 104 : index
    %c0_547 = arith.constant 0 : index
    %835 = vector.load %arg6[%c104, %c0_547] : memref<128x128xf32, #tpu.memory_space<vmem>>, vector<1x128xf32>
    tpu.vector_store %arg6[%c104, %c0_547], %834 {strides = array<i32>} : memref<128x128xf32, #tpu.memory_space<vmem>>, vector<1x128xf32>,
    %c8_i32_548 = arith.constant 8 : i32
    %836 = arith.muli %arg0, %c8_i32_548 : i32
    %c6_i32_549 = arith.constant 6 : i32
    %837 = arith.addi %836, %c6_i32_549 : i32
    %c13_i32_550 = arith.constant 13 : i32
    %838 = arith.muli %837, %c13_i32_550 : i32
    %c9_i32_551 = arith.constant 9 : i32
    %839 = arith.addi %838, %c9_i32_551 : i32
    %840 = arith.index_cast %839 : i32 to index
    %841 = memref.load %arg2[%840] : memref<416xi32, #tpu.memory_space<smem>>
    %842 = arith.index_cast %841 : i32 to index
    %c0_552 = arith.constant 0 : index
    %843 = vector.load %arg3[%842, %c0_552] : memref<32x128xf32, #tpu.memory_space<vmem>>, vector<1x128xf32>
    %c105 = arith.constant 105 : index
    %c0_553 = arith.constant 0 : index
    %844 = vector.load %arg6[%c105, %c0_553] : memref<128x128xf32, #tpu.memory_space<vmem>>, vector<1x128xf32>
    tpu.vector_store %arg6[%c105, %c0_553], %843 {strides = array<i32>} : memref<128x128xf32, #tpu.memory_space<vmem>>, vector<1x128xf32>,
    %c8_i32_554 = arith.constant 8 : i32
    %845 = arith.muli %arg0, %c8_i32_554 : i32
    %c6_i32_555 = arith.constant 6 : i32
    %846 = arith.addi %845, %c6_i32_555 : i32
    %c13_i32_556 = arith.constant 13 : i32
    %847 = arith.muli %846, %c13_i32_556 : i32
    %c10_i32_557 = arith.constant 10 : i32
    %848 = arith.addi %847, %c10_i32_557 : i32
    %849 = arith.index_cast %848 : i32 to index
    %850 = memref.load %arg2[%849] : memref<416xi32, #tpu.memory_space<smem>>
    %851 = arith.index_cast %850 : i32 to index
    %c0_558 = arith.constant 0 : index
    %852 = vector.load %arg3[%851, %c0_558] : memref<32x128xf32, #tpu.memory_space<vmem>>, vector<1x128xf32>
    %c106 = arith.constant 106 : index
    %c0_559 = arith.constant 0 : index
    %853 = vector.load %arg6[%c106, %c0_559] : memref<128x128xf32, #tpu.memory_space<vmem>>, vector<1x128xf32>
    tpu.vector_store %arg6[%c106, %c0_559], %852 {strides = array<i32>} : memref<128x128xf32, #tpu.memory_space<vmem>>, vector<1x128xf32>,
    %c8_i32_560 = arith.constant 8 : i32
    %854 = arith.muli %arg0, %c8_i32_560 : i32
    %c6_i32_561 = arith.constant 6 : i32
    %855 = arith.addi %854, %c6_i32_561 : i32
    %c13_i32_562 = arith.constant 13 : i32
    %856 = arith.muli %855, %c13_i32_562 : i32
    %c11_i32_563 = arith.constant 11 : i32
    %857 = arith.addi %856, %c11_i32_563 : i32
    %858 = arith.index_cast %857 : i32 to index
    %859 = memref.load %arg2[%858] : memref<416xi32, #tpu.memory_space<smem>>
    %860 = arith.index_cast %859 : i32 to index
    %c0_564 = arith.constant 0 : index
    %861 = vector.load %arg3[%860, %c0_564] : memref<32x128xf32, #tpu.memory_space<vmem>>, vector<1x128xf32>
    %c107 = arith.constant 107 : index
    %c0_565 = arith.constant 0 : index
    %862 = vector.load %arg6[%c107, %c0_565] : memref<128x128xf32, #tpu.memory_space<vmem>>, vector<1x128xf32>
    tpu.vector_store %arg6[%c107, %c0_565], %861 {strides = array<i32>} : memref<128x128xf32, #tpu.memory_space<vmem>>, vector<1x128xf32>,
    %c8_i32_566 = arith.constant 8 : i32
    %863 = arith.muli %arg0, %c8_i32_566 : i32
    %c6_i32_567 = arith.constant 6 : i32
    %864 = arith.addi %863, %c6_i32_567 : i32
    %c13_i32_568 = arith.constant 13 : i32
    %865 = arith.muli %864, %c13_i32_568 : i32
    %c12_i32_569 = arith.constant 12 : i32
    %866 = arith.addi %865, %c12_i32_569 : i32
    %867 = arith.index_cast %866 : i32 to index
    %868 = memref.load %arg2[%867] : memref<416xi32, #tpu.memory_space<smem>>
    %869 = arith.index_cast %868 : i32 to index
    %c0_570 = arith.constant 0 : index
    %870 = vector.load %arg3[%869, %c0_570] : memref<32x128xf32, #tpu.memory_space<vmem>>, vector<1x128xf32>
    %c108 = arith.constant 108 : index
    %c0_571 = arith.constant 0 : index
    %871 = vector.load %arg6[%c108, %c0_571] : memref<128x128xf32, #tpu.memory_space<vmem>>, vector<1x128xf32>
    tpu.vector_store %arg6[%c108, %c0_571], %870 {strides = array<i32>} : memref<128x128xf32, #tpu.memory_space<vmem>>, vector<1x128xf32>,
    %c8_i32_572 = arith.constant 8 : i32
    %872 = arith.muli %arg0, %c8_i32_572 : i32
    %c7_i32_573 = arith.constant 7 : i32
    %873 = arith.addi %872, %c7_i32_573 : i32
    %874 = arith.index_cast %873 : i32 to index
    %875 = memref.load %arg1[%874] : memref<32xi32, #tpu.memory_space<smem>>
    %876 = arith.index_cast %875 : i32 to index
    %c0_574 = arith.constant 0 : index
    %877 = vector.load %arg3[%876, %c0_574] : memref<32x128xf32, #tpu.memory_space<vmem>>, vector<1x128xf32>
    %c7_575 = arith.constant 7 : index
    %c0_576 = arith.constant 0 : index
    %878 = vector.load %arg5[%c7_575, %c0_576] : memref<8x128xf32, #tpu.memory_space<vmem>>, vector<1x128xf32>
    tpu.vector_store %arg5[%c7_575, %c0_576], %877 {strides = array<i32>} : memref<8x128xf32, #tpu.memory_space<vmem>>, vector<1x128xf32>,
    %c8_i32_577 = arith.constant 8 : i32
    %879 = arith.muli %arg0, %c8_i32_577 : i32
    %c7_i32_578 = arith.constant 7 : i32
    %880 = arith.addi %879, %c7_i32_578 : i32
    %c13_i32_579 = arith.constant 13 : i32
    %881 = arith.muli %880, %c13_i32_579 : i32
    %c0_i32_580 = arith.constant 0 : i32
    %882 = arith.addi %881, %c0_i32_580 : i32
    %883 = arith.index_cast %882 : i32 to index
    %884 = memref.load %arg2[%883] : memref<416xi32, #tpu.memory_space<smem>>
    %885 = arith.index_cast %884 : i32 to index
    %c0_581 = arith.constant 0 : index
    %886 = vector.load %arg3[%885, %c0_581] : memref<32x128xf32, #tpu.memory_space<vmem>>, vector<1x128xf32>
    %c112 = arith.constant 112 : index
    %c0_582 = arith.constant 0 : index
    %887 = vector.load %arg6[%c112, %c0_582] : memref<128x128xf32, #tpu.memory_space<vmem>>, vector<1x128xf32>
    tpu.vector_store %arg6[%c112, %c0_582], %886 {strides = array<i32>} : memref<128x128xf32, #tpu.memory_space<vmem>>, vector<1x128xf32>,
    %c8_i32_583 = arith.constant 8 : i32
    %888 = arith.muli %arg0, %c8_i32_583 : i32
    %c7_i32_584 = arith.constant 7 : i32
    %889 = arith.addi %888, %c7_i32_584 : i32
    %c13_i32_585 = arith.constant 13 : i32
    %890 = arith.muli %889, %c13_i32_585 : i32
    %c1_i32_586 = arith.constant 1 : i32
    %891 = arith.addi %890, %c1_i32_586 : i32
    %892 = arith.index_cast %891 : i32 to index
    %893 = memref.load %arg2[%892] : memref<416xi32, #tpu.memory_space<smem>>
    %894 = arith.index_cast %893 : i32 to index
    %c0_587 = arith.constant 0 : index
    %895 = vector.load %arg3[%894, %c0_587] : memref<32x128xf32, #tpu.memory_space<vmem>>, vector<1x128xf32>
    %c113 = arith.constant 113 : index
    %c0_588 = arith.constant 0 : index
    %896 = vector.load %arg6[%c113, %c0_588] : memref<128x128xf32, #tpu.memory_space<vmem>>, vector<1x128xf32>
    tpu.vector_store %arg6[%c113, %c0_588], %895 {strides = array<i32>} : memref<128x128xf32, #tpu.memory_space<vmem>>, vector<1x128xf32>,
    %c8_i32_589 = arith.constant 8 : i32
    %897 = arith.muli %arg0, %c8_i32_589 : i32
    %c7_i32_590 = arith.constant 7 : i32
    %898 = arith.addi %897, %c7_i32_590 : i32
    %c13_i32_591 = arith.constant 13 : i32
    %899 = arith.muli %898, %c13_i32_591 : i32
    %c2_i32_592 = arith.constant 2 : i32
    %900 = arith.addi %899, %c2_i32_592 : i32
    %901 = arith.index_cast %900 : i32 to index
    %902 = memref.load %arg2[%901] : memref<416xi32, #tpu.memory_space<smem>>
    %903 = arith.index_cast %902 : i32 to index
    %c0_593 = arith.constant 0 : index
    %904 = vector.load %arg3[%903, %c0_593] : memref<32x128xf32, #tpu.memory_space<vmem>>, vector<1x128xf32>
    %c114 = arith.constant 114 : index
    %c0_594 = arith.constant 0 : index
    %905 = vector.load %arg6[%c114, %c0_594] : memref<128x128xf32, #tpu.memory_space<vmem>>, vector<1x128xf32>
    tpu.vector_store %arg6[%c114, %c0_594], %904 {strides = array<i32>} : memref<128x128xf32, #tpu.memory_space<vmem>>, vector<1x128xf32>,
    %c8_i32_595 = arith.constant 8 : i32
    %906 = arith.muli %arg0, %c8_i32_595 : i32
    %c7_i32_596 = arith.constant 7 : i32
    %907 = arith.addi %906, %c7_i32_596 : i32
    %c13_i32_597 = arith.constant 13 : i32
    %908 = arith.muli %907, %c13_i32_597 : i32
    %c3_i32_598 = arith.constant 3 : i32
    %909 = arith.addi %908, %c3_i32_598 : i32
    %910 = arith.index_cast %909 : i32 to index
    %911 = memref.load %arg2[%910] : memref<416xi32, #tpu.memory_space<smem>>
    %912 = arith.index_cast %911 : i32 to index
    %c0_599 = arith.constant 0 : index
    %913 = vector.load %arg3[%912, %c0_599] : memref<32x128xf32, #tpu.memory_space<vmem>>, vector<1x128xf32>
    %c115 = arith.constant 115 : index
    %c0_600 = arith.constant 0 : index
    %914 = vector.load %arg6[%c115, %c0_600] : memref<128x128xf32, #tpu.memory_space<vmem>>, vector<1x128xf32>
    tpu.vector_store %arg6[%c115, %c0_600], %913 {strides = array<i32>} : memref<128x128xf32, #tpu.memory_space<vmem>>, vector<1x128xf32>,
    %c8_i32_601 = arith.constant 8 : i32
    %915 = arith.muli %arg0, %c8_i32_601 : i32
    %c7_i32_602 = arith.constant 7 : i32
    %916 = arith.addi %915, %c7_i32_602 : i32
    %c13_i32_603 = arith.constant 13 : i32
    %917 = arith.muli %916, %c13_i32_603 : i32
    %c4_i32_604 = arith.constant 4 : i32
    %918 = arith.addi %917, %c4_i32_604 : i32
    %919 = arith.index_cast %918 : i32 to index
    %920 = memref.load %arg2[%919] : memref<416xi32, #tpu.memory_space<smem>>
    %921 = arith.index_cast %920 : i32 to index
    %c0_605 = arith.constant 0 : index
    %922 = vector.load %arg3[%921, %c0_605] : memref<32x128xf32, #tpu.memory_space<vmem>>, vector<1x128xf32>
    %c116 = arith.constant 116 : index
    %c0_606 = arith.constant 0 : index
    %923 = vector.load %arg6[%c116, %c0_606] : memref<128x128xf32, #tpu.memory_space<vmem>>, vector<1x128xf32>
    tpu.vector_store %arg6[%c116, %c0_606], %922 {strides = array<i32>} : memref<128x128xf32, #tpu.memory_space<vmem>>, vector<1x128xf32>,
    %c8_i32_607 = arith.constant 8 : i32
    %924 = arith.muli %arg0, %c8_i32_607 : i32
    %c7_i32_608 = arith.constant 7 : i32
    %925 = arith.addi %924, %c7_i32_608 : i32
    %c13_i32_609 = arith.constant 13 : i32
    %926 = arith.muli %925, %c13_i32_609 : i32
    %c5_i32_610 = arith.constant 5 : i32
    %927 = arith.addi %926, %c5_i32_610 : i32
    %928 = arith.index_cast %927 : i32 to index
    %929 = memref.load %arg2[%928] : memref<416xi32, #tpu.memory_space<smem>>
    %930 = arith.index_cast %929 : i32 to index
    %c0_611 = arith.constant 0 : index
    %931 = vector.load %arg3[%930, %c0_611] : memref<32x128xf32, #tpu.memory_space<vmem>>, vector<1x128xf32>
    %c117 = arith.constant 117 : index
    %c0_612 = arith.constant 0 : index
    %932 = vector.load %arg6[%c117, %c0_612] : memref<128x128xf32, #tpu.memory_space<vmem>>, vector<1x128xf32>
    tpu.vector_store %arg6[%c117, %c0_612], %931 {strides = array<i32>} : memref<128x128xf32, #tpu.memory_space<vmem>>, vector<1x128xf32>,
    %c8_i32_613 = arith.constant 8 : i32
    %933 = arith.muli %arg0, %c8_i32_613 : i32
    %c7_i32_614 = arith.constant 7 : i32
    %934 = arith.addi %933, %c7_i32_614 : i32
    %c13_i32_615 = arith.constant 13 : i32
    %935 = arith.muli %934, %c13_i32_615 : i32
    %c6_i32_616 = arith.constant 6 : i32
    %936 = arith.addi %935, %c6_i32_616 : i32
    %937 = arith.index_cast %936 : i32 to index
    %938 = memref.load %arg2[%937] : memref<416xi32, #tpu.memory_space<smem>>
    %939 = arith.index_cast %938 : i32 to index
    %c0_617 = arith.constant 0 : index
    %940 = vector.load %arg3[%939, %c0_617] : memref<32x128xf32, #tpu.memory_space<vmem>>, vector<1x128xf32>
    %c118 = arith.constant 118 : index
    %c0_618 = arith.constant 0 : index
    %941 = vector.load %arg6[%c118, %c0_618] : memref<128x128xf32, #tpu.memory_space<vmem>>, vector<1x128xf32>
    tpu.vector_store %arg6[%c118, %c0_618], %940 {strides = array<i32>} : memref<128x128xf32, #tpu.memory_space<vmem>>, vector<1x128xf32>,
    %c8_i32_619 = arith.constant 8 : i32
    %942 = arith.muli %arg0, %c8_i32_619 : i32
    %c7_i32_620 = arith.constant 7 : i32
    %943 = arith.addi %942, %c7_i32_620 : i32
    %c13_i32_621 = arith.constant 13 : i32
    %944 = arith.muli %943, %c13_i32_621 : i32
    %c7_i32_622 = arith.constant 7 : i32
    %945 = arith.addi %944, %c7_i32_622 : i32
    %946 = arith.index_cast %945 : i32 to index
    %947 = memref.load %arg2[%946] : memref<416xi32, #tpu.memory_space<smem>>
    %948 = arith.index_cast %947 : i32 to index
    %c0_623 = arith.constant 0 : index
    %949 = vector.load %arg3[%948, %c0_623] : memref<32x128xf32, #tpu.memory_space<vmem>>, vector<1x128xf32>
    %c119 = arith.constant 119 : index
    %c0_624 = arith.constant 0 : index
    %950 = vector.load %arg6[%c119, %c0_624] : memref<128x128xf32, #tpu.memory_space<vmem>>, vector<1x128xf32>
    tpu.vector_store %arg6[%c119, %c0_624], %949 {strides = array<i32>} : memref<128x128xf32, #tpu.memory_space<vmem>>, vector<1x128xf32>,
    %c8_i32_625 = arith.constant 8 : i32
    %951 = arith.muli %arg0, %c8_i32_625 : i32
    %c7_i32_626 = arith.constant 7 : i32
    %952 = arith.addi %951, %c7_i32_626 : i32
    %c13_i32_627 = arith.constant 13 : i32
    %953 = arith.muli %952, %c13_i32_627 : i32
    %c8_i32_628 = arith.constant 8 : i32
    %954 = arith.addi %953, %c8_i32_628 : i32
    %955 = arith.index_cast %954 : i32 to index
    %956 = memref.load %arg2[%955] : memref<416xi32, #tpu.memory_space<smem>>
    %957 = arith.index_cast %956 : i32 to index
    %c0_629 = arith.constant 0 : index
    %958 = vector.load %arg3[%957, %c0_629] : memref<32x128xf32, #tpu.memory_space<vmem>>, vector<1x128xf32>
    %c120 = arith.constant 120 : index
    %c0_630 = arith.constant 0 : index
    %959 = vector.load %arg6[%c120, %c0_630] : memref<128x128xf32, #tpu.memory_space<vmem>>, vector<1x128xf32>
    tpu.vector_store %arg6[%c120, %c0_630], %958 {strides = array<i32>} : memref<128x128xf32, #tpu.memory_space<vmem>>, vector<1x128xf32>,
    %c8_i32_631 = arith.constant 8 : i32
    %960 = arith.muli %arg0, %c8_i32_631 : i32
    %c7_i32_632 = arith.constant 7 : i32
    %961 = arith.addi %960, %c7_i32_632 : i32
    %c13_i32_633 = arith.constant 13 : i32
    %962 = arith.muli %961, %c13_i32_633 : i32
    %c9_i32_634 = arith.constant 9 : i32
    %963 = arith.addi %962, %c9_i32_634 : i32
    %964 = arith.index_cast %963 : i32 to index
    %965 = memref.load %arg2[%964] : memref<416xi32, #tpu.memory_space<smem>>
    %966 = arith.index_cast %965 : i32 to index
    %c0_635 = arith.constant 0 : index
    %967 = vector.load %arg3[%966, %c0_635] : memref<32x128xf32, #tpu.memory_space<vmem>>, vector<1x128xf32>
    %c121 = arith.constant 121 : index
    %c0_636 = arith.constant 0 : index
    %968 = vector.load %arg6[%c121, %c0_636] : memref<128x128xf32, #tpu.memory_space<vmem>>, vector<1x128xf32>
    tpu.vector_store %arg6[%c121, %c0_636], %967 {strides = array<i32>} : memref<128x128xf32, #tpu.memory_space<vmem>>, vector<1x128xf32>,
    %c8_i32_637 = arith.constant 8 : i32
    %969 = arith.muli %arg0, %c8_i32_637 : i32
    %c7_i32_638 = arith.constant 7 : i32
    %970 = arith.addi %969, %c7_i32_638 : i32
    %c13_i32_639 = arith.constant 13 : i32
    %971 = arith.muli %970, %c13_i32_639 : i32
    %c10_i32_640 = arith.constant 10 : i32
    %972 = arith.addi %971, %c10_i32_640 : i32
    %973 = arith.index_cast %972 : i32 to index
    %974 = memref.load %arg2[%973] : memref<416xi32, #tpu.memory_space<smem>>
    %975 = arith.index_cast %974 : i32 to index
    %c0_641 = arith.constant 0 : index
    %976 = vector.load %arg3[%975, %c0_641] : memref<32x128xf32, #tpu.memory_space<vmem>>, vector<1x128xf32>
    %c122 = arith.constant 122 : index
    %c0_642 = arith.constant 0 : index
    %977 = vector.load %arg6[%c122, %c0_642] : memref<128x128xf32, #tpu.memory_space<vmem>>, vector<1x128xf32>
    tpu.vector_store %arg6[%c122, %c0_642], %976 {strides = array<i32>} : memref<128x128xf32, #tpu.memory_space<vmem>>, vector<1x128xf32>,
    %c8_i32_643 = arith.constant 8 : i32
    %978 = arith.muli %arg0, %c8_i32_643 : i32
    %c7_i32_644 = arith.constant 7 : i32
    %979 = arith.addi %978, %c7_i32_644 : i32
    %c13_i32_645 = arith.constant 13 : i32
    %980 = arith.muli %979, %c13_i32_645 : i32
    %c11_i32_646 = arith.constant 11 : i32
    %981 = arith.addi %980, %c11_i32_646 : i32
    %982 = arith.index_cast %981 : i32 to index
    %983 = memref.load %arg2[%982] : memref<416xi32, #tpu.memory_space<smem>>
    %984 = arith.index_cast %983 : i32 to index
    %c0_647 = arith.constant 0 : index
    %985 = vector.load %arg3[%984, %c0_647] : memref<32x128xf32, #tpu.memory_space<vmem>>, vector<1x128xf32>
    %c123 = arith.constant 123 : index
    %c0_648 = arith.constant 0 : index
    %986 = vector.load %arg6[%c123, %c0_648] : memref<128x128xf32, #tpu.memory_space<vmem>>, vector<1x128xf32>
    tpu.vector_store %arg6[%c123, %c0_648], %985 {strides = array<i32>} : memref<128x128xf32, #tpu.memory_space<vmem>>, vector<1x128xf32>,
    %c8_i32_649 = arith.constant 8 : i32
    %987 = arith.muli %arg0, %c8_i32_649 : i32
    %c7_i32_650 = arith.constant 7 : i32
    %988 = arith.addi %987, %c7_i32_650 : i32
    %c13_i32_651 = arith.constant 13 : i32
    %989 = arith.muli %988, %c13_i32_651 : i32
    %c12_i32_652 = arith.constant 12 : i32
    %990 = arith.addi %989, %c12_i32_652 : i32
    %991 = arith.index_cast %990 : i32 to index
    %992 = memref.load %arg2[%991] : memref<416xi32, #tpu.memory_space<smem>>
    %993 = arith.index_cast %992 : i32 to index
    %c0_653 = arith.constant 0 : index
    %994 = vector.load %arg3[%993, %c0_653] : memref<32x128xf32, #tpu.memory_space<vmem>>, vector<1x128xf32>
    %c124 = arith.constant 124 : index
    %c0_654 = arith.constant 0 : index
    %995 = vector.load %arg6[%c124, %c0_654] : memref<128x128xf32, #tpu.memory_space<vmem>>, vector<1x128xf32>
    tpu.vector_store %arg6[%c124, %c0_654], %994 {strides = array<i32>} : memref<128x128xf32, #tpu.memory_space<vmem>>, vector<1x128xf32>,
    %c0_655 = arith.constant 0 : index
    %c0_656 = arith.constant 0 : index
    %996 = vector.load %arg5[%c0_655, %c0_656] : memref<8x128xf32, #tpu.memory_space<vmem>>, vector<1x128xf32>
    %c0_657 = arith.constant 0 : index
    %c0_658 = arith.constant 0 : index
    %997 = vector.load %arg6[%c0_657, %c0_658] : memref<128x128xf32, #tpu.memory_space<vmem>>, vector<16x128xf32>
    %cst_659 = arith.constant dense<0.000000e+00> : vector<1x16xf32>
    %998 = tpu.matmul %996, %997, %cst_659 {dimension_numbers = #tpu.dot_dimension_numbers<[1], [1], [0], [0], [0, 0, 1, 0], [], []>} : vector<1x128xf32>, vector<16x128xf32>, vector<1x16xf32> -> vector<1x16xf32>
    %c0_660 = arith.constant 0 : index
    %c0_661 = arith.constant 0 : index
    %999 = vector.load %arg7[%c0_660, %c0_661] : memref<8x128xf32, #tpu.memory_space<vmem>>, vector<1x16xf32>
    tpu.vector_store %arg7[%c0_660, %c0_661], %998 {strides = array<i32>} : memref<8x128xf32, #tpu.memory_space<vmem>>, vector<1x16xf32>,
    %c1_662 = arith.constant 1 : index
    %c0_663 = arith.constant 0 : index
    %1000 = vector.load %arg5[%c1_662, %c0_663] : memref<8x128xf32, #tpu.memory_space<vmem>>, vector<1x128xf32>
    %c16_664 = arith.constant 16 : index
    %c0_665 = arith.constant 0 : index
    %1001 = vector.load %arg6[%c16_664, %c0_665] : memref<128x128xf32, #tpu.memory_space<vmem>>, vector<16x128xf32>
    %cst_666 = arith.constant dense<0.000000e+00> : vector<1x16xf32>
    %1002 = tpu.matmul %1000, %1001, %cst_666 {dimension_numbers = #tpu.dot_dimension_numbers<[1], [1], [0], [0], [0, 0, 1, 0], [], []>} : vector<1x128xf32>, vector<16x128xf32>, vector<1x16xf32> -> vector<1x16xf32>
    %c1_667 = arith.constant 1 : index
    %c0_668 = arith.constant 0 : index
    %1003 = vector.load %arg7[%c1_667, %c0_668] : memref<8x128xf32, #tpu.memory_space<vmem>>, vector<1x16xf32>
    tpu.vector_store %arg7[%c1_667, %c0_668], %1002 {strides = array<i32>} : memref<8x128xf32, #tpu.memory_space<vmem>>, vector<1x16xf32>,
    %c2_669 = arith.constant 2 : index
    %c0_670 = arith.constant 0 : index
    %1004 = vector.load %arg5[%c2_669, %c0_670] : memref<8x128xf32, #tpu.memory_space<vmem>>, vector<1x128xf32>
    %c32_671 = arith.constant 32 : index
    %c0_672 = arith.constant 0 : index
    %1005 = vector.load %arg6[%c32_671, %c0_672] : memref<128x128xf32, #tpu.memory_space<vmem>>, vector<16x128xf32>
    %cst_673 = arith.constant dense<0.000000e+00> : vector<1x16xf32>
    %1006 = tpu.matmul %1004, %1005, %cst_673 {dimension_numbers = #tpu.dot_dimension_numbers<[1], [1], [0], [0], [0, 0, 1, 0], [], []>} : vector<1x128xf32>, vector<16x128xf32>, vector<1x16xf32> -> vector<1x16xf32>
    %c2_674 = arith.constant 2 : index
    %c0_675 = arith.constant 0 : index
    %1007 = vector.load %arg7[%c2_674, %c0_675] : memref<8x128xf32, #tpu.memory_space<vmem>>, vector<1x16xf32>
    tpu.vector_store %arg7[%c2_674, %c0_675], %1006 {strides = array<i32>} : memref<8x128xf32, #tpu.memory_space<vmem>>, vector<1x16xf32>,
    %c3_676 = arith.constant 3 : index
    %c0_677 = arith.constant 0 : index
    %1008 = vector.load %arg5[%c3_676, %c0_677] : memref<8x128xf32, #tpu.memory_space<vmem>>, vector<1x128xf32>
    %c48_678 = arith.constant 48 : index
    %c0_679 = arith.constant 0 : index
    %1009 = vector.load %arg6[%c48_678, %c0_679] : memref<128x128xf32, #tpu.memory_space<vmem>>, vector<16x128xf32>
    %cst_680 = arith.constant dense<0.000000e+00> : vector<1x16xf32>
    %1010 = tpu.matmul %1008, %1009, %cst_680 {dimension_numbers = #tpu.dot_dimension_numbers<[1], [1], [0], [0], [0, 0, 1, 0], [], []>} : vector<1x128xf32>, vector<16x128xf32>, vector<1x16xf32> -> vector<1x16xf32>
    %c3_681 = arith.constant 3 : index
    %c0_682 = arith.constant 0 : index
    %1011 = vector.load %arg7[%c3_681, %c0_682] : memref<8x128xf32, #tpu.memory_space<vmem>>, vector<1x16xf32>
    tpu.vector_store %arg7[%c3_681, %c0_682], %1010 {strides = array<i32>} : memref<8x128xf32, #tpu.memory_space<vmem>>, vector<1x16xf32>,
    %c4_683 = arith.constant 4 : index
    %c0_684 = arith.constant 0 : index
    %1012 = vector.load %arg5[%c4_683, %c0_684] : memref<8x128xf32, #tpu.memory_space<vmem>>, vector<1x128xf32>
    %c64_685 = arith.constant 64 : index
    %c0_686 = arith.constant 0 : index
    %1013 = vector.load %arg6[%c64_685, %c0_686] : memref<128x128xf32, #tpu.memory_space<vmem>>, vector<16x128xf32>
    %cst_687 = arith.constant dense<0.000000e+00> : vector<1x16xf32>
    %1014 = tpu.matmul %1012, %1013, %cst_687 {dimension_numbers = #tpu.dot_dimension_numbers<[1], [1], [0], [0], [0, 0, 1, 0], [], []>} : vector<1x128xf32>, vector<16x128xf32>, vector<1x16xf32> -> vector<1x16xf32>
    %c4_688 = arith.constant 4 : index
    %c0_689 = arith.constant 0 : index
    %1015 = vector.load %arg7[%c4_688, %c0_689] : memref<8x128xf32, #tpu.memory_space<vmem>>, vector<1x16xf32>
    tpu.vector_store %arg7[%c4_688, %c0_689], %1014 {strides = array<i32>} : memref<8x128xf32, #tpu.memory_space<vmem>>, vector<1x16xf32>,
    %c5_690 = arith.constant 5 : index
    %c0_691 = arith.constant 0 : index
    %1016 = vector.load %arg5[%c5_690, %c0_691] : memref<8x128xf32, #tpu.memory_space<vmem>>, vector<1x128xf32>
    %c80_692 = arith.constant 80 : index
    %c0_693 = arith.constant 0 : index
    %1017 = vector.load %arg6[%c80_692, %c0_693] : memref<128x128xf32, #tpu.memory_space<vmem>>, vector<16x128xf32>
    %cst_694 = arith.constant dense<0.000000e+00> : vector<1x16xf32>
    %1018 = tpu.matmul %1016, %1017, %cst_694 {dimension_numbers = #tpu.dot_dimension_numbers<[1], [1], [0], [0], [0, 0, 1, 0], [], []>} : vector<1x128xf32>, vector<16x128xf32>, vector<1x16xf32> -> vector<1x16xf32>
    %c5_695 = arith.constant 5 : index
    %c0_696 = arith.constant 0 : index
    %1019 = vector.load %arg7[%c5_695, %c0_696] : memref<8x128xf32, #tpu.memory_space<vmem>>, vector<1x16xf32>
    tpu.vector_store %arg7[%c5_695, %c0_696], %1018 {strides = array<i32>} : memref<8x128xf32, #tpu.memory_space<vmem>>, vector<1x16xf32>,
    %c6_697 = arith.constant 6 : index
    %c0_698 = arith.constant 0 : index
    %1020 = vector.load %arg5[%c6_697, %c0_698] : memref<8x128xf32, #tpu.memory_space<vmem>>, vector<1x128xf32>
    %c96_699 = arith.constant 96 : index
    %c0_700 = arith.constant 0 : index
    %1021 = vector.load %arg6[%c96_699, %c0_700] : memref<128x128xf32, #tpu.memory_space<vmem>>, vector<16x128xf32>
    %cst_701 = arith.constant dense<0.000000e+00> : vector<1x16xf32>
    %1022 = tpu.matmul %1020, %1021, %cst_701 {dimension_numbers = #tpu.dot_dimension_numbers<[1], [1], [0], [0], [0, 0, 1, 0], [], []>} : vector<1x128xf32>, vector<16x128xf32>, vector<1x16xf32> -> vector<1x16xf32>
    %c6_702 = arith.constant 6 : index
    %c0_703 = arith.constant 0 : index
    %1023 = vector.load %arg7[%c6_702, %c0_703] : memref<8x128xf32, #tpu.memory_space<vmem>>, vector<1x16xf32>
    tpu.vector_store %arg7[%c6_702, %c0_703], %1022 {strides = array<i32>} : memref<8x128xf32, #tpu.memory_space<vmem>>, vector<1x16xf32>,
    %c7_704 = arith.constant 7 : index
    %c0_705 = arith.constant 0 : index
    %1024 = vector.load %arg5[%c7_704, %c0_705] : memref<8x128xf32, #tpu.memory_space<vmem>>, vector<1x128xf32>
    %c112_706 = arith.constant 112 : index
    %c0_707 = arith.constant 0 : index
    %1025 = vector.load %arg6[%c112_706, %c0_707] : memref<128x128xf32, #tpu.memory_space<vmem>>, vector<16x128xf32>
    %cst_708 = arith.constant dense<0.000000e+00> : vector<1x16xf32>
    %1026 = tpu.matmul %1024, %1025, %cst_708 {dimension_numbers = #tpu.dot_dimension_numbers<[1], [1], [0], [0], [0, 0, 1, 0], [], []>} : vector<1x128xf32>, vector<16x128xf32>, vector<1x16xf32> -> vector<1x16xf32>
    %c7_709 = arith.constant 7 : index
    %c0_710 = arith.constant 0 : index
    %1027 = vector.load %arg7[%c7_709, %c0_710] : memref<8x128xf32, #tpu.memory_space<vmem>>, vector<1x16xf32>
    tpu.vector_store %arg7[%c7_709, %c0_710], %1026 {strides = array<i32>} : memref<8x128xf32, #tpu.memory_space<vmem>>, vector<1x16xf32>,
    %c0_711 = arith.constant 0 : index
    %c0_712 = arith.constant 0 : index
    %1028 = vector.load %arg7[%c0_711, %c0_712] : memref<8x128xf32, #tpu.memory_space<vmem>>, vector<8x128xf32>
    %cst_713 = arith.constant dense<0xFF800000> : vector<128xf32>
    %1029 = vector.multi_reduction <maximumf>, %1028, %cst_713 [0] : vector<8x128xf32> to vector<128xf32>
    %1030 = vector.shape_cast %1029 : vector<128xf32> to vector<1x128xf32>
    %cst_714 = arith.constant dense<0.000000e+00> : vector<128xf32>
    %1031 = vector.multi_reduction <add>, %1028, %cst_714 [0] : vector<8x128xf32> to vector<128xf32>
    %1032 = vector.shape_cast %1031 : vector<128xf32> to vector<1x128xf32>
    %1033 = vector.broadcast %1030 : vector<1x128xf32> to vector<8x128xf32>
    %1034 = arith.subf %1028, %1033 : vector<8x128xf32>
    %1035 = math.exp %1034 : vector<8x128xf32>
    %cst_715 = arith.constant dense<0.000000e+00> : vector<128xf32>
    %1036 = vector.multi_reduction <add>, %1035, %cst_715 [0] : vector<8x128xf32> to vector<128xf32>
    %1037 = vector.shape_cast %1036 : vector<128xf32> to vector<1x128xf32>
    %1038 = math.log %1037 : vector<1x128xf32>
    %1039 = arith.addf %1038, %1030 : vector<1x128xf32>
    %cst_716 = arith.constant 8.000000e+00 : f32
    %1040 = vector.broadcast %cst_716 : f32 to vector<1x128xf32>
    %1041 = arith.mulf %1040, %1039 : vector<1x128xf32>
    %1042 = arith.subf %1041, %1032 : vector<1x128xf32>
    %1043 = vector.shape_cast %1042 : vector<1x128xf32> to vector<1x1x128xf32>
    %c0_717 = arith.constant 0 : index
    %c0_718 = arith.constant 0 : index
    %c0_719 = arith.constant 0 : index
    %1044 = vector.load %arg4[%c0_717, %c0_718, %c0_719] : memref<1x1x128xf32, #tpu.memory_space<vmem>>, vector<1x1x128xf32>
    tpu.vector_store %arg4[%c0_717, %c0_718, %c0_719], %1043 {strides = array<i32>} : memref<1x1x128xf32, #tpu.memory_space<vmem>>, vector<1x1x128xf32>,
    return
  }
  func.func @transform_0(%arg0: i32, %arg1: memref<32xi32, #tpu.memory_space<smem>>, %arg2: memref<416xi32, #tpu.memory_space<smem>>) -> (i32, i32) {
    %c0_i32 = arith.constant 0 : i32
    %c0_i32_0 = arith.constant 0 : i32
    %c0_i32_1 = arith.constant 0 : i32
    return %c0_i32, %c0_i32_0 : i32, i32
  }
  func.func @transform_1(%arg0: i32, %arg1: memref<32xi32, #tpu.memory_space<smem>>, %arg2: memref<416xi32, #tpu.memory_space<smem>>) -> (i32, i32, i32) {
    %c0_i32 = arith.constant 0 : i32
    %c0_i32_0 = arith.constant 0 : i32
    %c0_i32_1 = arith.constant 0 : i32
    return %arg0, %c0_i32, %c0_i32_0 : i32, i32, i32
  }
}

</mosaic_0001>

<bundles_post_ra>
// kernel: tpu_custom_call.1
= control target key start
LH: loop header
LB: loop body
LE: loop exit
PB: predicated region body
PF: predicated region fallthrough
CT: control target
= control target key end

     0   :  { %s1295_s18 = smov [#allocation6]   ;;  %s1296_s19 = smov [#allocation7]   ;;  %s1647_s0 = inlined_call_operand.hbm [shape: s32[32], index: 0, kind: input, shape index: {}]   ;;  %s1648_s2 = inlined_call_operand.hbm [shape: f32[32,128], index: 2, kind: input, shape index: {}]   ;;  %s1649_s3 = inlined_call_operand.hbm [shape: f32[4,1,128], index: 3, kind: output, shape index: {}]   ;;  %s1650_s1 = inlined_call_operand.hbm [shape: s32[416], index: 1, kind: input, shape index: {}]  }
   0x1   :  { %1656 = sst [smem:[#allocation16_spill]] %s1648_s2  ;;  %s9_s14 = sshll.u32 %s1647_s0, 4  ;;  %s10_s14 = int_to_ptr.hbm [resolvable:$true] %s9_s14 }
   0x2   :  { %s14_s17 = sshll.u32 %s1650_s1, 4  ;;  %s15_s17 = int_to_ptr.hbm [resolvable:$true] %s14_s17 }
   0x3   :  { %12 = dma.hbm_to_smem %s10_s14, 16, %s1295_s18, [#allocation5] }
   0x4   :  { %17 = dma.hbm_to_smem %s15_s17, 64, %s1296_s19, [#allocation5] }
   0x5   :  { %1269 = dma.done.wait [#allocation5], 80 }
   0x6   :  { %1270 = vsyncadd [#allocation5], 4294967216 }
   0x7   :  { %20 = sfence }
   0x8   :  { %21 = vsyncpa [#allocation9], 0 }
   0x9   :  { %22 = vsyncpa [#allocation10], 0 }
   0xa   :  { %24 = vsyncpa [#allocation10 + $0x1], 0  ;;  %s1327_s20 = smov 0   ;;  %s1329_s21 = smov 0  }
   0xb   :  { %s1331_s0 = smov 0   ;;  %s1333_s22 = smov 0  }
   0xc LB: > { %s1348_s1 = sadd.s32 4294967295, %s1293_s22   ;;  %s1104_s23 = sadd.s32 4294967294, %s1293_s22   ;;  %s1293_s22 = sphi %s1333_s22, %s1670_s22   ;;  %s1289_s0 = sphi %s1331_s0, %s1669_s0   ;;  %s1285_s21 = sphi %s1329_s21, %s1668_s21   ;;  %s1281_s20 = sphi %s1327_s20, %s1667_s20  }
   0xd   : > { %s1352_s24 = sadd.s32 1, %s1293_s22   ;;  %s58_s25 = sadd.s32 1, %s1289_s0 }
   0xe   : > { %s55_s26 = ssub.s32 %s1293_s22, %s1352_s24  ;;  %p68_p0 = scmp.ne.s32.totalorder %s1289_s0, %s1285_s21 }
   0xf   : > { %p56_p1 = scmp.eq.s32.totalorder %s55_s26, 0  ;;  %p69_p2 = scmp.eq.s32.totalorder %s1348_s1, 3 }
  0x10   : > { %p74_p3 = scmp.ne.s32.totalorder %s1285_s21, %s1281_s20  ;;  %p75_p4 = scmp.eq.s32.totalorder %s1104_s23, 3 }
  0x11   : > { %s1363_s27 = scalar_select %p56_p1, %s1289_s0, %s58_s25  }
  0x12   : > { %p1365_p5 = por %p69_p2, %p68_p0  ;;  %p1369_p6 = por %p75_p4, %p74_p3 }
  0x13   : > { %1657 = sst [smem:[#allocation15_spill]] %s1363_s27  ;;  %p1105_p7 = scmp.ge.s32.totalorder %s1293_s22, 1 }
  0x14   : > { %p82_p8 = scmp.lt.s32.totalorder %s1293_s22, 5  ;;  %p1126_p9 = scmp.eq.s32.totalorder %s1348_s1, 0 }
  0x15   : > { %s1660_s2 = sld [smem:[#allocation16_spill]]  ;;  %s1297_s6 = smov [#allocation8]  }
  0x16   : > { %p83_p10 = pnand %p1105_p7, %p82_p8  ;;  %s95_s7 = sshll.u32 %s1297_s6, 4  ;;  %s96_s7 = int_to_ptr.vmem [resolvable:$true] %s95_s7 }
  0x17   : > { %s1298_s8 = smov 128   ;;  %s1299_s9 = smov 8  }
  0x18   : > { %p1118_p11 = pneg %p83_p10  ;;  %111 = sbr.rel (%p83_p10) target bundleno = 403 (0x193), region = 24 }
  0x1a   : > { %p1119_p12 = pnand %p1126_p9, %p1118_p11 }
  0x1b   : > { %s93_s5 = sshll.u32 %s1660_s2, 4  ;;  %s94_s5 = int_to_ptr.hbm [resolvable:$true] %s93_s5 }
  0x1c   : > { %1121 = dma.hbm_to_vmem [thread:$0]  (!%p1119_p12), %s94_s5, 512, %s96_s7, [#allocation9], %s1298_s8, %s1298_s8, %s1299_s9  }
  0x1d   : > { %1272 = dma.done.wait (%p1126_p9), [#allocation9], 512  }
  0x1e   : > { %1274 = vsyncadd (%p1126_p9), [#allocation9], 4294966784  ;;  %s1386_s10 = sshll.u32 %s1348_s1, 3  ;;  %s1389_s11 = smul.u32 104, %s1348_s1  ;;  %v1300_v0 = vmov 0.0   ;;  %vm726_vm0 = vcmask 122880  }
  0x1f   : > { %132 = vst [vmem:[#allocation3 + $0x28] sm:$0xff] %v1300_v0  ;;  %s1652_s12 = sadd.s32 2, %s1386_s10  ;;  %s1651_s13 = sadd.s32 3, %s1386_s10 }
  0x20   : > { %s1396_s14 = smul.u32 13, %s1652_s12  ;;  %126 = vst [vmem:[#allocation4] sm:$0xff] %v1300_v0  ;;  %s188_s15 = sadd.s32 8, %s1389_s11 }
  0x21   : > { %127 = vst [vmem:[#allocation3] sm:$0xff] %v1300_v0  ;;  %s1403_s16 = smul.u32 13, %s1651_s13  ;;  %s1405_s17 = sld [smem:[#allocation7 + %s188_s15]] }
  0x22   : > { %s328_s18 = sadd.s32 8, %s1396_s14  ;;  %s333_s19 = sadd.s32 9, %s1396_s14  ;;  %128 = vst [vmem:[#allocation3 + $0x8] sm:$0xff] %v1300_v0 }
  0x23   : > { %s329_s23 = sld [smem:[#allocation7 + %s328_s18]]  ;;  %s338_s25 = sadd.s32 10, %s1396_s14  ;;  %129 = vst [vmem:[#allocation3 + $0x10] sm:$0xff] %v1300_v0 }
  0x24   : > { %s334_s26 = sld [smem:[#allocation7 + %s333_s19]]  ;;  %s343_s30 = sadd.s32 11, %s1396_s14  ;;  %130 = vst [vmem:[#allocation3 + $0x18] sm:$0xff] %v1300_v0 }
  0x25   : > { %s339_s4 = sld [smem:[#allocation7 + %s338_s25]]  ;;  %s348_s5 = sadd.s32 12, %s1396_s14  ;;  %131 = vst [vmem:[#allocation3 + $0x20] sm:$0xff] %v1300_v0 }
  0x26   : > { %s344_s6 = sld [smem:[#allocation7 + %s343_s30]]  ;;  %133 = vst [vmem:[#allocation3 + $0x30] sm:$0xff] %v1300_v0  ;;  %s398_s7 = sadd.s32 8, %s1403_s16 }
  0x27   : > { %s349_s8 = sld [smem:[#allocation7 + %s348_s5]]  ;;  %134 = vst [vmem:[#allocation3 + $0x38] sm:$0xff] %v1300_v0  ;;  %s403_s9 = sadd.s32 9, %s1403_s16 }
  0x28   : > { %135 = vst [vmem:[#allocation3 + $0x40] sm:$0xff] %v1300_v0  ;;  %s1421_s15 = sld [smem:[#allocation7 + %s398_s7]]  ;;  %s408_s18 = sadd.s32 10, %s1403_s16 }
  0x29   : > { %136 = vst [vmem:[#allocation3 + $0x48] sm:$0xff] %v1300_v0  ;;  %s1425_s19 = sld [smem:[#allocation7 + %s403_s9]]  ;;  %s330_s25 = scalar_lea.vmem [#allocation8], %s329_s23 }
  0x2a   : > { %v331_v1 = vld [vmem:[%s330_s25] sm:$0x1]  ;;  %137 = vst [vmem:[#allocation3 + $0x50] sm:$0xff] %v1300_v0  ;;  %s1428_s30 = sld [smem:[#allocation7 + %s408_s18]]  ;;  %s335_s5 = scalar_lea.vmem [#allocation8], %s334_s26 }
  0x2b   : > { %332 = vst [vmem:[#allocation3 + $0x28] sm:$0x1] %v331_v1  ;;  %v336_v2 = vld [vmem:[%s335_s5] sm:$0x1]  ;;  %s413_s13 = sadd.s32 11, %s1403_s16  ;;  %s340_s7 = scalar_lea.vmem [#allocation8], %s339_s4 }
  0x2c   : > { %337 = vst [vmem:[#allocation3 + $0x29] sm:$0x1] %v336_v2  ;;  %v341_v3 = vld [vmem:[%s340_s7] sm:$0x1]  ;;  %s1431_s12 = sld [smem:[#allocation7 + %s413_s13]]  ;;  %s345_s23 = scalar_lea.vmem [#allocation8], %s344_s6 }
  0x2d   : > { %342 = vst [vmem:[#allocation3 + $0x2a] sm:$0x1] %v341_v3  ;;  %v346_v4 = vld [vmem:[%s345_s23] sm:$0x1]  ;;  %s418_s9 = sadd.s32 12, %s1403_s16  ;;  %s350_s18 = scalar_lea.vmem [#allocation8], %s349_s8 }
  0x2e   : > { %347 = vst [vmem:[#allocation3 + $0x2b] sm:$0x1] %v346_v4  ;;  %v351_v5 = vld [vmem:[%s350_s18] sm:$0x1]  ;;  %s419_s26 = sld [smem:[#allocation7 + %s418_s9]]  ;;  %s293_s13 = sadd.s32 1, %s1396_s14 }
  0x2f   : > { %352 = vst [vmem:[#allocation3 + $0x2c] sm:$0x1] %v351_v5  ;;  %s1435_s25 = sld [smem:[#allocation7 + %s1396_s14]]  ;;  %s298_s6 = sadd.s32 2, %s1396_s14 }
  0x30   : > { %138 = vst [vmem:[#allocation3 + $0x58] sm:$0xff] %v1300_v0  ;;  %s1440_s4 = sld [smem:[#allocation7 + %s293_s13]]  ;;  %s400_s8 = scalar_lea.vmem [#allocation8], %s1421_s15 }
  0x31   : > { %139 = vst [vmem:[#allocation3 + $0x60] sm:$0xff] %v1300_v0  ;;  %v401_v6 = vld [vmem:[%s400_s8] sm:$0x1]  ;;  %s1445_s5 = sld [smem:[#allocation7 + %s298_s6]]  ;;  %s405_s7 = scalar_lea.vmem [#allocation8], %s1425_s19 }
  0x32   : > { %140 = vst [vmem:[#allocation3 + $0x68] sm:$0xff] %v1300_v0  ;;  %v406_v7 = vld [vmem:[%s405_s7] sm:$0x1]  ;;  %s303_s23 = sadd.s32 3, %s1396_s14  ;;  %s308_s9 = sadd.s32 4, %s1396_s14 }
  0x33   : > { %141 = vst [vmem:[#allocation3 + $0x70] sm:$0xff] %v1300_v0  ;;  %s410_s18 = scalar_lea.vmem [#allocation8], %s1428_s30  ;;  %s304_s13 = sld [smem:[#allocation7 + %s303_s23]] }
  0x34   : > { %142 = vst [vmem:[#allocation3 + $0x78] sm:$0xff] %v1300_v0  ;;  %v411_v8 = vld [vmem:[%s410_s18] sm:$0x1]  ;;  %s415_s2 = scalar_lea.vmem [#allocation8], %s1431_s12  ;;  %s309_s15 = sld [smem:[#allocation7 + %s308_s9]] }
  0x35   : > { %402 = vst [vmem:[#allocation3 + $0x38] sm:$0x1] %v401_v6  ;;  %v416_v9 = vld [vmem:[%s415_s2] sm:$0x1]  ;;  %s420_s19 = scalar_lea.vmem [#allocation8], %s419_s26  ;;  %s313_s6 = sadd.s32 5, %s1396_s14 }
  0x36   : > { %v754_v10 = vld [vmem:[#allocation3 + $0x28] sm:$0xff]  ;;  %407 = vst [vmem:[#allocation3 + $0x39] sm:$0x1] %v406_v7  ;;  %v421_v11 = vld [vmem:[%s420_s19] sm:$0x1]  ;;  %s290_s8 = scalar_lea.vmem [#allocation8], %s1435_s25 }
  0x37   : > { %769 = vmatpush.xpose.msra.mxu2 %v754_v10  ;;  %412 = vst [vmem:[#allocation3 + $0x3a] sm:$0x1] %v411_v8  ;;  %v291_v12 = vld [vmem:[%s290_s8] sm:$0x1]  ;;  %s314_s30 = sld [smem:[#allocation7 + %s313_s6]]  ;;  %s295_s7 = scalar_lea.vmem [#allocation8], %s1440_s4 }
  0x38   : > { %417 = vst [vmem:[#allocation3 + $0x3b] sm:$0x1] %v416_v9  ;;  %v296_v13 = vld [vmem:[%s295_s7] sm:$0x1]  ;;  %s318_s12 = sadd.s32 6, %s1396_s14  ;;  %s300_s2 = scalar_lea.vmem [#allocation8], %s1445_s5 }
  0x39   : > { %422 = vst [vmem:[#allocation3 + $0x3c] sm:$0x1] %v421_v11  ;;  %v301_v14 = vld [vmem:[%s300_s2] sm:$0x1]  ;;  %s319_s23 = sld [smem:[#allocation7 + %s318_s12]]  ;;  %s323_s26 = sadd.s32 7, %s1396_s14 }
  0x3a   : > { %292 = vst [vmem:[#allocation3 + $0x20] sm:$0x1] %v291_v12  ;;  %s324_s9 = sld [smem:[#allocation7 + %s323_s26]]  ;;  %s305_s18 = scalar_lea.vmem [#allocation8], %s304_s13 }
  0x3b   : > { %297 = vst [vmem:[#allocation3 + $0x21] sm:$0x1] %v296_v13  ;;  %v306_v15 = vld [vmem:[%s305_s18] sm:$0x1]  ;;  %s359_s25 = sld [smem:[#allocation7 + %s1403_s16]]  ;;  %s310_s19 = scalar_lea.vmem [#allocation8], %s309_s15 }
  0x3c   : > { %302 = vst [vmem:[#allocation3 + $0x22] sm:$0x1] %v301_v14  ;;  %v311_v16 = vld [vmem:[%s310_s19] sm:$0x1]  ;;  %s363_s4 = sadd.s32 1, %s1403_s16  ;;  %s368_s6 = sadd.s32 2, %s1403_s16 }
  0x3d   : > { %307 = vst [vmem:[#allocation3 + $0x23] sm:$0x1] %v306_v15  ;;  %s364_s8 = sld [smem:[#allocation7 + %s363_s4]]  ;;  %s315_s5 = scalar_lea.vmem [#allocation8], %s314_s30 }
  0x3e   : > { %312 = vst [vmem:[#allocation3 + $0x24] sm:$0x1] %v311_v16  ;;  %v316_v17 = vld [vmem:[%s315_s5] sm:$0x1]  ;;  %s369_s7 = sld [smem:[#allocation7 + %s368_s6]]  ;;  %s373_s14 = sadd.s32 3, %s1403_s16 }
  0x3f   : > { %317 = vst [vmem:[#allocation3 + $0x25] sm:$0x1] %v316_v17  ;;  %s374_s12 = sld [smem:[#allocation7 + %s373_s14]]  ;;  %s320_s13 = scalar_lea.vmem [#allocation8], %s319_s23 }
  0x40   : > { %v778_v18 = vld [vmem:[#allocation3 + $0x38] sm:$0xff]  ;;  %s378_s2 = sadd.s32 4, %s1403_s16  ;;  %s325_s15 = scalar_lea.vmem [#allocation8], %s324_s9 }
  0x41   : > { %v321_v19 = vld [vmem:[%s320_s13] sm:$0x1]  ;;  %793 = vmatpush.xpose.msra.mxu3 %v778_v18  ;;  %s379_s26 = sld [smem:[#allocation7 + %s378_s2]]  ;;  %s360_s18 = scalar_lea.vmem [#allocation8], %s359_s25 }
  0x42   : > { %322 = vst [vmem:[#allocation3 + $0x26] sm:$0x1] %v321_v19  ;;  %v326_v20 = vld [vmem:[%s325_s15] sm:$0x1]  ;;  %s383_s30 = sadd.s32 5, %s1403_s16  ;;  %s388_s19 = sadd.s32 6, %s1403_s16 }
  0x43   : > { %327 = vst [vmem:[#allocation3 + $0x27] sm:$0x1] %v326_v20  ;;  %v361_v21 = vld [vmem:[%s360_s18] sm:$0x1]  ;;  %s384_s4 = sld [smem:[#allocation7 + %s383_s30]]  ;;  %s365_s6 = scalar_lea.vmem [#allocation8], %s364_s8 }
  0x44   : > { %362 = vst [vmem:[#allocation3 + $0x30] sm:$0x1] %v361_v21  ;;  %v366_v22 = vld [vmem:[%s365_s6] sm:$0x1]  ;;  %s389_s23 = sld [smem:[#allocation7 + %s388_s19]]  ;;  %s370_s5 = scalar_lea.vmem [#allocation8], %s369_s7 }
  0x45   : > { %367 = vst [vmem:[#allocation3 + $0x31] sm:$0x1] %v366_v22  ;;  %v371_v23 = vld [vmem:[%s370_s5] sm:$0x1]  ;;  %s393_s9 = sadd.s32 7, %s1403_s16  ;;  %s375_s14 = scalar_lea.vmem [#allocation8], %s374_s12 }
  0x46   : > { %372 = vst [vmem:[#allocation3 + $0x32] sm:$0x1] %v371_v23  ;;  %v376_v24 = vld [vmem:[%s375_s14] sm:$0x1]  ;;  %s394_s13 = sld [smem:[#allocation7 + %s393_s9]]  ;;  %s190_s25 = scalar_lea.vmem [#allocation8], %s1405_s17 }
  0x47   : > { %377 = vst [vmem:[#allocation3 + $0x33] sm:$0x1] %v376_v24  ;;  %v191_v25 = vld [vmem:[%s190_s25] sm:$0x1]  ;;  %s193_s2 = sadd.s32 9, %s1389_s11  ;;  %s380_s15 = scalar_lea.vmem [#allocation8], %s379_s26 }
  0x48   : > { %v381_v26 = vld [vmem:[%s380_s15] sm:$0x1]  ;;  %192 = vst [vmem:[#allocation3 + $0x8] sm:$0x1] %v191_v25  ;;  %s194_s8 = sld [smem:[#allocation7 + %s193_s2]]  ;;  %s198_s18 = sadd.s32 10, %s1389_s11 }
  0x49   : > { %382 = vst [vmem:[#allocation3 + $0x34] sm:$0x1] %v381_v26  ;;  %s199_s16 = sld [smem:[#allocation7 + %s198_s18]]  ;;  %s385_s7 = scalar_lea.vmem [#allocation8], %s384_s4 }
  0x4a   : > { %v753_v27 = vld [vmem:[#allocation3 + $0x20] sm:$0xff]  ;;  %v386_v28 = vld [vmem:[%s385_s7] sm:$0x1]  ;;  %s203_s12 = sadd.s32 11, %s1389_s11  ;;  %s390_s17 = scalar_lea.vmem [#allocation8], %s389_s23 }
  0x4b   : > { %770 = vmatpush.xpose.msra.mxu2 %v753_v27  ;;  %387 = vst [vmem:[#allocation3 + $0x35] sm:$0x1] %v386_v28  ;;  %v391_v29 = vld [vmem:[%s390_s17] sm:$0x1]  ;;  %s204_s26 = sld [smem:[#allocation7 + %s203_s12]]  ;;  %s208_s30 = sadd.s32 12, %s1389_s11 }
  0x4c   : > { %392 = vst [vmem:[#allocation3 + $0x36] sm:$0x1] %v391_v29  ;;  %s209_s19 = sld [smem:[#allocation7 + %s208_s30]]  ;;  %s395_s6 = scalar_lea.vmem [#allocation8], %s394_s13 }
  0x4d   : > { %v396_v30 = vld [vmem:[%s395_s6] sm:$0x1]  ;;  %s1655_s5 = sadd.s32 1, %s1386_s10  ;;  %s1661_s9 = sadd.s32 2, %s1386_s10 }
  0x4e   : > { %s1476_s14 = sld [smem:[#allocation6 + %s1661_s9]]  ;;  %397 = vst [vmem:[#allocation3 + $0x37] sm:$0x1] %v396_v30  ;;  %s1480_s25 = smul.u32 13, %s1655_s5 }
  0x4f   : > { %s195_s4 = scalar_lea.vmem [#allocation8], %s194_s8  ;;  %s1662_s23 = sadd.s32 3, %s1386_s10 }
  0x50   : > { %v196_v31 = vld [vmem:[%s195_s4] sm:$0x1]  ;;  %s354_s2 = sld [smem:[#allocation6 + %s1662_s23]]  ;;  %s200_s15 = scalar_lea.vmem [#allocation8], %s199_s16 }
  0x51   : > { %197 = vst [vmem:[#allocation3 + $0x9] sm:$0x1] %v196_v31  ;;  %v201_v32 = vld [vmem:[%s200_s15] sm:$0x1]  ;;  %s258_s13 = sadd.s32 8, %s1480_s25  ;;  %s263_s18 = sadd.s32 9, %s1480_s25 }
  0x52   : > { %202 = vst [vmem:[#allocation3 + $0xa] sm:$0x1] %v201_v32  ;;  %s259_s7 = sld [smem:[#allocation7 + %s258_s13]]  ;;  %s205_s12 = scalar_lea.vmem [#allocation8], %s204_s26 }
  0x53   : > { %v206_v33 = vld [vmem:[%s205_s12] sm:$0x1]  ;;  %s264_s17 = sld [smem:[#allocation7 + %s263_s18]]  ;;  %s210_s30 = scalar_lea.vmem [#allocation8], %s209_s19 }
  0x54   : > { %207 = vst [vmem:[#allocation3 + $0xb] sm:$0x1] %v206_v33  ;;  %v211_v34 = vld [vmem:[%s210_s30] sm:$0x1]  ;;  %s268_s8 = sadd.s32 10, %s1480_s25  ;;  %s273_s6 = sadd.s32 11, %s1480_s25 }
  0x55   : > { %212 = vst [vmem:[#allocation3 + $0xc] sm:$0x1] %v211_v34  ;;  %s269_s9 = sld [smem:[#allocation7 + %s268_s8]]  ;;  %s278_s16 = sadd.s32 12, %s1480_s25  ;;  %v777_v35 = vld [vmem:[#allocation3 + $0x30] sm:$0xff] }
  0x56   : > { %s274_s4 = sld [smem:[#allocation7 + %s273_s6]]  ;;  %794 = vmatpush.xpose.msra.mxu3 %v777_v35  ;;  %s285_s26 = scalar_lea.vmem [#allocation8], %s1476_s14 }
  0x57   : > { %s1489_s23 = sld [smem:[#allocation7 + %s278_s16]]  ;;  %v286_v36 = vld [vmem:[%s285_s26] sm:$0x1]  ;;  %s355_s15 = scalar_lea.vmem [#allocation8], %s354_s2 }
  0x58   : > { %287 = vst [vmem:[#allocation2 + $0x2] sm:$0x1] %v286_v36  ;;  %v356_v37 = vld [vmem:[%s355_s15] sm:$0x1]  ;;  %s1653_s19 = sadd.s32 6, %s1386_s10  ;;  %s260_s13 = scalar_lea.vmem [#allocation8], %s259_s7 }
  0x59   : > { %v261_v38 = vld [vmem:[%s260_s13] sm:$0x1]  ;;  %357 = vst [vmem:[#allocation2 + $0x3] sm:$0x1] %v356_v37  ;;  %s1495_s18 = smul.u32 13, %s1653_s19  ;;  %s265_s12 = scalar_lea.vmem [#allocation8], %s264_s17 }
  0x5a   : > { %262 = vst [vmem:[#allocation3 + $0x18] sm:$0x1] %v261_v38  ;;  %v266_v39 = vld [vmem:[%s265_s12] sm:$0x1]  ;;  %s1654_s30 = sadd.s32 7, %s1386_s10  ;;  %s1499_s8 = sld [smem:[#allocation7 + %s1389_s11]] }
  0x5b   : > { %267 = vst [vmem:[#allocation3 + $0x19] sm:$0x1] %v266_v39  ;;  %s608_s14 = sadd.s32 8, %s1495_s18  ;;  %s270_s2 = scalar_lea.vmem [#allocation8], %s269_s9 }
  0x5c   : > { %v705_v40 = vld [vmem:[#allocation3 + $0x8] sm:$0xff]  ;;  %v271_v41 = vld [vmem:[%s270_s2] sm:$0x1]  ;;  %s609_s7 = sld [smem:[#allocation7 + %s608_s14]]  ;;  %s275_s6 = scalar_lea.vmem [#allocation8], %s274_s4 }
  0x5d   : > { %720 = vmatpush.xpose.msra.mxu0 %v705_v40  ;;  %272 = vst [vmem:[#allocation3 + $0x1a] sm:$0x1] %v271_v41  ;;  %v276_v42 = vld [vmem:[%s275_s6] sm:$0x1]  ;;  %s613_s16 = sadd.s32 9, %s1495_s18  ;;  %s280_s17 = scalar_lea.vmem [#allocation8], %s1489_s23 }
  0x5e   : > { %277 = vst [vmem:[#allocation3 + $0x1b] sm:$0x1] %v276_v42  ;;  %v281_v43 = vld [vmem:[%s280_s17] sm:$0x1]  ;;  %s614_s26 = sld [smem:[#allocation7 + %s613_s16]]  ;;  %s618_s15 = sadd.s32 10, %s1495_s18 }
  0x5f   : > { %282 = vst [vmem:[#allocation3 + $0x1c] sm:$0x1] %v281_v43  ;;  %v752_v44 = vld [vmem:[#allocation2 + $0x2] sm:$0x1]  ;;  %s619_s13 = sld [smem:[#allocation7 + %s618_s15]]  ;;  %s623_s9 = sadd.s32 11, %s1495_s18 }
  0x60   : > { %771 = vmatmul.f32.vlgmr.msra.gmra.mxu2 %v752_v44  ;;  %v776_v45 = vld [vmem:[#allocation2 + $0x3] sm:$0x1]  ;;  %s624_s12 = sld [smem:[#allocation7 + %s623_s9]]  ;;  %s628_s14 = sadd.s32 12, %s1495_s18 }
  0x61   : > { %795 = vmatmul.f32.vlgmr.msra.gmra.mxu3 %v776_v45  ;;  %s629_s2 = sld [smem:[#allocation7 + %s628_s14]]  ;;  %s1509_s4 = smul.u32 13, %s1654_s30 }
  0x62   : > { %s610_s23 = scalar_lea.vmem [#allocation8], %s609_s7  ;;  %s150_s17 = scalar_lea.vmem [#allocation8], %s1499_s8 }
  0x63   : > { %v611_v46 = vld [vmem:[%s610_s23] sm:$0x1]  ;;  %s678_s6 = sadd.s32 8, %s1509_s4  ;;  %s683_s16 = sadd.s32 9, %s1509_s4 }
  0x64   : > { %v151_v47 = vld [vmem:[%s150_s17] sm:$0x1]  ;;  %612 = vst [vmem:[#allocation3 + $0x68] sm:$0x1] %v611_v46  ;;  %s679_s15 = sld [smem:[#allocation7 + %s678_s6]]  ;;  %s615_s19 = scalar_lea.vmem [#allocation8], %s614_s26 }
  0x65   : > { %v616_v48 = vld [vmem:[%s615_s19] sm:$0x1]  ;;  %s684_s9 = sld [smem:[#allocation7 + %s683_s16]]  ;;  %152 = vst [vmem:[#allocation3] sm:$0x1] %v151_v47  ;;  %s620_s14 = scalar_lea.vmem [#allocation8], %s619_s13 }
  0x66   : > { %v730_v49 = vld [vmem:[#allocation3 + $0x18] sm:$0xff]  ;;  %617 = vst [vmem:[#allocation3 + $0x69] sm:$0x1] %v616_v48  ;;  %s625_s7 = scalar_lea.vmem [#allocation8], %s624_s12  ;;  %s688_s8 = sadd.s32 10, %s1509_s4 }
  0x67   : > { %v621_v50 = vld [vmem:[%s620_s14] sm:$0x1]  ;;  %745 = vmatpush.xpose.msra.mxu1 %v730_v49  ;;  %s630_s23 = scalar_lea.vmem [#allocation8], %s629_s2  ;;  %s689_s26 = sld [smem:[#allocation7 + %s688_s8]] }
  0x68   : > { %622 = vst [vmem:[#allocation3 + $0x6a] sm:$0x1] %v621_v50  ;;  %v626_v51 = vld [vmem:[%s625_s7] sm:$0x1]  ;;  %s693_s19 = sadd.s32 11, %s1509_s4  ;;  %s698_s16 = sadd.s32 12, %s1509_s4 }
  0x69   : > { %627 = vst [vmem:[#allocation3 + $0x6b] sm:$0x1] %v626_v51  ;;  %v631_v52 = vld [vmem:[%s630_s23] sm:$0x1]  ;;  %s694_s6 = sld [smem:[#allocation7 + %s693_s19]]  ;;  %s153_s14 = sadd.s32 1, %s1389_s11 }
  0x6a   : > { %632 = vst [vmem:[#allocation3 + $0x6c] sm:$0x1] %v631_v52  ;;  %s699_s17 = sld [smem:[#allocation7 + %s698_s16]]  ;;  %s680_s13 = scalar_lea.vmem [#allocation8], %s679_s15 }
  0x6b   : > { %v681_v53 = vld [vmem:[%s680_s13] sm:$0x1]  ;;  %s685_s30 = scalar_lea.vmem [#allocation8], %s684_s9  ;;  %s154_s12 = sld [smem:[#allocation7 + %s153_s14]] }
  0x6c   : > { %682 = vst [vmem:[#allocation3 + $0x78] sm:$0x1] %v681_v53  ;;  %v686_v54 = vld [vmem:[%s685_s30] sm:$0x1]  ;;  %s158_s7 = sadd.s32 2, %s1389_s11  ;;  %s163_s23 = sadd.s32 3, %s1389_s11 }
  0x6d   : > { %687 = vst [vmem:[#allocation3 + $0x79] sm:$0x1] %v686_v54  ;;  %s159_s2 = sld [smem:[#allocation7 + %s158_s7]]  ;;  %s690_s5 = scalar_lea.vmem [#allocation8], %s689_s26 }
  0x6e   : > { %s164_s8 = sld [smem:[#allocation7 + %s163_s23]]  ;;  %v691_v55 = vld [vmem:[%s690_s5] sm:$0x1]  ;;  %s168_s19 = sadd.s32 4, %s1389_s11 }
  0x6f   : > { %692 = vst [vmem:[#allocation3 + $0x7a] sm:$0x1] %v691_v55  ;;  %s695_s16 = scalar_lea.vmem [#allocation8], %s694_s6  ;;  %s169_s30 = sld [smem:[#allocation7 + %s168_s19]] }
  0x70   : > { %v696_v57 = vld [vmem:[%s695_s16] sm:$0x1]  ;;  %s700_s15 = scalar_lea.vmem [#allocation8], %s699_s17  ;;  %s173_s9 = sadd.s32 5, %s1389_s11 }
  0x71   : > { %v850_v56 = vld [vmem:[#allocation3 + $0x68] sm:$0xff]  ;;  %697 = vst [vmem:[#allocation3 + $0x7b] sm:$0x1] %v696_v57  ;;  %v701_v58 = vld [vmem:[%s700_s15] sm:$0x1]  ;;  %s174_s13 = sld [smem:[#allocation7 + %s173_s9]] }
  0x72   : > { %865 = vmatpush.xpose.msrb.mxu2 %v850_v56  ;;  %702 = vst [vmem:[#allocation3 + $0x7c] sm:$0x1] %v701_v58  ;;  %s155_s14 = scalar_lea.vmem [#allocation8], %s154_s12  ;;  %s178_s5 = sadd.s32 6, %s1389_s11 }
  0x73   : > { %v156_v59 = vld [vmem:[%s155_s14] sm:$0x1]  ;;  %s160_s26 = scalar_lea.vmem [#allocation8], %s159_s2  ;;  %s179_s6 = sld [smem:[#allocation7 + %s178_s5]] }
  0x74   : > { %157 = vst [vmem:[#allocation3 + $0x1] sm:$0x1] %v156_v59  ;;  %v161_v60 = vld [vmem:[%s160_s26] sm:$0x1]  ;;  %s165_s7 = scalar_lea.vmem [#allocation8], %s164_s8  ;;  %s183_s17 = sadd.s32 7, %s1389_s11 }
  0x75   : > { %162 = vst [vmem:[#allocation3 + $0x2] sm:$0x1] %v161_v60  ;;  %v166_v61 = vld [vmem:[%s165_s7] sm:$0x1]  ;;  %s219_s23 = sld [smem:[#allocation7 + %s1480_s25]]  ;;  %s223_s16 = sadd.s32 1, %s1480_s25 }
  0x76   : > { %167 = vst [vmem:[#allocation3 + $0x3] sm:$0x1] %v166_v61  ;;  %s184_s19 = sld [smem:[#allocation7 + %s183_s17]]  ;;  %s170_s27 = scalar_lea.vmem [#allocation8], %s169_s30 }
  0x77   : > { %s224_s15 = sld [smem:[#allocation7 + %s223_s16]]  ;;  %v171_v62 = vld [vmem:[%s170_s27] sm:$0x1]  ;;  %s228_s12 = sadd.s32 2, %s1480_s25 }
  0x78   : > { %172 = vst [vmem:[#allocation3 + $0x4] sm:$0x1] %v171_v62  ;;  %s175_s9 = scalar_lea.vmem [#allocation8], %s174_s13  ;;  %s229_s2 = sld [smem:[#allocation7 + %s228_s12]] }
  0x79   : > { %v874_v63 = vld [vmem:[#allocation3 + $0x78] sm:$0xff]  ;;  %s233_s8 = sadd.s32 3, %s1480_s25  ;;  %s180_s11 = scalar_lea.vmem [#allocation8], %s179_s6 }
  0x7a   : > { %v176_v0 = vld [vmem:[%s175_s9] sm:$0x1]  ;;  %889 = vmatpush.xpose.msrb.mxu3 %v874_v63  ;;  %s234_s14 = sld [smem:[#allocation7 + %s233_s8]]  ;;  %s238_s27 = sadd.s32 4, %s1480_s25 }
  0x7b   : > { %177 = vst [vmem:[#allocation3 + $0x5] sm:$0x1] %v176_v0  ;;  %v181_v1 = vld [vmem:[%s180_s11] sm:$0x1]  ;;  %s220_s5 = scalar_lea.vmem [#allocation8], %s219_s23  ;;  %s239_s26 = sld [smem:[#allocation7 + %s238_s27]] }
  0x7c   : > { %182 = vst [vmem:[#allocation3 + $0x6] sm:$0x1] %v181_v1  ;;  %v221_v2 = vld [vmem:[%s220_s5] sm:$0x1]  ;;  %s185_s30 = scalar_lea.vmem [#allocation8], %s184_s19  ;;  %s243_s7 = sadd.s32 5, %s1480_s25 }
  0x7d   : > { %v186_v3 = vld [vmem:[%s185_s30] sm:$0x1]  ;;  %222 = vst [vmem:[#allocation3 + $0x10] sm:$0x1] %v221_v2  ;;  %s225_s13 = scalar_lea.vmem [#allocation8], %s224_s15  ;;  %s248_s17 = sadd.s32 6, %s1480_s25 }
  0x7e   : > { %187 = vst [vmem:[#allocation3 + $0x7] sm:$0x1] %v186_v3  ;;  %v226_v4 = vld [vmem:[%s225_s13] sm:$0x1]  ;;  %s244_s6 = sld [smem:[#allocation7 + %s243_s7]]  ;;  %s230_s16 = scalar_lea.vmem [#allocation8], %s229_s2 }
  0x7f   : > { %227 = vst [vmem:[#allocation3 + $0x11] sm:$0x1] %v226_v4  ;;  %v231_v5 = vld [vmem:[%s230_s16] sm:$0x1]  ;;  %s249_s23 = sld [smem:[#allocation7 + %s248_s17]]  ;;  %s253_s12 = sadd.s32 7, %s1480_s25 }
  0x80   : > { %232 = vst [vmem:[#allocation3 + $0x12] sm:$0x1] %v231_v5  ;;  %s254_s19 = sld [smem:[#allocation7 + %s253_s12]]  ;;  %s235_s9 = scalar_lea.vmem [#allocation8], %s234_s14 }
  0x81   : > { %v236_v6 = vld [vmem:[%s235_s9] sm:$0x1]  ;;  %s569_s8 = sld [smem:[#allocation7 + %s1495_s18]]  ;;  %s573_s11 = sadd.s32 1, %s1495_s18 }
  0x82   : > { %237 = vst [vmem:[#allocation3 + $0x13] sm:$0x1] %v236_v6  ;;  %s574_s15 = sld [smem:[#allocation7 + %s573_s11]]  ;;  %s240_s5 = scalar_lea.vmem [#allocation8], %s239_s26 }
  0x83   : > { %v241_v7 = vld [vmem:[%s240_s5] sm:$0x1]  ;;  %s578_s27 = sadd.s32 2, %s1495_s18  ;;  %s583_s30 = sadd.s32 3, %s1495_s18 }
  0x84   : > { %242 = vst [vmem:[#allocation3 + $0x14] sm:$0x1] %v241_v7  ;;  %s579_s13 = sld [smem:[#allocation7 + %s578_s27]]  ;;  %s245_s2 = scalar_lea.vmem [#allocation8], %s244_s6 }
  0x85   : > { %v704_v8 = vld [vmem:[#allocation3] sm:$0xff]  ;;  %v246_v9 = vld [vmem:[%s245_s2] sm:$0x1]  ;;  %s584_s25 = sld [smem:[#allocation7 + %s583_s30]]  ;;  %s250_s14 = scalar_lea.vmem [#allocation8], %s249_s23 }
  0x86   : > { %721 = vmatpush.xpose.msra.mxu0 %v704_v8  ;;  %247 = vst [vmem:[#allocation3 + $0x15] sm:$0x1] %v246_v9  ;;  %v251_v10 = vld [vmem:[%s250_s14] sm:$0x1]  ;;  %s588_s7 = sadd.s32 4, %s1495_s18  ;;  %s255_s17 = scalar_lea.vmem [#allocation8], %s254_s19 }
  0x87   : > { %252 = vst [vmem:[#allocation3 + $0x16] sm:$0x1] %v251_v10  ;;  %v256_v11 = vld [vmem:[%s255_s17] sm:$0x1]  ;;  %s589_s26 = sld [smem:[#allocation7 + %s588_s7]]  ;;  %s570_s16 = scalar_lea.vmem [#allocation8], %s569_s8 }
  0x88   : > { %257 = vst [vmem:[#allocation3 + $0x17] sm:$0x1] %v256_v11  ;;  %v571_v12 = vld [vmem:[%s570_s16] sm:$0x1]  ;;  %s593_s12 = sadd.s32 5, %s1495_s18  ;;  %s575_s6 = scalar_lea.vmem [#allocation8], %s574_s15 }
  0x89   : > { %572 = vst [vmem:[#allocation3 + $0x60] sm:$0x1] %v571_v12  ;;  %v576_v13 = vld [vmem:[%s575_s6] sm:$0x1]  ;;  %s594_s9 = sld [smem:[#allocation7 + %s593_s12]]  ;;  %s598_s11 = sadd.s32 6, %s1495_s18 }
  0x8a   : > { %577 = vst [vmem:[#allocation3 + $0x61] sm:$0x1] %v576_v13  ;;  %s599_s23 = sld [smem:[#allocation7 + %s598_s11]]  ;;  %s580_s5 = scalar_lea.vmem [#allocation8], %s579_s13 }
  0x8b   : > { %v581_v14 = vld [vmem:[%s580_s5] sm:$0x1]  ;;  %s603_s19 = sadd.s32 7, %s1495_s18  ;;  %s585_s27 = scalar_lea.vmem [#allocation8], %s584_s25 }
  0x8c   : > { %582 = vst [vmem:[#allocation3 + $0x62] sm:$0x1] %v581_v14  ;;  %v586_v15 = vld [vmem:[%s585_s27] sm:$0x1]  ;;  %s604_s8 = sld [smem:[#allocation7 + %s603_s19]]  ;;  %s643_s30 = sadd.s32 1, %s1509_s4 }
  0x8d   : > { %587 = vst [vmem:[#allocation3 + $0x63] sm:$0x1] %v586_v15  ;;  %s639_s2 = sld [smem:[#allocation7 + %s1509_s4]]  ;;  %s590_s14 = scalar_lea.vmem [#allocation8], %s589_s26 }
  0x8e   : > { %v591_v16 = vld [vmem:[%s590_s14] sm:$0x1]  ;;  %s644_s15 = sld [smem:[#allocation7 + %s643_s30]]  ;;  %s648_s7 = sadd.s32 2, %s1509_s4 }
  0x8f   : > { %v729_v17 = vld [vmem:[#allocation3 + $0x10] sm:$0xff]  ;;  %592 = vst [vmem:[#allocation3 + $0x64] sm:$0x1] %v591_v16  ;;  %s649_s17 = sld [smem:[#allocation7 + %s648_s7]]  ;;  %s595_s13 = scalar_lea.vmem [#allocation8], %s594_s9 }
  0x90   : > { %746 = vmatpush.xpose.msra.mxu1 %v729_v17  ;;  %v596_v18 = vld [vmem:[%s595_s13] sm:$0x1]  ;;  %s653_s18 = sadd.s32 3, %s1509_s4  ;;  %s600_s25 = scalar_lea.vmem [#allocation8], %s599_s23 }
  0x91   : > { %597 = vst [vmem:[#allocation3 + $0x65] sm:$0x1] %v596_v18  ;;  %v601_v19 = vld [vmem:[%s600_s25] sm:$0x1]  ;;  %s654_s16 = sld [smem:[#allocation7 + %s653_s18]]  ;;  %s658_s12 = sadd.s32 4, %s1509_s4 }
  0x92   : > { %602 = vst [vmem:[#allocation3 + $0x66] sm:$0x1] %v601_v19  ;;  %s659_s6 = sld [smem:[#allocation7 + %s658_s12]]  ;;  %s605_s26 = scalar_lea.vmem [#allocation8], %s604_s8 }
  0x93   : > { %v606_v20 = vld [vmem:[%s605_s26] sm:$0x1]  ;;  %s663_s11 = sadd.s32 5, %s1509_s4  ;;  %s640_s5 = scalar_lea.vmem [#allocation8], %s639_s2 }
  0x94   : > { %607 = vst [vmem:[#allocation3 + $0x67] sm:$0x1] %v606_v20  ;;  %v641_v21 = vld [vmem:[%s640_s5] sm:$0x1]  ;;  %s664_s19 = sld [smem:[#allocation7 + %s663_s11]]  ;;  %s645_s9 = scalar_lea.vmem [#allocation8], %s644_s15 }
  0x95   : > { %642 = vst [vmem:[#allocation3 + $0x70] sm:$0x1] %v641_v21  ;;  %v646_v22 = vld [vmem:[%s645_s9] sm:$0x1]  ;;  %s668_s23 = sadd.s32 6, %s1509_s4  ;;  %s650_s27 = scalar_lea.vmem [#allocation8], %s649_s17 }
  0x96   : > { %647 = vst [vmem:[#allocation3 + $0x71] sm:$0x1] %v646_v22  ;;  %v651_v23 = vld [vmem:[%s650_s27] sm:$0x1]  ;;  %s669_s30 = sld [smem:[#allocation7 + %s668_s23]]  ;;  %s673_s14 = sadd.s32 7, %s1509_s4 }
  0x97   : > { %652 = vst [vmem:[#allocation3 + $0x72] sm:$0x1] %v651_v23  ;;  %s674_s8 = sld [smem:[#allocation7 + %s673_s14]]  ;;  %s655_s2 = scalar_lea.vmem [#allocation8], %s654_s16 }
  0x98   : > { %v656_v24 = vld [vmem:[%s655_s2] sm:$0x1]  ;;  %s144_s7 = sld [smem:[#allocation6 + %s1386_s10]]  ;;  %s660_s13 = scalar_lea.vmem [#allocation8], %s659_s6 }
  0x99   : > { %657 = vst [vmem:[#allocation3 + $0x73] sm:$0x1] %v656_v24  ;;  %v661_v25 = vld [vmem:[%s660_s13] sm:$0x1]  ;;  %s1663_s15 = sadd.s32 1, %s1386_s10  ;;  %s423_s25 = sadd.s32 4, %s1386_s10 }
  0x9a   : > { %s214_s18 = sld [smem:[#allocation6 + %s1663_s15]]  ;;  %662 = vst [vmem:[#allocation3 + $0x74] sm:$0x1] %v661_v25  ;;  %s1554_s12 = smul.u32 13, %s423_s25 }
  0x9b   : > { %v849_v26 = vld [vmem:[#allocation3 + $0x60] sm:$0xff]  ;;  %s665_s4 = scalar_lea.vmem [#allocation8], %s664_s19  ;;  %s493_s17 = sadd.s32 5, %s1386_s10 }
  0x9c   : > { %v666_v27 = vld [vmem:[%s665_s4] sm:$0x1]  ;;  %s1664_s26 = sadd.s32 6, %s1386_s10  ;;  %866 = vmatpush.xpose.msrb.mxu2 %v849_v26  ;;  %s468_s6 = sadd.s32 8, %s1554_s12 }
  0x9d   : > { %s1559_s16 = sld [smem:[#allocation6 + %s1664_s26]]  ;;  %667 = vst [vmem:[#allocation3 + $0x75] sm:$0x1] %v666_v27  ;;  %s670_s11 = scalar_lea.vmem [#allocation8], %s669_s30 }
  0x9e   : > { %v671_v28 = vld [vmem:[%s670_s11] sm:$0x1]  ;;  %s469_s5 = sld [smem:[#allocation7 + %s468_s6]]  ;;  %s675_s9 = scalar_lea.vmem [#allocation8], %s674_s8 }
  0x9f   : > { %672 = vst [vmem:[#allocation3 + $0x76] sm:$0x1] %v671_v28  ;;  %v676_v29 = vld [vmem:[%s675_s9] sm:$0x1]  ;;  %s473_s23 = sadd.s32 9, %s1554_s12  ;;  %s145_s19 = scalar_lea.vmem [#allocation8], %s144_s7 }
  0xa0   : > { %677 = vst [vmem:[#allocation3 + $0x77] sm:$0x1] %v676_v29  ;;  %v146_v30 = vld [vmem:[%s145_s19] sm:$0x1]  ;;  %s474_s27 = sld [smem:[#allocation7 + %s473_s23]]  ;;  %s215_s14 = scalar_lea.vmem [#allocation8], %s214_s18 }
  0xa1   : > { %147 = vst [vmem:[#allocation2] sm:$0x1] %v146_v30  ;;  %v216_v31 = vld [vmem:[%s215_s14] sm:$0x1]  ;;  %s478_s2 = sadd.s32 10, %s1554_s12  ;;  %s483_s13 = sadd.s32 11, %s1554_s12 }
  0xa2   : > { %217 = vst [vmem:[#allocation2 + $0x1] sm:$0x1] %v216_v31  ;;  %s479_s15 = sld [smem:[#allocation7 + %s478_s2]]  ;;  %s488_s30 = sadd.s32 12, %s1554_s12 }
  0xa3   : > { %s484_s4 = sld [smem:[#allocation7 + %s483_s13]]  ;;  %s1568_s26 = smul.u32 13, %s493_s17 }
  0xa4   : > { %s489_s8 = sld [smem:[#allocation7 + %s488_s30]]  ;;  %s470_s6 = scalar_lea.vmem [#allocation8], %s469_s5 }
  0xa5   : > { %v471_v32 = vld [vmem:[%s470_s6] sm:$0x1]  ;;  %s538_s7 = sadd.s32 8, %s1568_s26  ;;  %s543_s11 = sadd.s32 9, %s1568_s26 }
  0xa6   : > { %472 = vst [vmem:[#allocation3 + $0x48] sm:$0x1] %v471_v32  ;;  %s1572_s18 = sld [smem:[#allocation7 + %s538_s7]]  ;;  %s475_s9 = scalar_lea.vmem [#allocation8], %s474_s27 }
  0xa7   : > { %v873_v33 = vld [vmem:[#allocation3 + $0x70] sm:$0xff]  ;;  %v476_v34 = vld [vmem:[%s475_s9] sm:$0x1]  ;;  %s1574_s23 = sld [smem:[#allocation7 + %s543_s11]]  ;;  %s548_s19 = sadd.s32 10, %s1568_s26 }
  0xa8   : > { %890 = vmatpush.xpose.msrb.mxu3 %v873_v33  ;;  %v703_v35 = vld [vmem:[#allocation2] sm:$0x1]  ;;  %477 = vst [vmem:[#allocation3 + $0x49] sm:$0x1] %v476_v34  ;;  %s1577_s14 = sld [smem:[#allocation7 + %s548_s19]]  ;;  %s480_s5 = scalar_lea.vmem [#allocation8], %s479_s15 }
  0xa9   : > { %722 = vmatmul.f32.vlgmr.msra.gmra.mxu0 %v703_v35  ;;  %v728_v36 = vld [vmem:[#allocation2 + $0x1] sm:$0x1]  ;;  %v481_v37 = vld [vmem:[%s480_s5] sm:$0x1]  ;;  %s553_s2 = sadd.s32 11, %s1568_s26  ;;  %s485_s27 = scalar_lea.vmem [#allocation8], %s484_s4 }
  0xaa   : > { %747 = vmatmul.f32.vlgmr.msra.gmra.mxu1 %v728_v36  ;;  %482 = vst [vmem:[#allocation3 + $0x4a] sm:$0x1] %v481_v37  ;;  %v486_v38 = vld [vmem:[%s485_s27] sm:$0x1]  ;;  %s554_s13 = sld [smem:[#allocation7 + %s553_s2]]  ;;  %s490_s30 = scalar_lea.vmem [#allocation8], %s489_s8 }
  0xab   : > { %487 = vst [vmem:[#allocation3 + $0x4b] sm:$0x1] %v486_v38  ;;  %v491_v39 = vld [vmem:[%s490_s30] sm:$0x1]  ;;  %s558_s6 = sadd.s32 12, %s1568_s26  ;;  %s565_s7 = scalar_lea.vmem [#allocation8], %s1559_s16 }
  0xac   : > { %492 = vst [vmem:[#allocation3 + $0x4c] sm:$0x1] %v491_v39  ;;  %s559_s15 = sld [smem:[#allocation7 + %s558_s6]]  ;;  %v566_v40 = vld [vmem:[%s565_s7] sm:$0x1]  ;;  %s540_s11 = scalar_lea.vmem [#allocation8], %s1572_s18 }
  0xad   : > { %v541_v41 = vld [vmem:[%s540_s11] sm:$0x1]  ;;  %567 = vst [vmem:[#allocation2 + $0x6] sm:$0x1] %v566_v40  ;;  %s1665_s9 = sadd.s32 7, %s1386_s10  ;;  %s545_s19 = scalar_lea.vmem [#allocation8], %s1574_s23 }
  0xae   : > { %s634_s4 = sld [smem:[#allocation6 + %s1665_s9]]  ;;  %542 = vst [vmem:[#allocation3 + $0x58] sm:$0x1] %v541_v41  ;;  %v546_v42 = vld [vmem:[%s545_s19] sm:$0x1]  ;;  %s550_s8 = scalar_lea.vmem [#allocation8], %s1577_s14 }
  0xaf   : > { %s429_s5 = sld [smem:[#allocation7 + %s1554_s12]]  ;;  %547 = vst [vmem:[#allocation3 + $0x59] sm:$0x1] %v546_v42  ;;  %v551_v43 = vld [vmem:[%s550_s8] sm:$0x1]  ;;  %s433_s2 = sadd.s32 1, %s1554_s12 }
  0xb0   : > { %s438_s27 = sadd.s32 2, %s1554_s12  ;;  %552 = vst [vmem:[#allocation3 + $0x5a] sm:$0x1] %v551_v43  ;;  %s434_s30 = sld [smem:[#allocation7 + %s433_s2]] }
  0xb1   : > { %s555_s16 = scalar_lea.vmem [#allocation8], %s554_s13  ;;  %s439_s18 = sld [smem:[#allocation7 + %s438_s27]] }
  0xb2   : > { %v556_v44 = vld [vmem:[%s555_s16] sm:$0x1]  ;;  %s443_s6 = sadd.s32 3, %s1554_s12  ;;  %s560_s11 = scalar_lea.vmem [#allocation8], %s559_s15 }
  0xb3   : > { %557 = vst [vmem:[#allocation3 + $0x5b] sm:$0x1] %v556_v44  ;;  %s444_s7 = sld [smem:[#allocation7 + %s443_s6]]  ;;  %v802_v45 = vld [vmem:[#allocation3 + $0x48] sm:$0xff]  ;;  %v561_v46 = vld [vmem:[%s560_s11] sm:$0x1] }
  0xb4   : > { %s448_s23 = sadd.s32 4, %s1554_s12  ;;  %817 = vmatpush.xpose.msrb.mxu0 %v802_v45  ;;  %562 = vst [vmem:[#allocation3 + $0x5c] sm:$0x1] %v561_v46  ;;  %v848_v47 = vld [vmem:[#allocation2 + $0x6] sm:$0x1]  ;;  %s635_s14 = scalar_lea.vmem [#allocation8], %s634_s4 }
  0xb5   : > { %v636_v48 = vld [vmem:[%s635_s14] sm:$0x1]  ;;  %867 = vmatmul.f32.vlgmr.msrb.gmra.mxu2 %v848_v47  ;;  %s449_s9 = sld [smem:[#allocation7 + %s448_s23]]  ;;  %s430_s13 = scalar_lea.vmem [#allocation8], %s429_s5 }
  0xb6   : > { %637 = vst [vmem:[#allocation2 + $0x7] sm:$0x1] %v636_v48  ;;  %v431_v49 = vld [vmem:[%s430_s13] sm:$0x1]  ;;  %s453_s19 = sadd.s32 5, %s1554_s12  ;;  %s435_s8 = scalar_lea.vmem [#allocation8], %s434_s30 }
  0xb7   : > { %432 = vst [vmem:[#allocation3 + $0x40] sm:$0x1] %v431_v49  ;;  %v436_v50 = vld [vmem:[%s435_s8] sm:$0x1]  ;;  %s454_s15 = sld [smem:[#allocation7 + %s453_s19]]  ;;  %s440_s2 = scalar_lea.vmem [#allocation8], %s439_s18 }
  0xb8   : > { %437 = vst [vmem:[#allocation3 + $0x41] sm:$0x1] %v436_v50  ;;  %v441_v51 = vld [vmem:[%s440_s2] sm:$0x1]  ;;  %s458_s27 = sadd.s32 6, %s1554_s12  ;;  %s463_s6 = sadd.s32 7, %s1554_s12 }
  0xb9   : > { %442 = vst [vmem:[#allocation3 + $0x42] sm:$0x1] %v441_v51  ;;  %s445_s4 = scalar_lea.vmem [#allocation8], %s444_s7  ;;  %s459_s16 = sld [smem:[#allocation7 + %s458_s27]] }
  0xba   : > { %v446_v52 = vld [vmem:[%s445_s4] sm:$0x1]  ;;  %s464_s5 = sld [smem:[#allocation7 + %s463_s6]]  ;;  %s503_s11 = sadd.s32 1, %s1568_s26 }
  0xbb   : > { %447 = vst [vmem:[#allocation3 + $0x43] sm:$0x1] %v446_v52  ;;  %v826_v53 = vld [vmem:[#allocation3 + $0x58] sm:$0xff]  ;;  %s499_s30 = sld [smem:[#allocation7 + %s1568_s26]]  ;;  %s450_s23 = scalar_lea.vmem [#allocation8], %s449_s9 }
  0xbc   : > { %841 = vmatpush.xpose.msrb.mxu1 %v826_v53  ;;  %v451_v55 = vld [vmem:[%s450_s23] sm:$0x1]  ;;  %s504_s18 = sld [smem:[#allocation7 + %s503_s11]]  ;;  %s508_s14 = sadd.s32 2, %s1568_s26 }
  0xbd   : > { %v872_v54 = vld [vmem:[#allocation2 + $0x7] sm:$0x1]  ;;  %452 = vst [vmem:[#allocation3 + $0x44] sm:$0x1] %v451_v55  ;;  %s509_s7 = sld [smem:[#allocation7 + %s508_s14]]  ;;  %s455_s13 = scalar_lea.vmem [#allocation8], %s454_s15 }
  0xbe   : > { %891 = vmatmul.f32.vlgmr.msrb.gmra.mxu3 %v872_v54  ;;  %v456_v56 = vld [vmem:[%s455_s13] sm:$0x1]  ;;  %s513_s12 = sadd.s32 3, %s1568_s26  ;;  %s518_s19 = sadd.s32 4, %s1568_s26 }
  0xbf   : > { %457 = vst [vmem:[#allocation3 + $0x45] sm:$0x1] %v456_v56  ;;  %s514_s8 = sld [smem:[#allocation7 + %s513_s12]]  ;;  %s460_s2 = scalar_lea.vmem [#allocation8], %s459_s16 }
  0xc0   : > { %v461_v57 = vld [vmem:[%s460_s2] sm:$0x1]  ;;  %s519_s27 = sld [smem:[#allocation7 + %s518_s19]]  ;;  %s465_s9 = scalar_lea.vmem [#allocation8], %s464_s5 }
  0xc1   : > { %462 = vst [vmem:[#allocation3 + $0x46] sm:$0x1] %v461_v57  ;;  %v466_v58 = vld [vmem:[%s465_s9] sm:$0x1]  ;;  %s523_s4 = sadd.s32 5, %s1568_s26  ;;  %s500_s6 = scalar_lea.vmem [#allocation8], %s499_s30 }
  0xc2   : > { %467 = vst [vmem:[#allocation3 + $0x47] sm:$0x1] %v466_v58  ;;  %v501_v59 = vld [vmem:[%s500_s6] sm:$0x1]  ;;  %s524_s11 = sld [smem:[#allocation7 + %s523_s4]]  ;;  %s505_s15 = scalar_lea.vmem [#allocation8], %s504_s18 }
  0xc3   : > { %502 = vst [vmem:[#allocation3 + $0x50] sm:$0x1] %v501_v59  ;;  %v506_v60 = vld [vmem:[%s505_s15] sm:$0x1]  ;;  %s528_s23 = sadd.s32 6, %s1568_s26  ;;  %s510_s14 = scalar_lea.vmem [#allocation8], %s509_s7 }
  0xc4   : > { %507 = vst [vmem:[#allocation3 + $0x51] sm:$0x1] %v506_v60  ;;  %v511_v61 = vld [vmem:[%s510_s14] sm:$0x1]  ;;  %s529_s16 = sld [smem:[#allocation7 + %s528_s23]]  ;;  %s533_s13 = sadd.s32 7, %s1568_s26 }
  0xc5   : > { %512 = vst [vmem:[#allocation3 + $0x52] sm:$0x1] %v511_v61  ;;  %s534_s12 = sld [smem:[#allocation7 + %s533_s13]]  ;;  %s515_s5 = scalar_lea.vmem [#allocation8], %s514_s8 }
  0xc6   : > { %v516_v62 = vld [vmem:[%s515_s5] sm:$0x1]  ;;  %s424_s19 = sld [smem:[#allocation6 + %s423_s25]]  ;;  %s520_s30 = scalar_lea.vmem [#allocation8], %s519_s27 }
  0xc7   : > { %517 = vst [vmem:[#allocation3 + $0x53] sm:$0x1] %v516_v62  ;;  %v521_v63 = vld [vmem:[%s520_s30] sm:$0x1]  ;;  %s494_s2 = sld [smem:[#allocation6 + %s493_s17]]  ;;  %s124_s10 = sand.u32 1, %s1285_s21  }
  0xc8   : > { %522 = vst [vmem:[#allocation3 + $0x54] sm:$0x1] %v521_v63  ;;  %s525_s18 = scalar_lea.vmem [#allocation8], %s524_s11  ;;  %s933_s9 = scalar_lea.hbm %s1649_s3, %s1348_s1 }
  0xc9   : > { %v801_v0 = vld [vmem:[#allocation3 + $0x40] sm:$0xff]  ;;  %v526_v1 = vld [vmem:[%s525_s18] sm:$0x1]  ;;  %s125_s4 = scalar_lea.vmem [#allocation11], %s124_s10  ;;  %s937_s11 = sshll.u32 %s933_s9, 4  ;;  %s938_s11 = int_to_ptr.hbm [resolvable:$true] %s937_s11 }
  0xca   : > { %818 = vmatpush.xpose.msrb.mxu0 %v801_v0  ;;  %527 = vst [vmem:[#allocation3 + $0x55] sm:$0x1] %v526_v1  ;;  %s530_s7 = scalar_lea.vmem [#allocation8], %s529_s16  ;;  %s935_s6 = sshll.u32 %s125_s4, 4  ;;  %s936_s6 = int_to_ptr.vmem [resolvable:$true] %s935_s6 }
  0xcb   : > { %v531_v2 = vld [vmem:[%s530_s7] sm:$0x1]  ;;  %s535_s26 = scalar_lea.vmem [#allocation8], %s534_s12  ;;  %s925_s15 = scalar_lea.sflag [#allocation10], %s124_s10 }
  0xcc   : > { %532 = vst [vmem:[#allocation3 + $0x56] sm:$0x1] %v531_v2  ;;  %v536_v3 = vld [vmem:[%s535_s26] sm:$0x1]  ;;  %s425_s8 = scalar_lea.vmem [#allocation8], %s424_s19  ;;  %s1239_s23 = sshra.s32 %s938_s11, 4  ;;  %s1240_s23 = int_to_ptr.hbm [resolvable:$true] %s1239_s23 }
  0xcd   : > { %537 = vst [vmem:[#allocation3 + $0x57] sm:$0x1] %v536_v3  ;;  %v426_v4 = vld [vmem:[%s425_s8] sm:$0x1]  ;;  %s495_s25 = scalar_lea.vmem [#allocation8], %s494_s2  ;;  %s1241_s14 = scalar_lea.hbm %s1240_s23, 1 }
  0xce   : > { %427 = vst [vmem:[#allocation2 + $0x4] sm:$0x1] %v426_v4  ;;  %v496_v5 = vld [vmem:[%s495_s25] sm:$0x1]  ;;  %p1242_p13 = scmp.ne.s32.totalorder %s1240_s23, %s1241_s14  ;;  %s1245_s13 = scalar_lea.hbm %s1649_s3, 4 }
  0xcf   : > { %497 = vst [vmem:[#allocation2 + $0x5] sm:$0x1] %v496_v5  ;;  %p1246_p2 = scmp.lt.s32.totalorder %s1240_s23, %s1649_s3  ;;  %p1247_p3 = scmp.lt.s32.totalorder %s1245_s13, %s1241_s14 }
  0xd0   : > { %p1243_p0 = pnand %p1242_p13, %p1365_p5 }
  0xd1   : > { %p1248_p4 = por %p1247_p3, %p1246_p2 }
  0xd2   : > { %p1244_p1 = pneg %p1243_p0 }
  0xd4   : > { %v825_v6 = vld [vmem:[#allocation3 + $0x50] sm:$0xff]  ;;  %p1249_p7 = pnand %p1248_p4, %p1244_p1 }
  0xd5   : > { %842 = vmatpush.xpose.msrb.mxu1 %v825_v6  ;;  %v800_v7 = vld [vmem:[#allocation2 + $0x4] sm:$0x1] }
  0xd6   : > { %819 = vmatmul.f32.vlgmr.msrb.gmra.mxu0 %v800_v7  ;;  %v824_v8 = vld [vmem:[#allocation2 + $0x5] sm:$0x1] }
  0xd8   : > { %843 = vmatmul.f32.vlgmr.msrb.gmra.mxu1 %v824_v8 }
  0xe3   : > { %v772_v9 = vpop.f32.mrf.mxu2 }
  0xe4   : > { %v796_v10 = vpop.f32.mrf.mxu3  ;;  %775 = vst.msk [vmem:[#allocation4 + $0x2] sm:$0x1] %vm726_vm0, %v772_v9 }
  0xe5   : > { %799 = vst.msk [vmem:[#allocation4 + $0x3] sm:$0x1] %vm726_vm0, %v796_v10 }
 0x126   : > { %v723_v11 = vpop.f32.mrf.mxu0 }
 0x127   : > { %727 = vst.msk [vmem:[#allocation4] sm:$0x1] %vm726_vm0, %v723_v11  ;;  %v748_v12 = vpop.f32.mrf.mxu1 }
 0x128   : > { %751 = vst.msk [vmem:[#allocation4 + $0x1] sm:$0x1] %vm726_vm0, %v748_v12 }
 0x138   : > { %v868_v13 = vpop.f32.mrf.mxu2 }
 0x139   : > { %871 = vst.msk [vmem:[#allocation4 + $0x6] sm:$0x1] %vm726_vm0, %v868_v13 }
 0x141   : > { %v892_v14 = vpop.f32.mrf.mxu3 }
 0x142   : > { %895 = vst.msk [vmem:[#allocation4 + $0x7] sm:$0x1] %vm726_vm0, %v892_v14 }
 0x153   : > { %v820_v15 = vpop.f32.mrf.mxu0 }
 0x154   : > { %823 = vst.msk [vmem:[#allocation4 + $0x4] sm:$0x1] %vm726_vm0, %v820_v15 }
 0x155   : > { %v844_v16 = vpop.f32.mrf.mxu1 }
 0x156   : > { %847 = vst.msk [vmem:[#allocation4 + $0x5] sm:$0x1] %vm726_vm0, %v844_v16 }
 0x15d   : > { %v896_v17 = vld [vmem:[#allocation4] sm:$0xff] }
 0x15e   : > { %v897_v18 = vrot.slane %v896_v17, 4 }
 0x160   : > { %v898_v19 = vmax.f32 %v896_v17, %v897_v18  ;;  %v904_v31 = vadd.f32 %v897_v18, %v896_v17 }
 0x162   : > { %v899_v20 = vrot.slane %v898_v19, 2  ;;  %v905_v34 = vrot.slane %v904_v31, 2 }
 0x164   : > { %v900_v21 = vmax.f32 %v898_v19, %v899_v20  ;;  %v906_v35 = vadd.f32 %v905_v34, %v904_v31 }
 0x166   : > { %v901_v22 = vrot.slane %v900_v21, 1  ;;  %v907_v37 = vrot.slane %v906_v35, 1 }
 0x168   : > { %v902_v23 = vmax.f32 %v900_v21, %v901_v22  ;;  %v908_v40 = vadd.f32 %v907_v37, %v906_v35 }
 0x16a   : > { %v909_v24 = vsub.f32 %v896_v17, %v902_v23 }
 0x16c   : > { %v910_v25 = vmul.f32 1.442695, %v909_v24 }
 0x16e   : > { %1167 = vpow2.f32 %v910_v25 }
 0x174   : > { %v1168_v26 = vpop.eup %1167 }
 0x175   : > { %v912_v27 = vrot.slane %v1168_v26, 4 }
 0x177   : > { %v913_v28 = vadd.f32 %v1168_v26, %v912_v27 }
 0x179   : > { %v914_v29 = vrot.slane %v913_v28, 2 }
 0x17b   : > { %v915_v30 = vadd.f32 %v914_v29, %v913_v28 }
 0x17d   : > { %v916_v32 = vrot.slane %v915_v30, 1 }
 0x17f   : > { %v917_v33 = vadd.f32 %v916_v32, %v915_v30 }
 0x181   : > { %1169 = vlog2.f32 %v917_v33 }
 0x187   : > { %v1170_v36 = vpop.eup %1169 }
 0x188   : > { %v919_v38 = vmul.f32 0.6931472, %v1170_v36 }
 0x18a   : > { %v920_v39 = vadd.f32 %v919_v38, %v902_v23 }
 0x18c   : > { %v921_v41 = vmul.f32 8.0, %v920_v39 }
 0x18e   : > { %v922_v42 = vsub.f32 %v921_v41, %v908_v40 }
 0x190   : > { %923 = vst [vmem:[%s125_s4] sm:$0x1] %v922_v42 }
 0x191   : > { %1252 = shalt.err (!%p1249_p7)
}
 0x192   : > { %1116 = dma.vmem_to_hbm [thread:$0]  (%p1365_p5), %s936_s6, 16, %s938_s11, %s925_s15  }
 0x193 PF: > { %p1128_p8 = scmp.ge.s32.totalorder %s1293_s22, 2  ;;  %s949_s19 = sand.u32 1, %s1281_s20  }
 0x194   : > { %s950_s30 = scalar_lea.sflag [#allocation10], %s949_s19 }
 0x195   : > { %p1123_p9 = pnand %p1128_p8, %p1369_p6 }
 0x197   : > { %p1124_p10 = pneg %p1123_p9 }
 0x199   : > { %1276 = dma.done.wait (%p1124_p10), %s950_s30, 16  }
 0x19a   : > { %1278 = vsyncadd (%p1124_p10), %s950_s30, 4294967280  ;;  %s1666_s2 = sld [smem:[#allocation15_spill]]  ;;  %p27_p11 = scmp.ge.s32.totalorder %s1352_s24, 6  }
 0x19b   : > { %s1667_s20 = smov %s1285_s21  ;;  %s1668_s21 = smov %s1289_s0 }
 0x19c   : > { %s1670_s22 = smov %s1352_s24  ;;  %29 = sbr.rel (!%p27_p11) target bundleno = 12 (0xc), region = 173 }
 0x1a0   : > { %s1669_s0 = smov %s1666_s2 }
 0x1a1   :  { %955 = vsyncpa [#allocation9], 1 }
 0x1a2   :  { %957 = vsyncpa [#allocation9 + $0x1], 1 }
 0x1a3   :  { %958 = vsyncpa [#allocation10], 1 }
 0x1a4   :  { %960 = vsyncpa [#allocation10 + $0x1], 1 }

</bundles_post_ra>
